<compile_context>
chip_gen: v5e
topology: v5e:2x2
jax: 0.10.0
libtpu: 0.0.40
codegen_flags: <defaults>
</compile_context>

<pallas_src>
import functools

import jax
import jax.numpy as jnp
import numpy as np
from jax import lax
from jax.experimental import pallas as pl
from jax.experimental.pallas import tpu as pltpu

SIZE = 9                      # Go board size fixed by the module (fc1 = 48*9*9)
C1 = 48                       # conv channels
FC1 = 512                     # fc1 width
NPOS = SIZE * SIZE            # 81 board positions
N_WCHUNK = 3                  # fc1 weight DMA'd in 3 chunks of 27 positions
POS_PER_CHUNK = NPOS // N_WCHUNK          # 27
ROWS_PER_CHUNK = POS_PER_CHUNK * C1       # 1296 contraction rows per chunk


# ---------------------------------------------------------------------------
# Host-side helpers (trace-time constants / trivial XLA glue in the wrapper).
# ---------------------------------------------------------------------------
def _tap_masks(nb):
    """(9, nb*81, 1) f32 validity mask per 3x3 tap (zero where the shifted
    board position falls off the 9x9 board).  Batch-independent pattern,
    replicated nb times per position (rows ordered r = p*nb + n)."""
    m = np.zeros((9, nb * NPOS, 1), np.float32)
    for ky in range(3):
        for kx in range(3):
            tap = ky * 3 + kx
            dy, dx = ky - 1, kx - 1
            for y in range(SIZE):
                for x in range(SIZE):
                    if 0 <= y + dy < SIZE and 0 <= x + dx < SIZE:
                        p = y * SIZE + x
                        m[tap, p * nb:(p + 1) * nb, 0] = 1.0
    return m


def _conv1_patches(x_nchw):
    """im2col for the 1-channel 3x3 'same' conv: (nb*81, 9) f32, rows ordered
    r = p*nb + n (position-major, batch interleaved)."""
    nb = x_nchw.shape[0]
    xp = jnp.pad(x_nchw[:, 0, :, :], ((0, 0), (1, 1), (1, 1)))       # (nb,11,11)
    cols = [xp[:, ky:ky + SIZE, kx:kx + SIZE].reshape(nb, NPOS)
            for ky in range(3) for kx in range(3)]
    pat = jnp.stack(cols, axis=-1)                                   # (nb,81,9)
    return pat.transpose(1, 0, 2).reshape(nb * NPOS, 9).astype(jnp.float32)


# ---------------------------------------------------------------------------
# Fused forward kernel.
# ---------------------------------------------------------------------------
def _gocnn_kernel(nb,
                  pat_ref, mask_ref, w1_ref, b1_ref, w2_ref, b2_ref,
                  wf1_hbm, scale_ref, bf1_ref, wf2_ref, bf2_ref,
                  out_ref,
                  y1pad_s, y2_s, wf1_s, dma_sem):
    rows = nb * NPOS
    guard = (SIZE + 1) * nb          # covers the largest tap shift (|dy*9+dx|<=10)

    # Kick off all fc1 int8 weight chunk DMAs immediately; waits are
    # interleaved with the fc1 accumulation loop below.
    for j in range(N_WCHUNK):
        pltpu.make_async_copy(wf1_hbm.at[j], wf1_s.at[j], dma_sem.at[j]).start()

    # ---- conv1 + sigmoid: one (rows, 9) @ (9, 48) f32 matmul ----------------
    y1 = jax.nn.sigmoid(
        jnp.dot(pat_ref[...], w1_ref[...], preferred_element_type=jnp.float32)
        + b1_ref[...])

    # Store y1 into a zero-guarded scratch so each 3x3 tap is a plain static
    # sublane-offset slice (no selector matmuls, batch-size independent).
    y1pad_s[...] = jnp.zeros((rows + 2 * guard, C1), jnp.float32)
    y1pad_s[pl.ds(guard, rows), :] = y1

    # ---- conv2 + sigmoid: per-tap shifted slice + x-boundary mask + matmul --
    acc = None
    for tap in range(9):
        dy, dx = tap // 3 - 1, tap % 3 - 1
        s = (dy * SIZE + dx) * nb
        shifted = y1pad_s[pl.ds(guard + s, rows), :]          # (rows, 48) f32
        if dx != 0:                       # guard rows already zero y-overflow
            shifted = shifted * mask_ref[tap]                 # (rows,1) bcast
        term = jnp.dot(shifted.astype(jnp.bfloat16), w2_ref[tap],
                       preferred_element_type=jnp.float32)
        acc = term if acc is None else acc + term
    y2_s[...] = jax.nn.sigmoid(acc + b2_ref[...])             # (rows, 48) f32

    # ---- fc1: accumulate over board positions (replaces flatten + big dot) --
    # torch NCHW flatten == per-position 48-row blocks of the pre-permuted wf1.
    z1 = jnp.zeros((nb, FC1), jnp.float32)
    for j in range(N_WCHUNK):
        # Weight chunk j holds rows for positions [27*j, 27*j + 27).
        pltpu.make_async_copy(wf1_hbm.at[j], wf1_s.at[j], dma_sem.at[j]).wait()

        def chunk_body(local, z, j=j):
            p = j * POS_PER_CHUNK + local
            a = y2_s[pl.ds(p * nb, nb), :].astype(jnp.bfloat16)       # (nb,48)
            w_start = pl.multiple_of(local * C1, 8)
            w = wf1_s[j, pl.ds(w_start, C1), :]                       # int8
            w = w.astype(jnp.float32).astype(jnp.bfloat16)            # exact
            return z + jnp.dot(a, w, preferred_element_type=jnp.float32)

        z1 = lax.fori_loop(0, POS_PER_CHUNK, chunk_body, z1)

    # Fold the per-column int8 dequant scale in once, then bias + sigmoid.
    z1 = jax.nn.sigmoid(z1 * scale_ref[...] + bf1_ref[...])

    # ---- fc2 + sigmoid ------------------------------------------------------
    z2 = jnp.dot(z1.astype(jnp.bfloat16), wf2_ref[...],
                 preferred_element_type=jnp.float32) + bf2_ref[...]
    out_ref[...] = jax.nn.sigmoid(z2)


# ---------------------------------------------------------------------------
# Forward wrapper: one grid-less pallas_call; only the int8 fc1 weight stays
# in HBM (manual chunked DMA inside the kernel).
# ---------------------------------------------------------------------------
@jax.jit
def go_cnn_forward(packed, x_nchw):
    nb = x_nchw.shape[0]
    rows = nb * NPOS
    guard = (SIZE + 1) * nb

    patches = _conv1_patches(x_nchw)                 # (rows, 9) f32, XLA glue
    masks = jnp.asarray(_tap_masks(nb))              # compile-time constant

    kernel = functools.partial(_gocnn_kernel, nb)
    vmem = pltpu.MemorySpace.VMEM
    return pl.pallas_call(
        kernel,
        out_shape=jax.ShapeDtypeStruct((nb, NPOS), jnp.float32),
        in_specs=[
            pl.BlockSpec(memory_space=vmem),    # conv1 im2col patches (rows,9)
            pl.BlockSpec(memory_space=vmem),    # conv2 tap validity masks
            pl.BlockSpec(memory_space=vmem),    # conv1 weight (9,48) f32
            pl.BlockSpec(memory_space=vmem),    # conv1 bias
            pl.BlockSpec(memory_space=vmem),    # conv2 taps (9,48,48) bf16
            pl.BlockSpec(memory_space=vmem),    # conv2 bias
            pl.BlockSpec(memory_space=pl.ANY),  # fc1 weight int8, stays in HBM
            pl.BlockSpec(memory_space=vmem),    # fc1 per-column dequant scale
            pl.BlockSpec(memory_space=vmem),    # fc1 bias
            pl.BlockSpec(memory_space=vmem),    # fc2 weight (512,81) bf16
            pl.BlockSpec(memory_space=vmem),    # fc2 bias
        ],
        out_specs=pl.BlockSpec(memory_space=vmem),
        scratch_shapes=[
            pltpu.VMEM((rows + 2 * guard, C1), jnp.float32),          # padded y1
            pltpu.VMEM((rows, C1), jnp.float32),                      # y2
            pltpu.VMEM((N_WCHUNK, ROWS_PER_CHUNK, FC1), jnp.int8),    # fc1 wq
            pltpu.SemaphoreType.DMA((N_WCHUNK,)),
        ],
    )(patches, masks, packed["w1"], packed["b1"], packed["w2"], packed["b2"],
      packed["wf1_q"], packed["wf1_scale"], packed["bf1"],
      packed["wf2"], packed["bf2"])


# ---------------------------------------------------------------------------
# Deterministic parameter init (PyTorch default-style) + one-time packing.
# ---------------------------------------------------------------------------
def init_params(key):
    def uniform(k, shape, fan_in):
        bound = 1.0 / jnp.sqrt(float(fan_in))
        return jax.random.uniform(k, shape, jnp.float32, -bound, bound)

    ks = jax.random.split(key, 8)
    return {
        "conv1_w": uniform(ks[0], (C1, 1, 3, 3), 1 * 9),
        "conv1_b": uniform(ks[1], (C1,), 1 * 9),
        "conv2_w": uniform(ks[2], (C1, C1, 3, 3), C1 * 9),
        "conv2_b": uniform(ks[3], (C1,), C1 * 9),
        "fc1_w": uniform(ks[4], (FC1, C1 * NPOS), C1 * NPOS),
        "fc1_b": uniform(ks[5], (FC1,), C1 * NPOS),
        "fc2_w": uniform(ks[6], (NPOS, FC1), FC1),
        "fc2_b": uniform(ks[7], (NPOS,), FC1),
    }


def pack_params(p):
    f32, bf16 = jnp.float32, jnp.bfloat16
    # fc1 weight rows permuted to ((y*9+x)*48 + c) so the kernel's per-position
    # accumulation matches torch's NCHW flatten, then int8 per-column quant.
    wf1 = jnp.transpose(p["fc1_w"].reshape(FC1, C1, SIZE, SIZE),
                        (2, 3, 1, 0)).reshape(NPOS * C1, FC1).astype(f32)
    scale = jnp.maximum(jnp.max(jnp.abs(wf1), axis=0, keepdims=True) / 127.0,
                        1e-12)                                       # (1, 512)
    wf1_q = jnp.clip(jnp.round(wf1 / scale), -127, 127).astype(jnp.int8)
    return {
        # conv taps reordered to [ky*3+kx, cin, cout]
        "w1": jnp.transpose(p["conv1_w"], (2, 3, 1, 0)).reshape(9, C1).astype(f32),
        "b1": p["conv1_b"].reshape(1, C1).astype(f32),
        "w2": jnp.transpose(p["conv2_w"], (2, 3, 1, 0)).reshape(9, C1, C1).astype(bf16),
        "b2": p["conv2_b"].reshape(1, C1).astype(f32),
        "wf1_q": wf1_q.reshape(N_WCHUNK, ROWS_PER_CHUNK, FC1),
        "wf1_scale": scale.astype(f32),
        "bf1": p["fc1_b"].reshape(1, FC1).astype(f32),
        "wf2": jnp.transpose(p["fc2_w"], (1, 0)).astype(bf16),
        "bf2": p["fc2_b"].reshape(1, NPOS).astype(f32),
    }


# Pure-JAX f32 reference (mirrors the PyTorch module) for a tolerance check.
def reference_forward(params, x):
    dn = ("NCHW", "OIHW", "NCHW")
    y = jax.lax.conv_general_dilated(x, params["conv1_w"], (1, 1),
                                     ((1, 1), (1, 1)), dimension_numbers=dn)
    y = jax.nn.sigmoid(y + params["conv1_b"].reshape(1, -1, 1, 1))
    y = jax.lax.conv_general_dilated(y, params["conv2_w"], (1, 1),
                                     ((1, 1), (1, 1)), dimension_numbers=dn)
    y = jax.nn.sigmoid(y + params["conv2_b"].reshape(1, -1, 1, 1))
    f = y.reshape(y.shape[0], -1)
    z1 = jax.nn.sigmoid(f @ params["fc1_w"].T + params["fc1_b"])
    return jax.nn.sigmoid(z1 @ params["fc2_w"].T + params["fc2_b"])


if __name__ == "__main__":
    key = jax.random.PRNGKey(0)
    kx, kp = jax.random.split(key)
    batch = 2
    # Input matches PyTorch NCHW: (batch=2, channels=1, 9, 9)
    x = jax.random.normal(kx, (batch, 1, SIZE, SIZE), jnp.float32)
    params = init_params(kp)
    packed = pack_params(params)

    out = go_cnn_forward(packed, x)
    jax.block_until_ready(out)

    ref = reference_forward(params, x)
    assert out.shape == (batch, SIZE * SIZE)
    assert bool(jnp.all((out >= 0.0) & (out <= 1.0)))
    max_err = float(jnp.max(jnp.abs(out - ref)))
    assert max_err < 5e-2, max_err   # bf16/int8-weight tolerance vs f32 reference
    print("KERNEL_OK")
</pallas_src>

<mosaic_0001>
module attributes {stable_mosaic.version = 11 : i64} {
  func.func @_gocnn_kernel(%arg0: memref<162x9xf32, #tpu.memory_space<vmem>>, %arg1: memref<9x162x1xf32, #tpu.memory_space<vmem>>, %arg2: memref<9x48xf32, #tpu.memory_space<vmem>>, %arg3: memref<1x48xf32, #tpu.memory_space<vmem>>, %arg4: memref<9x48x48xbf16, #tpu.memory_space<vmem>>, %arg5: memref<1x48xf32, #tpu.memory_space<vmem>>, %arg6: memref<3x1296x512xi8, #tpu.memory_space<any>>, %arg7: memref<1x512xf32, #tpu.memory_space<vmem>>, %arg8: memref<1x512xf32, #tpu.memory_space<vmem>>, %arg9: memref<512x81xbf16, #tpu.memory_space<vmem>>, %arg10: memref<1x81xf32, #tpu.memory_space<vmem>>, %arg11: memref<2x81xf32, #tpu.memory_space<vmem>>, %arg12: memref<202x48xf32, #tpu.memory_space<vmem>>, %arg13: memref<162x48xf32, #tpu.memory_space<vmem>>, %arg14: memref<3x1296x512xi8, #tpu.memory_space<vmem>>, %arg15: memref<3x!tpu.dma_semaphore, #tpu.memory_space<semaphore_mem>>) attributes {dimension_semantics = [], scalar_prefetch = 0 : i64, scratch_operands = 4 : i64, tpu.core_type = #tpu.core_type<tc>} {
    %c0_i32 = arith.constant 0 : i32
    %c0_i32_0 = arith.constant 0 : i32
    %c0_i32_1 = arith.constant 0 : i32
    %c0_i32_2 = arith.constant 0 : i32
    %c0_i32_3 = arith.constant 0 : i32
    %0 = tpu.memref_slice %arg6[%c0_i32, %c0_i32_2, %c0_i32_3] : memref<3x1296x512xi8, #tpu.memory_space<any>> -> memref<1x1296x512xi8, #tpu.memory_space<any>>
    %1 = tpu.memref_squeeze %0 : memref<1x1296x512xi8, #tpu.memory_space<any>> -> memref<1296x512xi8, #tpu.memory_space<any>>
    %c0_i32_4 = arith.constant 0 : i32
    %c0_i32_5 = arith.constant 0 : i32
    %2 = tpu.memref_slice %arg14[%c0_i32_0, %c0_i32_4, %c0_i32_5] : memref<3x1296x512xi8, #tpu.memory_space<vmem>> -> memref<1x1296x512xi8, #tpu.memory_space<vmem>>
    %3 = tpu.memref_squeeze %2 : memref<1x1296x512xi8, #tpu.memory_space<vmem>> -> memref<1296x512xi8, #tpu.memory_space<vmem>>
    %4 = tpu.memref_slice %arg15[%c0_i32_1] : memref<3x!tpu.dma_semaphore, #tpu.memory_space<semaphore_mem>> -> memref<1x!tpu.dma_semaphore, #tpu.memory_space<semaphore_mem>>
    %5 = tpu.memref_squeeze %4 : memref<1x!tpu.dma_semaphore, #tpu.memory_space<semaphore_mem>> -> memref<!tpu.dma_semaphore, #tpu.memory_space<semaphore_mem>>
    tpu.enqueue_dma source(%1 : memref<1296x512xi8, #tpu.memory_space<any>>) target(%3 : memref<1296x512xi8, #tpu.memory_space<vmem>>) target_semaphore(%5 : memref<!tpu.dma_semaphore, #tpu.memory_space<semaphore_mem>>)
    %c1_i32 = arith.constant 1 : i32
    %c1_i32_6 = arith.constant 1 : i32
    %c1_i32_7 = arith.constant 1 : i32
    %c0_i32_8 = arith.constant 0 : i32
    %c0_i32_9 = arith.constant 0 : i32
    %6 = tpu.memref_slice %arg6[%c1_i32, %c0_i32_8, %c0_i32_9] : memref<3x1296x512xi8, #tpu.memory_space<any>> -> memref<1x1296x512xi8, #tpu.memory_space<any>>
    %7 = tpu.memref_squeeze %6 : memref<1x1296x512xi8, #tpu.memory_space<any>> -> memref<1296x512xi8, #tpu.memory_space<any>>
    %c0_i32_10 = arith.constant 0 : i32
    %c0_i32_11 = arith.constant 0 : i32
    %8 = tpu.memref_slice %arg14[%c1_i32_6, %c0_i32_10, %c0_i32_11] : memref<3x1296x512xi8, #tpu.memory_space<vmem>> -> memref<1x1296x512xi8, #tpu.memory_space<vmem>>
    %9 = tpu.memref_squeeze %8 : memref<1x1296x512xi8, #tpu.memory_space<vmem>> -> memref<1296x512xi8, #tpu.memory_space<vmem>>
    %10 = tpu.memref_slice %arg15[%c1_i32_7] : memref<3x!tpu.dma_semaphore, #tpu.memory_space<semaphore_mem>> -> memref<1x!tpu.dma_semaphore, #tpu.memory_space<semaphore_mem>>
    %11 = tpu.memref_squeeze %10 : memref<1x!tpu.dma_semaphore, #tpu.memory_space<semaphore_mem>> -> memref<!tpu.dma_semaphore, #tpu.memory_space<semaphore_mem>>
    tpu.enqueue_dma source(%7 : memref<1296x512xi8, #tpu.memory_space<any>>) target(%9 : memref<1296x512xi8, #tpu.memory_space<vmem>>) target_semaphore(%11 : memref<!tpu.dma_semaphore, #tpu.memory_space<semaphore_mem>>)
    %c2_i32 = arith.constant 2 : i32
    %c2_i32_12 = arith.constant 2 : i32
    %c2_i32_13 = arith.constant 2 : i32
    %c0_i32_14 = arith.constant 0 : i32
    %c0_i32_15 = arith.constant 0 : i32
    %12 = tpu.memref_slice %arg6[%c2_i32, %c0_i32_14, %c0_i32_15] : memref<3x1296x512xi8, #tpu.memory_space<any>> -> memref<1x1296x512xi8, #tpu.memory_space<any>>
    %13 = tpu.memref_squeeze %12 : memref<1x1296x512xi8, #tpu.memory_space<any>> -> memref<1296x512xi8, #tpu.memory_space<any>>
    %c0_i32_16 = arith.constant 0 : i32
    %c0_i32_17 = arith.constant 0 : i32
    %14 = tpu.memref_slice %arg14[%c2_i32_12, %c0_i32_16, %c0_i32_17] : memref<3x1296x512xi8, #tpu.memory_space<vmem>> -> memref<1x1296x512xi8, #tpu.memory_space<vmem>>
    %15 = tpu.memref_squeeze %14 : memref<1x1296x512xi8, #tpu.memory_space<vmem>> -> memref<1296x512xi8, #tpu.memory_space<vmem>>
    %16 = tpu.memref_slice %arg15[%c2_i32_13] : memref<3x!tpu.dma_semaphore, #tpu.memory_space<semaphore_mem>> -> memref<1x!tpu.dma_semaphore, #tpu.memory_space<semaphore_mem>>
    %17 = tpu.memref_squeeze %16 : memref<1x!tpu.dma_semaphore, #tpu.memory_space<semaphore_mem>> -> memref<!tpu.dma_semaphore, #tpu.memory_space<semaphore_mem>>
    tpu.enqueue_dma source(%13 : memref<1296x512xi8, #tpu.memory_space<any>>) target(%15 : memref<1296x512xi8, #tpu.memory_space<vmem>>) target_semaphore(%17 : memref<!tpu.dma_semaphore, #tpu.memory_space<semaphore_mem>>)
    %c0 = arith.constant 0 : index
    %c0_18 = arith.constant 0 : index
    %18 = vector.load %arg0[%c0, %c0_18] : memref<162x9xf32, #tpu.memory_space<vmem>>, vector<162x9xf32>
    %c0_19 = arith.constant 0 : index
    %c0_20 = arith.constant 0 : index
    %19 = vector.load %arg2[%c0_19, %c0_20] : memref<9x48xf32, #tpu.memory_space<vmem>>, vector<9x48xf32>
    %cst = arith.constant dense<0.000000e+00> : vector<162x48xf32>
    %20 = tpu.matmul %18, %19, %cst {dimension_numbers = #tpu.dot_dimension_numbers<[1], [0], [0], [1], [0, 0, 1, 1], [], []>} : vector<162x9xf32>, vector<9x48xf32>, vector<162x48xf32> -> vector<162x48xf32>
    %c0_21 = arith.constant 0 : index
    %c0_22 = arith.constant 0 : index
    %21 = vector.load %arg3[%c0_21, %c0_22] : memref<1x48xf32, #tpu.memory_space<vmem>>, vector<1x48xf32>
    %22 = vector.broadcast %21 : vector<1x48xf32> to vector<162x48xf32>
    %23 = arith.addf %20, %22 : vector<162x48xf32>
    %24 = arith.negf %23 : vector<162x48xf32>
    %25 = math.exp %24 : vector<162x48xf32>
    %cst_23 = arith.constant 1.000000e+00 : f32
    %26 = vector.broadcast %cst_23 : f32 to vector<162x48xf32>
    %27 = arith.addf %26, %25 : vector<162x48xf32>
    %28 = arith.divf %26, %27 : vector<162x48xf32>
    %cst_24 = arith.constant 0.000000e+00 : f32
    %29 = vector.broadcast %cst_24 : f32 to vector<202x48xf32>
    %c0_25 = arith.constant 0 : index
    %c0_26 = arith.constant 0 : index
    %30 = vector.load %arg12[%c0_25, %c0_26] : memref<202x48xf32, #tpu.memory_space<vmem>>, vector<202x48xf32>
    tpu.vector_store %arg12[%c0_25, %c0_26], %29 {strides = array<i32>} : memref<202x48xf32, #tpu.memory_space<vmem>>, vector<202x48xf32>,
    %c20 = arith.constant 20 : index
    %c0_27 = arith.constant 0 : index
    %31 = vector.load %arg12[%c20, %c0_27] : memref<202x48xf32, #tpu.memory_space<vmem>>, vector<162x48xf32>
    tpu.vector_store %arg12[%c20, %c0_27], %28 {strides = array<i32>} : memref<202x48xf32, #tpu.memory_space<vmem>>, vector<162x48xf32>,
    %c0_28 = arith.constant 0 : index
    %c0_29 = arith.constant 0 : index
    %32 = vector.load %arg12[%c0_28, %c0_29] : memref<202x48xf32, #tpu.memory_space<vmem>>, vector<162x48xf32>
    %c0_30 = arith.constant 0 : index
    %c0_31 = arith.constant 0 : index
    %c0_32 = arith.constant 0 : index
    %33 = vector.load %arg1[%c0_30, %c0_31, %c0_32] : memref<9x162x1xf32, #tpu.memory_space<vmem>>, vector<1x162x1xf32>
    %34 = vector.shape_cast %33 : vector<1x162x1xf32> to vector<162x1xf32>
    %35 = vector.broadcast %34 : vector<162x1xf32> to vector<162x48xf32>
    %36 = arith.mulf %32, %35 : vector<162x48xf32>
    %37 = arith.truncf %36 : vector<162x48xf32> to vector<162x48xbf16>
    %c0_33 = arith.constant 0 : index
    %c0_34 = arith.constant 0 : index
    %c0_35 = arith.constant 0 : index
    %38 = vector.load %arg4[%c0_33, %c0_34, %c0_35] : memref<9x48x48xbf16, #tpu.memory_space<vmem>>, vector<1x48x48xbf16>
    %39 = vector.shape_cast %38 : vector<1x48x48xbf16> to vector<48x48xbf16>
    %cst_36 = arith.constant dense<0.000000e+00> : vector<162x48xf32>
    %40 = tpu.matmul %37, %39, %cst_36 {dimension_numbers = #tpu.dot_dimension_numbers<[1], [0], [0], [1], [0, 0, 1, 1], [], []>} : vector<162x48xbf16>, vector<48x48xbf16>, vector<162x48xf32> -> vector<162x48xf32>
    %c2 = arith.constant 2 : index
    %c0_37 = arith.constant 0 : index
    %41 = vector.load %arg12[%c2, %c0_37] : memref<202x48xf32, #tpu.memory_space<vmem>>, vector<162x48xf32>
    %42 = arith.truncf %41 : vector<162x48xf32> to vector<162x48xbf16>
    %c1 = arith.constant 1 : index
    %c0_38 = arith.constant 0 : index
    %c0_39 = arith.constant 0 : index
    %43 = vector.load %arg4[%c1, %c0_38, %c0_39] : memref<9x48x48xbf16, #tpu.memory_space<vmem>>, vector<1x48x48xbf16>
    %44 = vector.shape_cast %43 : vector<1x48x48xbf16> to vector<48x48xbf16>
    %cst_40 = arith.constant dense<0.000000e+00> : vector<162x48xf32>
    %45 = tpu.matmul %42, %44, %cst_40 {dimension_numbers = #tpu.dot_dimension_numbers<[1], [0], [0], [1], [0, 0, 1, 1], [], []>} : vector<162x48xbf16>, vector<48x48xbf16>, vector<162x48xf32> -> vector<162x48xf32>
    %46 = arith.addf %40, %45 : vector<162x48xf32>
    %c4 = arith.constant 4 : index
    %c0_41 = arith.constant 0 : index
    %47 = vector.load %arg12[%c4, %c0_41] : memref<202x48xf32, #tpu.memory_space<vmem>>, vector<162x48xf32>
    %c2_42 = arith.constant 2 : index
    %c0_43 = arith.constant 0 : index
    %c0_44 = arith.constant 0 : index
    %48 = vector.load %arg1[%c2_42, %c0_43, %c0_44] : memref<9x162x1xf32, #tpu.memory_space<vmem>>, vector<1x162x1xf32>
    %49 = vector.shape_cast %48 : vector<1x162x1xf32> to vector<162x1xf32>
    %50 = vector.broadcast %49 : vector<162x1xf32> to vector<162x48xf32>
    %51 = arith.mulf %47, %50 : vector<162x48xf32>
    %52 = arith.truncf %51 : vector<162x48xf32> to vector<162x48xbf16>
    %c2_45 = arith.constant 2 : index
    %c0_46 = arith.constant 0 : index
    %c0_47 = arith.constant 0 : index
    %53 = vector.load %arg4[%c2_45, %c0_46, %c0_47] : memref<9x48x48xbf16, #tpu.memory_space<vmem>>, vector<1x48x48xbf16>
    %54 = vector.shape_cast %53 : vector<1x48x48xbf16> to vector<48x48xbf16>
    %cst_48 = arith.constant dense<0.000000e+00> : vector<162x48xf32>
    %55 = tpu.matmul %52, %54, %cst_48 {dimension_numbers = #tpu.dot_dimension_numbers<[1], [0], [0], [1], [0, 0, 1, 1], [], []>} : vector<162x48xbf16>, vector<48x48xbf16>, vector<162x48xf32> -> vector<162x48xf32>
    %56 = arith.addf %46, %55 : vector<162x48xf32>
    %c18 = arith.constant 18 : index
    %c0_49 = arith.constant 0 : index
    %57 = vector.load %arg12[%c18, %c0_49] : memref<202x48xf32, #tpu.memory_space<vmem>>, vector<162x48xf32>
    %c3 = arith.constant 3 : index
    %c0_50 = arith.constant 0 : index
    %c0_51 = arith.constant 0 : index
    %58 = vector.load %arg1[%c3, %c0_50, %c0_51] : memref<9x162x1xf32, #tpu.memory_space<vmem>>, vector<1x162x1xf32>
    %59 = vector.shape_cast %58 : vector<1x162x1xf32> to vector<162x1xf32>
    %60 = vector.broadcast %59 : vector<162x1xf32> to vector<162x48xf32>
    %61 = arith.mulf %57, %60 : vector<162x48xf32>
    %62 = arith.truncf %61 : vector<162x48xf32> to vector<162x48xbf16>
    %c3_52 = arith.constant 3 : index
    %c0_53 = arith.constant 0 : index
    %c0_54 = arith.constant 0 : index
    %63 = vector.load %arg4[%c3_52, %c0_53, %c0_54] : memref<9x48x48xbf16, #tpu.memory_space<vmem>>, vector<1x48x48xbf16>
    %64 = vector.shape_cast %63 : vector<1x48x48xbf16> to vector<48x48xbf16>
    %cst_55 = arith.constant dense<0.000000e+00> : vector<162x48xf32>
    %65 = tpu.matmul %62, %64, %cst_55 {dimension_numbers = #tpu.dot_dimension_numbers<[1], [0], [0], [1], [0, 0, 1, 1], [], []>} : vector<162x48xbf16>, vector<48x48xbf16>, vector<162x48xf32> -> vector<162x48xf32>
    %66 = arith.addf %56, %65 : vector<162x48xf32>
    %c20_56 = arith.constant 20 : index
    %c0_57 = arith.constant 0 : index
    %67 = vector.load %arg12[%c20_56, %c0_57] : memref<202x48xf32, #tpu.memory_space<vmem>>, vector<162x48xf32>
    %68 = arith.truncf %67 : vector<162x48xf32> to vector<162x48xbf16>
    %c4_58 = arith.constant 4 : index
    %c0_59 = arith.constant 0 : index
    %c0_60 = arith.constant 0 : index
    %69 = vector.load %arg4[%c4_58, %c0_59, %c0_60] : memref<9x48x48xbf16, #tpu.memory_space<vmem>>, vector<1x48x48xbf16>
    %70 = vector.shape_cast %69 : vector<1x48x48xbf16> to vector<48x48xbf16>
    %cst_61 = arith.constant dense<0.000000e+00> : vector<162x48xf32>
    %71 = tpu.matmul %68, %70, %cst_61 {dimension_numbers = #tpu.dot_dimension_numbers<[1], [0], [0], [1], [0, 0, 1, 1], [], []>} : vector<162x48xbf16>, vector<48x48xbf16>, vector<162x48xf32> -> vector<162x48xf32>
    %72 = arith.addf %66, %71 : vector<162x48xf32>
    %c22 = arith.constant 22 : index
    %c0_62 = arith.constant 0 : index
    %73 = vector.load %arg12[%c22, %c0_62] : memref<202x48xf32, #tpu.memory_space<vmem>>, vector<162x48xf32>
    %c5 = arith.constant 5 : index
    %c0_63 = arith.constant 0 : index
    %c0_64 = arith.constant 0 : index
    %74 = vector.load %arg1[%c5, %c0_63, %c0_64] : memref<9x162x1xf32, #tpu.memory_space<vmem>>, vector<1x162x1xf32>
    %75 = vector.shape_cast %74 : vector<1x162x1xf32> to vector<162x1xf32>
    %76 = vector.broadcast %75 : vector<162x1xf32> to vector<162x48xf32>
    %77 = arith.mulf %73, %76 : vector<162x48xf32>
    %78 = arith.truncf %77 : vector<162x48xf32> to vector<162x48xbf16>
    %c5_65 = arith.constant 5 : index
    %c0_66 = arith.constant 0 : index
    %c0_67 = arith.constant 0 : index
    %79 = vector.load %arg4[%c5_65, %c0_66, %c0_67] : memref<9x48x48xbf16, #tpu.memory_space<vmem>>, vector<1x48x48xbf16>
    %80 = vector.shape_cast %79 : vector<1x48x48xbf16> to vector<48x48xbf16>
    %cst_68 = arith.constant dense<0.000000e+00> : vector<162x48xf32>
    %81 = tpu.matmul %78, %80, %cst_68 {dimension_numbers = #tpu.dot_dimension_numbers<[1], [0], [0], [1], [0, 0, 1, 1], [], []>} : vector<162x48xbf16>, vector<48x48xbf16>, vector<162x48xf32> -> vector<162x48xf32>
    %82 = arith.addf %72, %81 : vector<162x48xf32>
    %c36 = arith.constant 36 : index
    %c0_69 = arith.constant 0 : index
    %83 = vector.load %arg12[%c36, %c0_69] : memref<202x48xf32, #tpu.memory_space<vmem>>, vector<162x48xf32>
    %c6 = arith.constant 6 : index
    %c0_70 = arith.constant 0 : index
    %c0_71 = arith.constant 0 : index
    %84 = vector.load %arg1[%c6, %c0_70, %c0_71] : memref<9x162x1xf32, #tpu.memory_space<vmem>>, vector<1x162x1xf32>
    %85 = vector.shape_cast %84 : vector<1x162x1xf32> to vector<162x1xf32>
    %86 = vector.broadcast %85 : vector<162x1xf32> to vector<162x48xf32>
    %87 = arith.mulf %83, %86 : vector<162x48xf32>
    %88 = arith.truncf %87 : vector<162x48xf32> to vector<162x48xbf16>
    %c6_72 = arith.constant 6 : index
    %c0_73 = arith.constant 0 : index
    %c0_74 = arith.constant 0 : index
    %89 = vector.load %arg4[%c6_72, %c0_73, %c0_74] : memref<9x48x48xbf16, #tpu.memory_space<vmem>>, vector<1x48x48xbf16>
    %90 = vector.shape_cast %89 : vector<1x48x48xbf16> to vector<48x48xbf16>
    %cst_75 = arith.constant dense<0.000000e+00> : vector<162x48xf32>
    %91 = tpu.matmul %88, %90, %cst_75 {dimension_numbers = #tpu.dot_dimension_numbers<[1], [0], [0], [1], [0, 0, 1, 1], [], []>} : vector<162x48xbf16>, vector<48x48xbf16>, vector<162x48xf32> -> vector<162x48xf32>
    %92 = arith.addf %82, %91 : vector<162x48xf32>
    %c38 = arith.constant 38 : index
    %c0_76 = arith.constant 0 : index
    %93 = vector.load %arg12[%c38, %c0_76] : memref<202x48xf32, #tpu.memory_space<vmem>>, vector<162x48xf32>
    %94 = arith.truncf %93 : vector<162x48xf32> to vector<162x48xbf16>
    %c7 = arith.constant 7 : index
    %c0_77 = arith.constant 0 : index
    %c0_78 = arith.constant 0 : index
    %95 = vector.load %arg4[%c7, %c0_77, %c0_78] : memref<9x48x48xbf16, #tpu.memory_space<vmem>>, vector<1x48x48xbf16>
    %96 = vector.shape_cast %95 : vector<1x48x48xbf16> to vector<48x48xbf16>
    %cst_79 = arith.constant dense<0.000000e+00> : vector<162x48xf32>
    %97 = tpu.matmul %94, %96, %cst_79 {dimension_numbers = #tpu.dot_dimension_numbers<[1], [0], [0], [1], [0, 0, 1, 1], [], []>} : vector<162x48xbf16>, vector<48x48xbf16>, vector<162x48xf32> -> vector<162x48xf32>
    %98 = arith.addf %92, %97 : vector<162x48xf32>
    %c40 = arith.constant 40 : index
    %c0_80 = arith.constant 0 : index
    %99 = vector.load %arg12[%c40, %c0_80] : memref<202x48xf32, #tpu.memory_space<vmem>>, vector<162x48xf32>
    %c8 = arith.constant 8 : index
    %c0_81 = arith.constant 0 : index
    %c0_82 = arith.constant 0 : index
    %100 = vector.load %arg1[%c8, %c0_81, %c0_82] : memref<9x162x1xf32, #tpu.memory_space<vmem>>, vector<1x162x1xf32>
    %101 = vector.shape_cast %100 : vector<1x162x1xf32> to vector<162x1xf32>
    %102 = vector.broadcast %101 : vector<162x1xf32> to vector<162x48xf32>
    %103 = arith.mulf %99, %102 : vector<162x48xf32>
    %104 = arith.truncf %103 : vector<162x48xf32> to vector<162x48xbf16>
    %c8_83 = arith.constant 8 : index
    %c0_84 = arith.constant 0 : index
    %c0_85 = arith.constant 0 : index
    %105 = vector.load %arg4[%c8_83, %c0_84, %c0_85] : memref<9x48x48xbf16, #tpu.memory_space<vmem>>, vector<1x48x48xbf16>
    %106 = vector.shape_cast %105 : vector<1x48x48xbf16> to vector<48x48xbf16>
    %cst_86 = arith.constant dense<0.000000e+00> : vector<162x48xf32>
    %107 = tpu.matmul %104, %106, %cst_86 {dimension_numbers = #tpu.dot_dimension_numbers<[1], [0], [0], [1], [0, 0, 1, 1], [], []>} : vector<162x48xbf16>, vector<48x48xbf16>, vector<162x48xf32> -> vector<162x48xf32>
    %108 = arith.addf %98, %107 : vector<162x48xf32>
    %c0_87 = arith.constant 0 : index
    %c0_88 = arith.constant 0 : index
    %109 = vector.load %arg5[%c0_87, %c0_88] : memref<1x48xf32, #tpu.memory_space<vmem>>, vector<1x48xf32>
    %110 = vector.broadcast %109 : vector<1x48xf32> to vector<162x48xf32>
    %111 = arith.addf %108, %110 : vector<162x48xf32>
    %112 = arith.negf %111 : vector<162x48xf32>
    %113 = math.exp %112 : vector<162x48xf32>
    %cst_89 = arith.constant 1.000000e+00 : f32
    %114 = vector.broadcast %cst_89 : f32 to vector<162x48xf32>
    %115 = arith.addf %114, %113 : vector<162x48xf32>
    %116 = arith.divf %114, %115 : vector<162x48xf32>
    %c0_90 = arith.constant 0 : index
    %c0_91 = arith.constant 0 : index
    %117 = vector.load %arg13[%c0_90, %c0_91] : memref<162x48xf32, #tpu.memory_space<vmem>>, vector<162x48xf32>
    tpu.vector_store %arg13[%c0_90, %c0_91], %116 {strides = array<i32>} : memref<162x48xf32, #tpu.memory_space<vmem>>, vector<162x48xf32>,
    %cst_92 = arith.constant 0.000000e+00 : f32
    %118 = vector.broadcast %cst_92 : f32 to vector<2x512xf32>
    %c0_i32_93 = arith.constant 0 : i32
    %c0_i32_94 = arith.constant 0 : i32
    %c0_i32_95 = arith.constant 0 : i32
    %c0_i32_96 = arith.constant 0 : i32
    %c0_i32_97 = arith.constant 0 : i32
    %119 = tpu.memref_slice %arg6[%c0_i32_93, %c0_i32_96, %c0_i32_97] : memref<3x1296x512xi8, #tpu.memory_space<any>> -> memref<1x1296x512xi8, #tpu.memory_space<any>>
    %120 = tpu.memref_squeeze %119 : memref<1x1296x512xi8, #tpu.memory_space<any>> -> memref<1296x512xi8, #tpu.memory_space<any>>
    %c0_i32_98 = arith.constant 0 : i32
    %c0_i32_99 = arith.constant 0 : i32
    %121 = tpu.memref_slice %arg14[%c0_i32_94, %c0_i32_98, %c0_i32_99] : memref<3x1296x512xi8, #tpu.memory_space<vmem>> -> memref<1x1296x512xi8, #tpu.memory_space<vmem>>
    %122 = tpu.memref_squeeze %121 : memref<1x1296x512xi8, #tpu.memory_space<vmem>> -> memref<1296x512xi8, #tpu.memory_space<vmem>>
    %123 = tpu.memref_slice %arg15[%c0_i32_95] : memref<3x!tpu.dma_semaphore, #tpu.memory_space<semaphore_mem>> -> memref<1x!tpu.dma_semaphore, #tpu.memory_space<semaphore_mem>>
    %124 = tpu.memref_squeeze %123 : memref<1x!tpu.dma_semaphore, #tpu.memory_space<semaphore_mem>> -> memref<!tpu.dma_semaphore, #tpu.memory_space<semaphore_mem>>
    tpu.wait_dma2 semaphore(%124 : memref<!tpu.dma_semaphore, #tpu.memory_space<semaphore_mem>>) src(%120 : memref<1296x512xi8, #tpu.memory_space<any>>) dst(%122 : memref<1296x512xi8, #tpu.memory_space<vmem>>)
    %c0_i32_100 = arith.constant 0 : i32
    %c27_i32 = arith.constant 27 : i32
    %125 = arith.addi %c0_i32_100, %c27_i32 : i32
    %c1_i32_101 = arith.constant 1 : i32
    %126 = scf.for %arg16 = %c0_i32_100 to %125 step %c1_i32_101 iter_args(%arg17 = %118) -> (vector<2x512xf32>)  : i32 {
      %c0_i32_138 = arith.constant 0 : i32
      %166 = arith.addi %c0_i32_138, %arg16 : i32
      %c2_i32_139 = arith.constant 2 : i32
      %167 = arith.muli %166, %c2_i32_139 : i32
      %168 = arith.index_cast %167 : i32 to index
      %c0_140 = arith.constant 0 : index
      %169 = vector.load %arg13[%168, %c0_140] : memref<162x48xf32, #tpu.memory_space<vmem>>, vector<2x48xf32>
      %170 = arith.truncf %169 : vector<2x48xf32> to vector<2x48xbf16>
      %c48_i32 = arith.constant 48 : i32
      %171 = arith.muli %arg16, %c48_i32 : i32
      %172 = tpu.assume_multiple %171, 8 : i32
      %c0_141 = arith.constant 0 : index
      %173 = arith.index_cast %172 : i32 to index
      %c0_142 = arith.constant 0 : index
      %174 = vector.load %arg14[%c0_141, %173, %c0_142] : memref<3x1296x512xi8, #tpu.memory_space<vmem>>, vector<1x48x512xi8>
      %175 = vector.shape_cast %174 : vector<1x48x512xi8> to vector<48x512xi8>
      %176 = arith.sitofp %175 : vector<48x512xi8> to vector<48x512xf32>
      %177 = arith.truncf %176 : vector<48x512xf32> to vector<48x512xbf16>
      %cst_143 = arith.constant dense<0.000000e+00> : vector<2x512xf32>
      %178 = tpu.matmul %170, %177, %cst_143 {dimension_numbers = #tpu.dot_dimension_numbers<[1], [0], [0], [1], [0, 0, 1, 1], [], []>} : vector<2x48xbf16>, vector<48x512xbf16>, vector<2x512xf32> -> vector<2x512xf32>
      %179 = arith.addf %arg17, %178 : vector<2x512xf32>
      scf.yield %179 : vector<2x512xf32>
    }
    %c27_i32_102 = arith.constant 27 : i32
    %c1_i32_103 = arith.constant 1 : i32
    %c1_i32_104 = arith.constant 1 : i32
    %c1_i32_105 = arith.constant 1 : i32
    %c0_i32_106 = arith.constant 0 : i32
    %c0_i32_107 = arith.constant 0 : i32
    %127 = tpu.memref_slice %arg6[%c1_i32_103, %c0_i32_106, %c0_i32_107] : memref<3x1296x512xi8, #tpu.memory_space<any>> -> memref<1x1296x512xi8, #tpu.memory_space<any>>
    %128 = tpu.memref_squeeze %127 : memref<1x1296x512xi8, #tpu.memory_space<any>> -> memref<1296x512xi8, #tpu.memory_space<any>>
    %c0_i32_108 = arith.constant 0 : i32
    %c0_i32_109 = arith.constant 0 : i32
    %129 = tpu.memref_slice %arg14[%c1_i32_104, %c0_i32_108, %c0_i32_109] : memref<3x1296x512xi8, #tpu.memory_space<vmem>> -> memref<1x1296x512xi8, #tpu.memory_space<vmem>>
    %130 = tpu.memref_squeeze %129 : memref<1x1296x512xi8, #tpu.memory_space<vmem>> -> memref<1296x512xi8, #tpu.memory_space<vmem>>
    %131 = tpu.memref_slice %arg15[%c1_i32_105] : memref<3x!tpu.dma_semaphore, #tpu.memory_space<semaphore_mem>> -> memref<1x!tpu.dma_semaphore, #tpu.memory_space<semaphore_mem>>
    %132 = tpu.memref_squeeze %131 : memref<1x!tpu.dma_semaphore, #tpu.memory_space<semaphore_mem>> -> memref<!tpu.dma_semaphore, #tpu.memory_space<semaphore_mem>>
    tpu.wait_dma2 semaphore(%132 : memref<!tpu.dma_semaphore, #tpu.memory_space<semaphore_mem>>) src(%128 : memref<1296x512xi8, #tpu.memory_space<any>>) dst(%130 : memref<1296x512xi8, #tpu.memory_space<vmem>>)
    %c0_i32_110 = arith.constant 0 : i32
    %c27_i32_111 = arith.constant 27 : i32
    %133 = arith.addi %c0_i32_110, %c27_i32_111 : i32
    %c1_i32_112 = arith.constant 1 : i32
    %134 = scf.for %arg16 = %c0_i32_110 to %133 step %c1_i32_112 iter_args(%arg17 = %126) -> (vector<2x512xf32>)  : i32 {
      %c27_i32_138 = arith.constant 27 : i32
      %166 = arith.addi %c27_i32_138, %arg16 : i32
      %c2_i32_139 = arith.constant 2 : i32
      %167 = arith.muli %166, %c2_i32_139 : i32
      %168 = arith.index_cast %167 : i32 to index
      %c0_140 = arith.constant 0 : index
      %169 = vector.load %arg13[%168, %c0_140] : memref<162x48xf32, #tpu.memory_space<vmem>>, vector<2x48xf32>
      %170 = arith.truncf %169 : vector<2x48xf32> to vector<2x48xbf16>
      %c48_i32 = arith.constant 48 : i32
      %171 = arith.muli %arg16, %c48_i32 : i32
      %172 = tpu.assume_multiple %171, 8 : i32
      %c1_141 = arith.constant 1 : index
      %173 = arith.index_cast %172 : i32 to index
      %c0_142 = arith.constant 0 : index
      %174 = vector.load %arg14[%c1_141, %173, %c0_142] : memref<3x1296x512xi8, #tpu.memory_space<vmem>>, vector<1x48x512xi8>
      %175 = vector.shape_cast %174 : vector<1x48x512xi8> to vector<48x512xi8>
      %176 = arith.sitofp %175 : vector<48x512xi8> to vector<48x512xf32>
      %177 = arith.truncf %176 : vector<48x512xf32> to vector<48x512xbf16>
      %cst_143 = arith.constant dense<0.000000e+00> : vector<2x512xf32>
      %178 = tpu.matmul %170, %177, %cst_143 {dimension_numbers = #tpu.dot_dimension_numbers<[1], [0], [0], [1], [0, 0, 1, 1], [], []>} : vector<2x48xbf16>, vector<48x512xbf16>, vector<2x512xf32> -> vector<2x512xf32>
      %179 = arith.addf %arg17, %178 : vector<2x512xf32>
      scf.yield %179 : vector<2x512xf32>
    }
    %c27_i32_113 = arith.constant 27 : i32
    %c2_i32_114 = arith.constant 2 : i32
    %c2_i32_115 = arith.constant 2 : i32
    %c2_i32_116 = arith.constant 2 : i32
    %c0_i32_117 = arith.constant 0 : i32
    %c0_i32_118 = arith.constant 0 : i32
    %135 = tpu.memref_slice %arg6[%c2_i32_114, %c0_i32_117, %c0_i32_118] : memref<3x1296x512xi8, #tpu.memory_space<any>> -> memref<1x1296x512xi8, #tpu.memory_space<any>>
    %136 = tpu.memref_squeeze %135 : memref<1x1296x512xi8, #tpu.memory_space<any>> -> memref<1296x512xi8, #tpu.memory_space<any>>
    %c0_i32_119 = arith.constant 0 : i32
    %c0_i32_120 = arith.constant 0 : i32
    %137 = tpu.memref_slice %arg14[%c2_i32_115, %c0_i32_119, %c0_i32_120] : memref<3x1296x512xi8, #tpu.memory_space<vmem>> -> memref<1x1296x512xi8, #tpu.memory_space<vmem>>
    %138 = tpu.memref_squeeze %137 : memref<1x1296x512xi8, #tpu.memory_space<vmem>> -> memref<1296x512xi8, #tpu.memory_space<vmem>>
    %139 = tpu.memref_slice %arg15[%c2_i32_116] : memref<3x!tpu.dma_semaphore, #tpu.memory_space<semaphore_mem>> -> memref<1x!tpu.dma_semaphore, #tpu.memory_space<semaphore_mem>>
    %140 = tpu.memref_squeeze %139 : memref<1x!tpu.dma_semaphore, #tpu.memory_space<semaphore_mem>> -> memref<!tpu.dma_semaphore, #tpu.memory_space<semaphore_mem>>
    tpu.wait_dma2 semaphore(%140 : memref<!tpu.dma_semaphore, #tpu.memory_space<semaphore_mem>>) src(%136 : memref<1296x512xi8, #tpu.memory_space<any>>) dst(%138 : memref<1296x512xi8, #tpu.memory_space<vmem>>)
    %c0_i32_121 = arith.constant 0 : i32
    %c27_i32_122 = arith.constant 27 : i32
    %141 = arith.addi %c0_i32_121, %c27_i32_122 : i32
    %c1_i32_123 = arith.constant 1 : i32
    %142 = scf.for %arg16 = %c0_i32_121 to %141 step %c1_i32_123 iter_args(%arg17 = %134) -> (vector<2x512xf32>)  : i32 {
      %c54_i32 = arith.constant 54 : i32
      %166 = arith.addi %c54_i32, %arg16 : i32
      %c2_i32_138 = arith.constant 2 : i32
      %167 = arith.muli %166, %c2_i32_138 : i32
      %168 = arith.index_cast %167 : i32 to index
      %c0_139 = arith.constant 0 : index
      %169 = vector.load %arg13[%168, %c0_139] : memref<162x48xf32, #tpu.memory_space<vmem>>, vector<2x48xf32>
      %170 = arith.truncf %169 : vector<2x48xf32> to vector<2x48xbf16>
      %c48_i32 = arith.constant 48 : i32
      %171 = arith.muli %arg16, %c48_i32 : i32
      %172 = tpu.assume_multiple %171, 8 : i32
      %c2_140 = arith.constant 2 : index
      %173 = arith.index_cast %172 : i32 to index
      %c0_141 = arith.constant 0 : index
      %174 = vector.load %arg14[%c2_140, %173, %c0_141] : memref<3x1296x512xi8, #tpu.memory_space<vmem>>, vector<1x48x512xi8>
      %175 = vector.shape_cast %174 : vector<1x48x512xi8> to vector<48x512xi8>
      %176 = arith.sitofp %175 : vector<48x512xi8> to vector<48x512xf32>
      %177 = arith.truncf %176 : vector<48x512xf32> to vector<48x512xbf16>
      %cst_142 = arith.constant dense<0.000000e+00> : vector<2x512xf32>
      %178 = tpu.matmul %170, %177, %cst_142 {dimension_numbers = #tpu.dot_dimension_numbers<[1], [0], [0], [1], [0, 0, 1, 1], [], []>} : vector<2x48xbf16>, vector<48x512xbf16>, vector<2x512xf32> -> vector<2x512xf32>
      %179 = arith.addf %arg17, %178 : vector<2x512xf32>
      scf.yield %179 : vector<2x512xf32>
    }
    %c27_i32_124 = arith.constant 27 : i32
    %c0_125 = arith.constant 0 : index
    %c0_126 = arith.constant 0 : index
    %143 = vector.load %arg7[%c0_125, %c0_126] : memref<1x512xf32, #tpu.memory_space<vmem>>, vector<1x512xf32>
    %144 = vector.broadcast %143 : vector<1x512xf32> to vector<2x512xf32>
    %145 = arith.mulf %142, %144 : vector<2x512xf32>
    %c0_127 = arith.constant 0 : index
    %c0_128 = arith.constant 0 : index
    %146 = vector.load %arg8[%c0_127, %c0_128] : memref<1x512xf32, #tpu.memory_space<vmem>>, vector<1x512xf32>
    %147 = vector.broadcast %146 : vector<1x512xf32> to vector<2x512xf32>
    %148 = arith.addf %145, %147 : vector<2x512xf32>
    %149 = arith.negf %148 : vector<2x512xf32>
    %150 = math.exp %149 : vector<2x512xf32>
    %cst_129 = arith.constant 1.000000e+00 : f32
    %151 = vector.broadcast %cst_129 : f32 to vector<2x512xf32>
    %152 = arith.addf %151, %150 : vector<2x512xf32>
    %153 = arith.divf %151, %152 : vector<2x512xf32>
    %154 = arith.truncf %153 : vector<2x512xf32> to vector<2x512xbf16>
    %c0_130 = arith.constant 0 : index
    %c0_131 = arith.constant 0 : index
    %155 = vector.load %arg9[%c0_130, %c0_131] : memref<512x81xbf16, #tpu.memory_space<vmem>>, vector<512x81xbf16>
    %cst_132 = arith.constant dense<0.000000e+00> : vector<2x81xf32>
    %156 = tpu.matmul %154, %155, %cst_132 {dimension_numbers = #tpu.dot_dimension_numbers<[1], [0], [0], [1], [0, 0, 1, 1], [], []>} : vector<2x512xbf16>, vector<512x81xbf16>, vector<2x81xf32> -> vector<2x81xf32>
    %c0_133 = arith.constant 0 : index
    %c0_134 = arith.constant 0 : index
    %157 = vector.load %arg10[%c0_133, %c0_134] : memref<1x81xf32, #tpu.memory_space<vmem>>, vector<1x81xf32>
    %158 = vector.broadcast %157 : vector<1x81xf32> to vector<2x81xf32>
    %159 = arith.addf %156, %158 : vector<2x81xf32>
    %160 = arith.negf %159 : vector<2x81xf32>
    %161 = math.exp %160 : vector<2x81xf32>
    %cst_135 = arith.constant 1.000000e+00 : f32
    %162 = vector.broadcast %cst_135 : f32 to vector<2x81xf32>
    %163 = arith.addf %162, %161 : vector<2x81xf32>
    %164 = arith.divf %162, %163 : vector<2x81xf32>
    %c0_136 = arith.constant 0 : index
    %c0_137 = arith.constant 0 : index
    %165 = vector.load %arg11[%c0_136, %c0_137] : memref<2x81xf32, #tpu.memory_space<vmem>>, vector<2x81xf32>
    tpu.vector_store %arg11[%c0_136, %c0_137], %164 {strides = array<i32>} : memref<2x81xf32, #tpu.memory_space<vmem>>, vector<2x81xf32>,
    return
  }
}

</mosaic_0001>

<bundles_post_ra>
// kernel: go_cnn_forward.1
= control target key start
LH: loop header
LB: loop body
LE: loop exit
PB: predicated region body
PF: predicated region fallthrough
CT: control target
= control target key end

     0   :  { %16 = vsyncpa [#allocation7], 0  ;;  %s8380_s0 = inlined_call_operand.vmem [shape: f32[162,9], index: 0, kind: input, shape index: {}]   ;;  %s8381_s1 = inlined_call_operand.hbm [shape: f32[9,162,1], index: 1, kind: input, shape index: {}]   ;;  %s8382_s2 = inlined_call_operand.hbm [shape: f32[9,48], index: 2, kind: input, shape index: {}]   ;;  %s8383_s3 = inlined_call_operand.hbm [shape: f32[1,48], index: 3, kind: input, shape index: {}]   ;;  %s8384_s4 = inlined_call_operand.hbm [shape: bf16[9,48,48], index: 4, kind: input, shape index: {}]   ;;  %s8385_s5 = inlined_call_operand.hbm [shape: f32[1,48], index: 5, kind: input, shape index: {}]   ;;  %s8386_s6 = inlined_call_operand.hbm [shape: s8[3,1296,512], index: 6, kind: input, shape index: {}]   ;;  %s8387_s7 = inlined_call_operand.hbm [shape: f32[1,512], index: 7, kind: input, shape index: {}]   ;;  %s8388_s8 = inlined_call_operand.hbm [shape: f32[1,512], index: 8, kind: input, shape index: {}]   ;;  %s8389_s9 = inlined_call_operand.vmem [shape: bf16[512,81], index: 9, kind: input, shape index: {}]   ;;  %s8390_s10 = inlined_call_operand.hbm [shape: f32[1,81], index: 10, kind: input, shape index: {}]   ;;  %s8391_s11 = inlined_call_operand.hbm [shape: f32[2,81], index: 11, kind: output, shape index: {}]  }
   0x1   :  { %17 = vsyncpa [#allocation10], 0 }
   0x2   :  { %18 = vsyncpa [#allocation13], 0 }
   0x3   :  { %19 = vsyncpa [#allocation16], 0 }
   0x4   :  { %20 = vsyncpa [#allocation19], 0 }
   0x5   :  { %21 = vsyncpa [#allocation8], 0  ;;  %s41_s19 = sshll.u32 %s8382_s2, 4  ;;  %s5945_s20 = smov [#allocation9]   ;;  %s42_s19 = int_to_ptr.hbm [resolvable:$true] %s41_s19 }
   0x6   :  { %s43_s21 = sshll.u32 %s5945_s20, 4  ;;  %s65_s24 = sshll.u32 %s8384_s4, 4  ;;  %s44_s21 = int_to_ptr.vmem [resolvable:$true] %s43_s21  ;;  %s66_s24 = int_to_ptr.hbm [resolvable:$true] %s65_s24 }
   0x7   :  { %s5946_s25 = smov 128   ;;  %s5947_s26 = smov 8  }
   0x8   :  { %49 = dma.hbm_to_vmem [thread:$0]  %s42_s19, 256, %s44_s21, [#allocation10], %s5946_s25, %s5946_s25, %s5947_s26  }
   0x9   :  { %s5948_s27 = smov [#allocation12]   ;;  %s5949_s29 = smov 64  }
   0xa   :  { %s67_s28 = sshll.u32 %s5948_s27, 4  ;;  %s5950_s30 = smov 4   ;;  %s68_s28 = int_to_ptr.vmem [resolvable:$true] %s67_s28 }
   0xb   :  { %73 = dma.hbm_to_vmem [thread:$0]  %s66_s24, 3456, %s68_s28, [#allocation13], %s5949_s29, %s5949_s29, %s5950_s30  }
   0xc   :  { %s90_s13 = sshll.u32 %s8387_s7, 4  ;;  %s5951_s14 = smov [#allocation15]   ;;  %s91_s13 = int_to_ptr.hbm [resolvable:$true] %s90_s13 }
   0xd   :  { %s92_s15 = sshll.u32 %s5951_s14, 4  ;;  %s28_s17 = sshll.u32 %s8381_s1, 4  ;;  %s93_s15 = int_to_ptr.vmem [resolvable:$true] %s92_s15  ;;  %s29_s17 = int_to_ptr.hbm [resolvable:$true] %s28_s17 }
   0xe   :  { %95 = dma.hbm_to_vmem [thread:$0]  %s91_s13, 64, %s93_s15, [#allocation16]  }
   0xf   :  { %s5952_s18 = smov [#allocation6]   ;;  %s55_s22 = sshll.u32 %s8383_s3, 4  ;;  %s56_s22 = int_to_ptr.hbm [resolvable:$true] %s55_s22 }
  0x10   :  { %s30_s19 = sshll.u32 %s5952_s18, 4  ;;  %s79_s24 = sshll.u32 %s8385_s5, 4  ;;  %s31_s19 = int_to_ptr.vmem [resolvable:$true] %s30_s19  ;;  %s80_s24 = int_to_ptr.hbm [resolvable:$true] %s79_s24 }
  0x11   :  { %36 = dma.hbm_to_vmem [thread:$0]  %s29_s17, 24192, %s31_s19, [#allocation7], %s5946_s25, %s5946_s25, %s5947_s26  }
  0x12   :  { %s5953_s27 = smov [#allocation11]   ;;  %s5954_s1 = smov [#allocation14]  }
  0x13   :  { %s57_s28 = sshll.u32 %s5953_s27, 4  ;;  %s81_s29 = sshll.u32 %s5954_s1, 4  ;;  %s58_s28 = int_to_ptr.vmem [resolvable:$true] %s57_s28  ;;  %s82_s29 = int_to_ptr.vmem [resolvable:$true] %s81_s29 }
  0x14   :  { %60 = dma.hbm_to_vmem [thread:$0]  %s56_s22, 16, %s58_s28, [#allocation10]  }
  0x15   :  { %s101_s2 = sshll.u32 %s8388_s8, 4  ;;  %s114_s26 = sshll.u32 %s8390_s10, 4  ;;  %s102_s2 = int_to_ptr.hbm [resolvable:$true] %s101_s2  ;;  %s115_s26 = int_to_ptr.hbm [resolvable:$true] %s114_s26 }
  0x16   :  { %84 = dma.hbm_to_vmem [thread:$0]  %s80_s24, 16, %s82_s29, [#allocation13]  }
  0x17   :  { %s5955_s13 = smov [#allocation17]   ;;  %s5956_s14 = smov [#allocation18]  }
  0x18   :  { %s103_s5 = sshll.u32 %s5955_s13, 4  ;;  %s116_s15 = sshll.u32 %s5956_s14, 4  ;;  %s104_s5 = int_to_ptr.vmem [resolvable:$true] %s103_s5  ;;  %s117_s15 = int_to_ptr.vmem [resolvable:$true] %s116_s15 }
  0x19   :  { %106 = dma.hbm_to_vmem [thread:$0]  %s102_s2, 64, %s104_s5, [#allocation16]  }
  0x1a   :  { %119 = dma.hbm_to_vmem [thread:$0]  %s115_s26, 16, %s117_s15, [#allocation19]  }
  0x1b   :  { %5867 = dma.done.wait [#allocation7], 24192  }
  0x1c   :  { %5868 = vsyncadd [#allocation7], 4294943104 }
  0x1d   :  { %5869 = dma.done.wait [#allocation10], 272  }
  0x1e   :  { %5870 = vsyncadd [#allocation10], 4294967024 }
  0x1f   :  { %5871 = dma.done.wait [#allocation13], 3472  }
  0x20   :  { %5872 = vsyncadd [#allocation13], 4294963824 }
  0x21   :  { %5873 = dma.done.wait [#allocation16], 128  }
  0x22   :  { %5874 = vsyncadd [#allocation16], 4294967168 }
  0x23   :  { %5875 = dma.done.wait [#allocation19], 16  }
  0x24   :  { %5876 = vsyncadd [#allocation19], 4294967280  ;;  %v5957_v0 = vmov 0   ;;  %vm289_vm0 = vcmask 1040384   ;;  %v846_v1 = vld [vmem:[#allocation6 + $0x20] sm:$0xff]  ;;  %v844_v2 = vld [vmem:[#allocation6 + $0x10] sm:$0xff] }
  0x25   :  { %5323 = vset.pattern.permute.xlu2 %v5957_v0  ;;  %5322 = vset.pattern.permute.xlu1 %v5957_v0  ;;  %v842_v3 = vld [vmem:[#allocation6] sm:$0xff]  ;;  %v220_v4 = vld [vmem:[#allocation9 + $0x8] sm:$0x1]  ;;  %v219_v5 = vld [vmem:[#allocation9] sm:$0xff]  ;;  %vm225_vm1 = vcmask 72704   ;;  %vm772_vm2 = vcmask 392192  }
  0x26   :  { %5321 = vset.pattern.permute.xlu0 %v5957_v0  ;;  %885 = vperm.xlu2 %5323, %v846_v1   ;;  %v198_v6 = vld [vmem:[%s8380_s0] sm:$0xff]  ;;  %v847_v8 = vld [vmem:[#allocation6 + $0x28] sm:$0xff]  ;;  %v199_v11 = vld [vmem:[%s8380_s0 + $0x8] sm:$0xff]  ;;  %v8392_v55 = vmov 0.0   ;;  %s160_s29 = sshll.u32 %s8386_s6, 4  ;;  %s5959_s30 = smov [#allocation4]   ;;  %s161_s29 = int_to_ptr.hbm [resolvable:$true] %s160_s29 }
  0x27   :  { %875 = vperm.xlu1 %5322, %v844_v2   ;;  %865 = vperm.xlu0 %5321, %v842_v3   ;;  %v210_v7 = vld [vmem:[%s8380_s0 + $0x60] sm:$0xff]  ;;  %v843_v10 = vld [vmem:[#allocation6 + $0x8] sm:$0xff]  ;;  %v211_v12 = vld [vmem:[%s8380_s0 + $0x68] sm:$0xff]  ;;  %773 = vst.msk [vmem:[#allocation2] sm:$0xff] %vm772_vm2, %v8392_v55  ;;  %s162_s12 = sshll.u32 %s5959_s30, 4  ;;  %s166_s25 = scalar_lea.hbm %s8386_s6, 1296  ;;  %s163_s12 = int_to_ptr.vmem [resolvable:$true] %s162_s12 }
  0x28   :  { %4674 = vmatpush.msk.msra.mxu0 %vm289_vm0, %v220_v4  ;;  %5178 = vmatpush.msk.msra.mxu3 %vm289_vm0, %v220_v4  ;;  %v845_v9 = vld [vmem:[#allocation6 + $0x18] sm:$0xff]  ;;  %v850_v13 = vld [vmem:[#allocation6 + $0x40] sm:$0xff]  ;;  %v848_v15 = vld [vmem:[#allocation6 + $0x30] sm:$0xff]  ;;  %774 = vst.msk [vmem:[#allocation2 + $0x8] sm:$0xff] %vm772_vm2, %v8392_v55  ;;  %165 = dma.hbm_to_vmem [thread:$0]  %s161_s29, 20736, %s163_s12, [#allocation5] }
  0x29   :  { %v849_v14 = vld [vmem:[#allocation6 + $0x38] sm:$0xff]  ;;  %v200_v16 = vld [vmem:[%s8380_s0 + $0x10] sm:$0xff]  ;;  %v852_v19 = vld [vmem:[#allocation6 + $0x50] sm:$0xff]  ;;  %775 = vst.msk [vmem:[#allocation2 + $0x10] sm:$0xff] %vm772_vm2, %v8392_v55  ;;  %s176_s26 = sshll.u32 %s166_s25, 4  ;;  %s5960_s13 = smov [#allocation4 + $0x510]   ;;  %s177_s26 = int_to_ptr.hbm [resolvable:$true] %s176_s26 }
  0x2a   :  { %308 = vmatpush.msra.mxu0 %v219_v5  ;;  %5179 = vmatpush.msra.mxu3 %v219_v5  ;;  %v212_v17 = vld [vmem:[%s8380_s0 + $0x70] sm:$0xff]  ;;  %v853_v18 = vld [vmem:[#allocation6 + $0x58] sm:$0xff]  ;;  %v201_v21 = vld [vmem:[%s8380_s0 + $0x18] sm:$0xff]  ;;  %776 = vst.msk [vmem:[#allocation2 + $0x18] sm:$0xff] %vm772_vm2, %v8392_v55  ;;  %s178_s5 = sshll.u32 %s5960_s13, 4  ;;  %s182_s8 = scalar_lea.hbm %s8386_s6, 2592  ;;  %s179_s5 = int_to_ptr.vmem [resolvable:$true] %s178_s5 }
  0x2b   :  { %4675 = vmatmul.msk.f32.vlgmr.msra.gmra.mxu0 %vm225_vm1, %v198_v6  ;;  %4687 = vmatmul.msk.f32.vlgmr.msra.gmra.mxu3 %vm225_vm1, %v210_v7  ;;  %v851_v20 = vld [vmem:[#allocation6 + $0x48] sm:$0xff]  ;;  %v213_v22 = vld [vmem:[%s8380_s0 + $0x78] sm:$0xff]  ;;  %v854_v25 = vld [vmem:[#allocation6 + $0x60] sm:$0xff]  ;;  %777 = vst.msk [vmem:[#allocation2 + $0x20] sm:$0xff] %vm772_vm2, %v8392_v55  ;;  %181 = dma.hbm_to_vmem [thread:$0]  %s177_s26, 20736, %s179_s5, [#allocation5 + $0x1] }
  0x2c   :  { %v856_v23 = vld [vmem:[#allocation6 + $0x70] sm:$0xff]  ;;  %v855_v24 = vld [vmem:[#allocation6 + $0x68] sm:$0xff]  ;;  %v202_v26 = vld [vmem:[%s8380_s0 + $0x20] sm:$0xff]  ;;  %778 = vst.msk [vmem:[#allocation2 + $0x28] sm:$0xff] %vm772_vm2, %v8392_v55  ;;  %s192_s10 = sshll.u32 %s182_s8, 4  ;;  %s5961_s6 = smov [#allocation4 + $0xa20]   ;;  %s193_s10 = int_to_ptr.hbm [resolvable:$true] %s192_s10 }
  0x2d   :  { %v214_v27 = vld [vmem:[%s8380_s0 + $0x80] sm:$0xff]  ;;  %v859_v28 = vld [vmem:[#allocation6 + $0x88] sm:$0xff]  ;;  %v858_v29 = vld [vmem:[#allocation6 + $0x80] sm:$0xff]  ;;  %779 = vst.msk [vmem:[#allocation2 + $0x30] sm:$0xff] %vm772_vm2, %v8392_v55  ;;  %s194_s16 = sshll.u32 %s5961_s6, 4  ;;  %s195_s16 = int_to_ptr.vmem [resolvable:$true] %s194_s16 }
  0x2e   :  { %890 = vperm.xlu2 %5323, %v847_v8   ;;  %v857_v30 = vld [vmem:[#allocation6 + $0x78] sm:$0xff]  ;;  %v203_v31 = vld [vmem:[%s8380_s0 + $0x28] sm:$0xff]  ;;  %v860_v35 = vld [vmem:[#allocation6 + $0x90] sm:$0xff]  ;;  %780 = vst.msk [vmem:[#allocation2 + $0x38] sm:$0xff] %vm772_vm2, %v8392_v55  ;;  %197 = dma.hbm_to_vmem [thread:$0]  %s193_s10, 20736, %s195_s16, [#allocation5 + $0x2] }
  0x2f   :  { %880 = vperm.xlu1 %5322, %v845_v9   ;;  %870 = vperm.xlu0 %5321, %v843_v10   ;;  %v215_v32 = vld [vmem:[%s8380_s0 + $0x88] sm:$0xff]  ;;  %v861_v34 = vld [vmem:[#allocation6 + $0x98] sm:$0xff]  ;;  %v204_v36 = vld [vmem:[%s8380_s0 + $0x30] sm:$0xff]  ;;  %781 = vst.msk [vmem:[#allocation2 + $0x40] sm:$0xff] %vm772_vm2, %v8392_v55 }
  0x30   :  { %v862_v33 = vld [vmem:[#allocation6 + $0xa0] sm:$0x3]  ;;  %v216_v37 = vld [vmem:[%s8380_s0 + $0x90] sm:$0xff]  ;;  %v1296_v39 = vld [vmem:[#allocation6 + $0x158] sm:$0xff]  ;;  %782 = vst.msk [vmem:[#allocation2 + $0x48] sm:$0xff] %vm772_vm2, %v8392_v55 }
  0x31   :  { %v1297_v38 = vld [vmem:[#allocation6 + $0x160] sm:$0xff]  ;;  %v1295_v40 = vld [vmem:[#allocation6 + $0x150] sm:$0xff]  ;;  %v1300_v43 = vld [vmem:[#allocation6 + $0x178] sm:$0xff]  ;;  %783 = vst.msk [vmem:[#allocation2 + $0x50] sm:$0xff] %vm772_vm2, %v8392_v55 }
  0x32   :  { %v205_v41 = vld [vmem:[%s8380_s0 + $0x38] sm:$0xff]  ;;  %v1298_v45 = vld [vmem:[#allocation6 + $0x168] sm:$0xff]  ;;  %v206_v46 = vld [vmem:[%s8380_s0 + $0x40] sm:$0xff]  ;;  %784 = vst.msk [vmem:[#allocation2 + $0x58] sm:$0xff] %vm772_vm2, %v8392_v55 }
  0x33   :  { %4676 = vmatmul.msk.f32.gmra.mxu0 %vm225_vm1, %v199_v11  ;;  %4688 = vmatmul.msk.f32.gmra.mxu3 %vm225_vm1, %v211_v12  ;;  %v217_v42 = vld [vmem:[%s8380_s0 + $0x98] sm:$0xff]  ;;  %v1302_v48 = vld [vmem:[#allocation6 + $0x188] sm:$0xff]  ;;  %v1301_v49 = vld [vmem:[#allocation6 + $0x180] sm:$0xff]  ;;  %785 = vst.msk [vmem:[#allocation2 + $0x60] sm:$0xff] %vm772_vm2, %v8392_v55 }
  0x34   :  { %v1299_v44 = vld [vmem:[#allocation6 + $0x170] sm:$0xff]  ;;  %v207_v50 = vld [vmem:[%s8380_s0 + $0x48] sm:$0xff]  ;;  %v1306_v51 = vld [vmem:[#allocation6 + $0x1a8] sm:$0xff]  ;;  %786 = vst.msk [vmem:[#allocation2 + $0x68] sm:$0xff] %vm772_vm2, %v8392_v55 }
  0x35   :  { %v1303_v47 = vld [vmem:[#allocation6 + $0x190] sm:$0xff]  ;;  %v1305_v52 = vld [vmem:[#allocation6 + $0x1a0] sm:$0xff]  ;;  %v1304_v53 = vld [vmem:[#allocation6 + $0x198] sm:$0xff]  ;;  %787 = vst.msk [vmem:[#allocation2 + $0x70] sm:$0xff] %vm772_vm2, %v8392_v55 }
  0x36   :  { %905 = vperm.xlu2 %5323, %v850_v13   ;;  %v208_v54 = vld [vmem:[%s8380_s0 + $0x50] sm:$0xff]  ;;  %v1309_v56 = vld [vmem:[#allocation6 + $0x1c0] sm:$0xff]  ;;  %v1308_v57 = vld [vmem:[#allocation6 + $0x1b8] sm:$0xff]  ;;  %788 = vst.msk [vmem:[#allocation2 + $0x78] sm:$0xff] %vm772_vm2, %v8392_v55 }
  0x37   :  { %900 = vperm.xlu1 %5322, %v849_v14   ;;  %895 = vperm.xlu0 %5321, %v848_v15   ;;  %v1307_v58 = vld [vmem:[#allocation6 + $0x1b0] sm:$0xff]  ;;  %v1618_v61 = vld [vmem:[#allocation6 + $0x200] sm:$0xff]  ;;  %v1617_v62 = vld [vmem:[#allocation6 + $0x1f8] sm:$0xff]  ;;  %789 = vst.msk [vmem:[#allocation2 + $0x80] sm:$0xff] %vm772_vm2, %v8392_v55 }
  0x38   :  { %v209_v59 = vld [vmem:[%s8380_s0 + $0x58] sm:$0xff]  ;;  %v1310_v63 = vld [vmem:[#allocation6 + $0x1c8] sm:$0xff]  ;;  %790 = vst.msk [vmem:[#allocation2 + $0x88] sm:$0xff] %vm772_vm2, %v8392_v55  ;;  %v1312_v5 = vld [vmem:[#allocation6 + $0x1d8] sm:$0xff] }
  0x39   :  { %v1311_v1 = vld [vmem:[#allocation6 + $0x1d0] sm:$0xff]  ;;  %791 = vst.msk [vmem:[#allocation2 + $0x90] sm:$0xff] %vm772_vm2, %v8392_v55  ;;  %v1619_v3 = vld [vmem:[#allocation6 + $0x208] sm:$0xff]  ;;  %v1622_v6 = vld [vmem:[#allocation6 + $0x220] sm:$0xff] }
  0x3a   :  { %v1620_v2 = vld [vmem:[#allocation6 + $0x210] sm:$0xff]  ;;  %792 = vst.msk [vmem:[#allocation2 + $0x98] sm:$0xff] %vm772_vm2, %v8392_v55  ;;  %v1621_v7 = vld [vmem:[#allocation6 + $0x218] sm:$0xff]  ;;  %v1623_v13 = vld [vmem:[#allocation6 + $0x228] sm:$0xff] }
  0x3b   :  { %4677 = vmatmul.msk.f32.gmra.mxu0 %vm225_vm1, %v200_v16  ;;  %4689 = vmatmul.msk.f32.gmra.mxu3 %vm225_vm1, %v212_v17  ;;  %793 = vst.msk [vmem:[#allocation2 + $0xa0] sm:$0xff] %vm772_vm2, %v8392_v55  ;;  %v1625_v11 = vld [vmem:[#allocation6 + $0x238] sm:$0xff]  ;;  %v1624_v12 = vld [vmem:[#allocation6 + $0x230] sm:$0xff]  ;;  %v5121_v14 = vld [vmem:[#allocation12 + $0x28] sm:$0xff] }
  0x3c   :  { %794 = vst.msk [vmem:[#allocation2 + $0xa8] sm:$0xff] %vm772_vm2, %v8392_v55  ;;  %v821_v15 = vld [vmem:[#allocation2] sm:$0xff]  ;;  %v822_v16 = vld [vmem:[#allocation2 + $0x8] sm:$0xff]  ;;  %1101 = vmatpush.bf16.msra.mxu1 %v5121_v14  ;;  %5180 = vmatpush.bf16.msra.mxu2 %v5121_v14 }
  0x3d   :  { %795 = vst.msk [vmem:[#allocation2 + $0xb0] sm:$0xff] %vm772_vm2, %v8392_v55 }
  0x3e   :  { %920 = vperm.xlu2 %5323, %v853_v18   ;;  %796 = vst.msk [vmem:[#allocation2 + $0xb8] sm:$0xff] %vm772_vm2, %v8392_v55 }
  0x3f   :  { %915 = vperm.xlu1 %5322, %v852_v19   ;;  %910 = vperm.xlu0 %5321, %v851_v20   ;;  %797 = vst.msk [vmem:[#allocation2 + $0xc0] sm:$0xff] %vm772_vm2, %v8392_v55  ;;  %v5120_v20 = vld [vmem:[#allocation12 + $0x20] sm:$0xff] }
  0x40   :  { %1102 = vmatpush.bf16.msra.mxu1 %v5120_v20  ;;  %5181 = vmatpush.bf16.msra.mxu2 %v5120_v20 }
  0x43   :  { %4678 = vmatmul.msk.f32.gmra.mxu0 %vm225_vm1, %v201_v21  ;;  %4690 = vmatmul.msk.f32.gmra.mxu3 %vm225_vm1, %v213_v22 }
  0x46   :  { %935 = vperm.xlu2 %5323, %v856_v23   ;;  %v1627_v23 = vld [vmem:[#allocation6 + $0x248] sm:$0xff] }
  0x47   :  { %930 = vperm.xlu1 %5322, %v855_v24   ;;  %925 = vperm.xlu0 %5321, %v854_v25   ;;  %v1313_v24 = vld [vmem:[#allocation6 + $0x1e0] sm:$0xff]  ;;  %v2117_v25 = vld [vmem:[#allocation6 + $0x368] sm:$0xff] }
  0x4b   :  { %4679 = vmatmul.msk.f32.gmra.mxu0 %vm225_vm1, %v202_v26  ;;  %4691 = vmatmul.msk.f32.gmra.mxu3 %vm225_vm1, %v214_v27  ;;  %v1626_v26 = vld [vmem:[#allocation6 + $0x240] sm:$0xff]  ;;  %v6197_v27 = vld [vmem:[#allocation11] ss:$0 sm:$0xff] }
  0x4e   :  { %950 = vperm.xlu2 %5323, %v859_v28   ;;  %v5119_v28 = vld [vmem:[#allocation12 + $0x18] sm:$0xff] }
  0x4f   :  { %945 = vperm.xlu1 %5322, %v858_v29   ;;  %940 = vperm.xlu0 %5321, %v857_v30  }
  0x50   :  { %1103 = vmatpush.bf16.msra.mxu1 %v5119_v28  ;;  %5182 = vmatpush.bf16.msra.mxu2 %v5119_v28 }
  0x53   :  { %4680 = vmatmul.msk.f32.gmra.mxu0 %vm225_vm1, %v203_v31  ;;  %4692 = vmatmul.msk.f32.gmra.mxu3 %vm225_vm1, %v215_v32 }
  0x56   :  { %965 = vperm.xlu2 %5323, %v862_v33   ;;  %v1006_v33 = vld [vmem:[#allocation2 + $0x2] sm:$0xff] }
  0x57   :  { %960 = vperm.xlu1 %5322, %v861_v34   ;;  %955 = vperm.xlu0 %5321, %v860_v35   ;;  %v1007_v34 = vld [vmem:[#allocation2 + $0xa] sm:$0xff] }
  0x5b   :  { %4681 = vmatmul.msk.f32.gmra.mxu0 %vm225_vm1, %v204_v36  ;;  %4693 = vmatmul.msk.f32.gmra.mxu3 %vm225_vm1, %v216_v37  ;;  %v1027_v36 = vpack.c.bf16 %v1007_v34, %v1006_v33 }
  0x5d   :  { %4729 = vmatmul.msk.bf16.vlgmr.msra.gmra.mxu1 %vm772_vm2, %v1027_v36  ;;  %v1637_v36 = vld [vmem:[#allocation6 + $0x298] sm:$0x3] }
  0x5e   :  { %1328 = vperm.xlu2 %5323, %v1297_v38   ;;  %v1629_v38 = vld [vmem:[#allocation6 + $0x258] sm:$0xff] }
  0x5f   :  { %1323 = vperm.xlu1 %5322, %v1296_v39   ;;  %1318 = vperm.xlu0 %5321, %v1295_v40   ;;  %v1314_v39 = vld [vmem:[#allocation6 + $0x1e8] sm:$0xff]  ;;  %v5124_v40 = vld [vmem:[#allocation12 + $0x40] sm:$0xff] }
  0x60   :  { %1516 = vmatpush.bf16.msrb.mxu3 %v5124_v40 }
  0x63   :  { %4682 = vmatmul.msk.f32.gmra.mxu0 %vm225_vm1, %v205_v41  ;;  %4694 = vmatmul.msk.f32.gmra.mxu3 %vm225_vm1, %v217_v42  ;;  %v1628_v41 = vld [vmem:[#allocation6 + $0x250] sm:$0xff] }
  0x66   :  { %1343 = vperm.xlu2 %5323, %v1300_v43   ;;  %v218_v43 = vld [vmem:[%s8380_s0 + $0xa0] sm:$0x3] }
  0x67   :  { %1338 = vperm.xlu1 %5322, %v1299_v44   ;;  %1333 = vperm.xlu0 %5321, %v1298_v45  }
  0x6b   :  { %4683 = vmatmul.msk.f32.gmra.mxu0 %vm225_vm1, %v206_v46  ;;  %4695 = vmatmul.msk.f32.gmra.mxu3 %vm225_vm1, %v218_v43 }
  0x6e   :  { %1358 = vperm.xlu2 %5323, %v1303_v47  }
  0x6f   :  { %1353 = vperm.xlu1 %5322, %v1302_v48   ;;  %1348 = vperm.xlu0 %5321, %v1301_v49  }
  0x73   :  { %4684 = vmatmul.msk.f32.gmra.mxu0 %vm225_vm1, %v207_v50  ;;  %v5123_v50 = vld [vmem:[#allocation12 + $0x38] sm:$0xff] }
  0x74   :  { %1517 = vmatpush.bf16.msrb.mxu3 %v5123_v50 }
  0x76   :  { %1373 = vperm.xlu2 %5323, %v1306_v51  }
  0x77   :  { %1368 = vperm.xlu1 %5322, %v1305_v52   ;;  %1363 = vperm.xlu0 %5321, %v1304_v53   ;;  %v1632_v52 = vld [vmem:[#allocation6 + $0x270] sm:$0xff]  ;;  %v1631_v53 = vld [vmem:[#allocation6 + $0x268] sm:$0xff] }
  0x7b   :  { %4685 = vmatmul.msk.f32.gmra.mxu0 %vm225_vm1, %v208_v54  ;;  %v1630_v54 = vld [vmem:[#allocation6 + $0x260] sm:$0xff] }
  0x7e   :  { %1388 = vperm.xlu2 %5323, %v1309_v56   ;;  %v5122_v56 = vld [vmem:[#allocation12 + $0x30] sm:$0xff] }
  0x7f   :  { %1383 = vperm.xlu1 %5322, %v1308_v57   ;;  %1378 = vperm.xlu0 %5321, %v1307_v58  }
  0x80   :  { %v6140_v60 = vpop.permute.xlu2 %885  ;;  %1518 = vmatpush.bf16.msrb.mxu3 %v5122_v56 }
  0x83   :  { %4686 = vmatmul.msk.f32.gmra.mxu0 %vm225_vm1, %v209_v59 }
  0x86   :  { %1645 = vperm.xlu2 %5323, %v1618_v61  }
  0x87   :  { %1640 = vperm.xlu1 %5322, %v1617_v62   ;;  %1393 = vperm.xlu0 %5321, %v1310_v63  }
  0x88   :  { %v6159_v0 = vpop.permute.xlu2 %890 }
  0x8e   :  { %1398 = vperm.xlu2 %5323, %v1311_v1  }
  0x8f   :  { %1655 = vperm.xlu1 %5322, %v1620_v2   ;;  %1650 = vperm.xlu0 %5321, %v1619_v3  }
  0x90   :  { %v6177_v4 = vpop.permute.xlu2 %905 }
  0x91   :  { %8417 = vst [vmem:[#allocation38_spill] sm:$0xff] %v6177_v4 }
  0x96   :  { %1403 = vperm.xlu2 %5323, %v1312_v5  }
  0x97   :  { %1665 = vperm.xlu1 %5322, %v1622_v6   ;;  %1660 = vperm.xlu0 %5321, %v1621_v7   ;;  %v1634_v6 = vld [vmem:[#allocation6 + $0x280] sm:$0xff]  ;;  %v1633_v7 = vld [vmem:[#allocation6 + $0x278] sm:$0xff] }
  0x98   :  { %v6183_v8 = vpop.permute.xlu2 %920 }
  0x99   :  { %8418 = vst [vmem:[#allocation39_spill] sm:$0xff] %v6183_v8  ;;  %v6185_v9 = vpop.permute.xlu1 %875  ;;  %v866_v10 = vpop.permute.xlu0 %865  ;;  %v2444_v8 = vld [vmem:[#allocation6 + $0x438] sm:$0xff] }
  0x9a   :  { %v6187_v17 = vmul.f32 %v866_v10, %v821_v15 }
  0x9e   :  { %1680 = vperm.xlu2 %5323, %v1625_v11   ;;  %v1315_v11 = vld [vmem:[#allocation6 + $0x1f0] sm:$0x3] }
  0x9f   :  { %1675 = vperm.xlu1 %5322, %v1624_v12   ;;  %1670 = vperm.xlu0 %5321, %v1623_v13  }
  0xa0   :  { %v6189_v18 = vpop.permute.xlu2 %935 }
  0xa1   :  { %8419 = vst [vmem:[#allocation40_spill] sm:$0xff] %v6189_v18  ;;  %v6191_v19 = vpop.permute.xlu1 %880  ;;  %v871_v21 = vpop.permute.xlu0 %870 }
  0xa2   :  { %v6193_v22 = vmul.f32 %v871_v21, %v822_v16 }
  0xa6   :  { %1690 = vperm.xlu2 %5323, %v1627_v23  }
  0xa7   :  { %1408 = vperm.xlu1 %5322, %v1313_v24   ;;  %1685 = vperm.xlu0 %5321, %v1626_v26  }
  0xa8   :  { %v310_v29 = vpop.f32.mrf.mxu0  ;;  %v6200_v31 = vpop.permute.xlu2 %950 }
  0xa9   :  { %v311_v30 = vadd.f32 %v6197_v27, %v310_v29  ;;  %8420 = vst [vmem:[#allocation41_spill] sm:$0xff] %v6200_v31  ;;  %v6202_v32 = vpop.permute.xlu1 %900  ;;  %v6204_v35 = vpop.permute.xlu0 %895  ;;  %v2935_v31 = vld [vmem:[#allocation6 + $0x560] sm:$0xff] }
  0xab   :  { %v4696_v37 = vmul.f32 -1.442695, %v311_v30 }
  0xad   :  { %5326 = vpow2.f32 %v4696_v37  ;;  %v1636_v37 = vld [vmem:[#allocation6 + $0x290] sm:$0xff] }
  0xae   :  { %1700 = vperm.xlu2 %5323, %v1629_v38   ;;  %v346_v63 = vpop.f32.mrf.mxu3 }
  0xaf   :  { %1413 = vperm.xlu1 %5322, %v1314_v39   ;;  %1695 = vperm.xlu0 %5321, %v1628_v41   ;;  %v1635_v41 = vld [vmem:[#allocation6 + $0x288] sm:$0xff] }
  0xb0   :  { %v313_v42 = vpop.f32.mrf.mxu0  ;;  %v6211_v45 = vpop.permute.xlu2 %965 }
  0xb1   :  { %v314_v44 = vadd.f32 %v6197_v27, %v313_v42  ;;  %8421 = vst [vmem:[#allocation42_spill] sm:$0xff] %v6211_v45  ;;  %v6213_v46 = vpop.permute.xlu1 %915  ;;  %v6216_v47 = vpop.permute.xlu0 %910 }
  0xb2   :  { %8422 = vst [vmem:[#allocation43_spill] sm:$0xff] %v6213_v46  ;;  %v2939_v46 = vld [vmem:[#allocation6 + $0x580] sm:$0xff] }
  0xb3   :  { %8423 = vst [vmem:[#allocation44_spill] sm:$0xff] %v6216_v47  ;;  %v5327_v48 = vpop.eup %5326  ;;  %v4697_v49 = vmul.f32 -1.442695, %v314_v44  ;;  %v347_v44 = vadd.f32 %v6197_v27, %v346_v63  ;;  %v2948_v47 = vld [vmem:[#allocation6 + $0x5c8] sm:$0xff] }
  0xb4   :  { %v436_v51 = vadd.f32 1.0, %v5327_v48 }
  0xb5   :  { %5328 = vpow2.f32 %v4697_v49 }
  0xb6   :  { %5330 = vrcp.f32 %v436_v51  ;;  %1715 = vperm.xlu2 %5323, %v1632_v52   ;;  %v468_v13 = vand.u32 2147483648, %v436_v51  ;;  %v466_v16 = vand.u32 2147483647, %v436_v51  ;;  %vm462_vm4 = vweird.f32 %v436_v51  ;;  %v349_v38 = vpop.f32.mrf.mxu3 }
  0xb7   :  { %1710 = vperm.xlu1 %5322, %v1631_v53   ;;  %1705 = vperm.xlu0 %5321, %v1630_v54   ;;  %v4708_v53 = vmul.f32 -1.442695, %v347_v44  ;;  %v1273_v44 = vld [vmem:[#allocation2 + $0x4] sm:$0xff] }
  0xb8   :  { %v316_v57 = vpop.f32.mrf.mxu0  ;;  %v6219_v59 = vpop.permute.xlu2 %1328  ;;  %v469_v33 = vor.u32 1.1754944e-38, %v468_v13  ;;  %vm467_vm6 = vcmp.eq.f32.partialorder %v466_v16, 8.507059e+37 }
  0xb9   :  { %v317_v58 = vadd.f32 %v6197_v27, %v316_v57  ;;  %v6221_v61 = vpop.permute.xlu1 %930  ;;  %v6223_v62 = vpop.permute.xlu0 %925 }
  0xba   :  { %8424 = vst [vmem:[#allocation45_spill] sm:$0xff] %v6221_v61 }
  0xbb   :  { %8425 = vst [vmem:[#allocation46_spill] sm:$0xff] %v6223_v62  ;;  %v5329_v1 = vpop.eup %5328  ;;  %v4698_v2 = vmul.f32 -1.442695, %v317_v58  ;;  %v2121_v62 = vld [vmem:[#allocation6 + $0x388] sm:$0xff] }
  0xbc   :  { %v5331_v3 = vpop.eup %5330  ;;  %v6225_v5 = vadd.f32 1.0, %v5329_v1 }
  0xbd   :  { %v458_v10 = vmul.f32 %v5331_v3, %v436_v51  ;;  %5332 = vpow2.f32 %v4698_v2  ;;  %vm463_vm3 = vweird.f32 %v5331_v3  ;;  %v350_v51 = vadd.f32 %v6197_v27, %v349_v38 }
  0xbe   :  { %5334 = vrcp.f32 %v6225_v5  ;;  %1725 = vperm.xlu2 %5323, %v1634_v6   ;;  %vm464_vm5 = vmor %vm462_vm4, %vm463_vm3  ;;  %v481_v48 = vand.u32 2147483647, %v6225_v5  ;;  %v483_v49 = vand.u32 2147483648, %v6225_v5  ;;  %vm477_vm8 = vweird.f32 %v6225_v5 }
  0xbf   :  { %v459_v12 = vsub.f32 1.0, %v458_v10  ;;  %1720 = vperm.xlu1 %5322, %v1633_v7   ;;  %1418 = vperm.xlu0 %5321, %v1315_v11   ;;  %v4709_v63 = vmul.f32 -1.442695, %v350_v51  ;;  %v2435_v11 = vld [vmem:[#allocation6 + $0x3f0] sm:$0xff] }
  0xc0   :  { %v319_v14 = vpop.f32.mrf.mxu0  ;;  %v6229_v21 = vpop.permute.xlu2 %1343  ;;  %v484_v7 = vor.u32 1.1754944e-38, %v483_v49  ;;  %vm482_vm10 = vcmp.eq.f32.partialorder %v481_v48, 8.507059e+37 }
  0xc1   :  { %v460_v15 = vmul.f32 %v5331_v3, %v459_v12  ;;  %v320_v20 = vadd.f32 %v6197_v27, %v319_v14  ;;  %v6231_v23 = vpop.permute.xlu1 %945  ;;  %v6233_v24 = vpop.permute.xlu0 %940  ;;  %v2114_v12 = vld [vmem:[#allocation6 + $0x350] sm:$0xff] }
  0xc2   :  { %8426 = vst [vmem:[#allocation47_spill] sm:$0xff] %v6231_v23 }
  0xc3   :  { %8427 = vst [vmem:[#allocation48_spill] sm:$0xff] %v6233_v24  ;;  %v5333_v26 = vpop.eup %5332  ;;  %v461_v28 = vadd.f32 %v5331_v3, %v460_v15  ;;  %v4699_v29 = vmul.f32 -1.442695, %v320_v20  ;;  %v2113_v15 = vld [vmem:[#allocation6 + $0x348] sm:$0xff] }
  0xc4   :  { %v5335_v30 = vpop.eup %5334  ;;  %v6235_v34 = vadd.f32 1.0, %v5333_v26 }
  0xc5   :  { %v465_v39 = vsel %vm464_vm5, %v5331_v3, %v461_v28  ;;  %v473_v40 = vmul.f32 %v5335_v30, %v6225_v5  ;;  %5336 = vpow2.f32 %v4699_v29  ;;  %vm478_vm7 = vweird.f32 %v5335_v30  ;;  %v6257_v5 = vpop.f32.mrf.mxu3 }
  0xc6   :  { %v470_v42 = vsel %vm467_vm6, %v469_v33, %v465_v39  ;;  %5338 = vrcp.f32 %v6235_v34  ;;  %1740 = vperm.xlu2 %5323, %v1637_v36   ;;  %vm479_vm9 = vmor %vm477_vm8, %vm478_vm7  ;;  %v496_v20 = vand.u32 2147483647, %v6235_v34  ;;  %v498_v28 = vand.u32 2147483648, %v6235_v34  ;;  %v1274_v39 = vld [vmem:[#allocation2 + $0xc] sm:$0xff] }
  0xc7   :  { %800 = vst.msk [vmem:[#allocation2 + $0x14] sm:$0xff] %vm772_vm2, %v470_v42  ;;  %v474_v43 = vsub.f32 1.0, %v473_v40  ;;  %1735 = vperm.xlu1 %5322, %v1636_v37   ;;  %1730 = vperm.xlu0 %5321, %v1635_v41   ;;  %5340 = vpow2.f32 %v4708_v53  ;;  %vm492_vm12 = vweird.f32 %v6235_v34 }
  0xc8   :  { %v322_v50 = vpop.f32.mrf.mxu0  ;;  %v6245_v56 = vpop.permute.xlu2 %1358  ;;  %5342 = vpow2.f32 %v4709_v63  ;;  %vm6265_vm13 = vcmp.eq.f32.partialorder %v496_v20, 8.507059e+37 }
  0xc9   :  { %v475_v52 = vmul.f32 %v5335_v30, %v474_v43  ;;  %v323_v54 = vadd.f32 %v6197_v27, %v322_v50  ;;  %v6247_v57 = vpop.permute.xlu1 %960  ;;  %v6249_v58 = vpop.permute.xlu0 %955  ;;  %v499_v50 = vor.u32 1.1754944e-38, %v498_v28 }
  0xca   :  { %8428 = vst [vmem:[#allocation49_spill] sm:$0xff] %v6247_v57 }
  0xcb   :  { %8429 = vst [vmem:[#allocation50_spill] sm:$0xff] %v6249_v58  ;;  %v5337_v1 = vpop.eup %5336  ;;  %v476_v2 = vadd.f32 %v5335_v30, %v475_v52  ;;  %v4700_v3 = vmul.f32 -1.442695, %v323_v54 }
  0xcc   :  { %v5339_v6 = vpop.eup %5338  ;;  %v6252_v10 = vadd.f32 1.0, %v5337_v1  ;;  %v2932_v1 = vld [vmem:[#allocation6 + $0x548] sm:$0xff] }
  0xcd   :  { %v480_v13 = vsel %vm479_vm9, %v5335_v30, %v476_v2  ;;  %v488_v14 = vmul.f32 %v5339_v6, %v6235_v34  ;;  %5344 = vpow2.f32 %v4700_v3  ;;  %v5341_v30 = vpop.eup %5340  ;;  %vm493_vm11 = vweird.f32 %v5339_v6  ;;  %v2931_v2 = vld [vmem:[#allocation6 + $0x540] sm:$0xff] }
  0xce   :  { %v485_v16 = vsel %vm482_vm10, %v484_v7, %v480_v13  ;;  %5346 = vrcp.f32 %v6252_v10  ;;  %2458 = vperm.xlu2 %5323, %v2435_v11   ;;  %v5343_v40 = vpop.eup %5342  ;;  %v6269_v42 = vadd.f32 1.0, %v5341_v30  ;;  %v511_v51 = vand.u32 2147483647, %v6252_v10  ;;  %vm494_vm14 = vmor %vm492_vm12, %vm493_vm11  ;;  %v2436_v13 = vld [vmem:[#allocation6 + $0x3f8] sm:$0xff] }
  0xcf   :  { %801 = vst.msk [vmem:[#allocation2 + $0x1c] sm:$0xff] %vm772_vm2, %v485_v16  ;;  %v489_v26 = vsub.f32 1.0, %v488_v14  ;;  %2141 = vperm.xlu1 %5322, %v2114_v12   ;;  %2136 = vperm.xlu0 %5321, %v2113_v15   ;;  %v6272_v52 = vadd.f32 1.0, %v5343_v40  ;;  %v513_v34 = vand.u32 2147483648, %v6252_v10  ;;  %vm507_vm15 = vweird.f32 %v6252_v10 }
  0xd0   :  { %v325_v29 = vpop.f32.mrf.mxu0  ;;  %v6262_v37 = vpop.permute.xlu2 %1373  ;;  %5348 = vrcp.f32 %v6269_v42  ;;  %v646_v15 = vand.u32 2147483647, %v6269_v42  ;;  %v648_v16 = vand.u32 2147483648, %v6269_v42  ;;  %vm6291_vm0 = vcmp.eq.f32.partialorder %v511_v51, 8.507059e+37 }
  0xd1   :  { %v490_v33 = vmul.f32 %v5339_v6, %v489_v26  ;;  %v326_v36 = vadd.f32 %v6197_v27, %v325_v29  ;;  %v1324_v38 = vpop.permute.xlu1 %1323  ;;  %v1319_v43 = vpop.permute.xlu0 %1318  ;;  %5350 = vrcp.f32 %v6272_v52  ;;  %v514_v26 = vor.u32 1.1754944e-38, %v513_v34 }
  0xd2   :  { %v1422_v63 = vmul.f32 %v1324_v38, %v1274_v39  ;;  %v1421_v12 = vmul.f32 %v1319_v43, %v1273_v44  ;;  %vm642_vm1 = vweird.f32 %v6269_v42  ;;  %v355_v29 = vpop.f32.mrf.mxu3  ;;  %vm6306_vm4 = vcmp.eq.f32.partialorder %v646_v15, 8.507059e+37 }
  0xd3   :  { %v5345_v48 = vpop.eup %5344  ;;  %v491_v49 = vadd.f32 %v5339_v6, %v490_v33  ;;  %v4701_v54 = vmul.f32 -1.442695, %v326_v36  ;;  %v6310_v43 = vor.u32 1.1754944e-38, %v648_v16  ;;  %vm657_vm5 = vweird.f32 %v6272_v52 }
  0xd4   :  { %v6274_v53 = vpop.eup %5346  ;;  %v6281_v11 = vadd.f32 1.0, %v5345_v48  ;;  %v1442_v33 = vpack.c.bf16 %v1422_v63, %v1421_v12  ;;  %v353_v48 = vadd.f32 %v6197_v27, %v6257_v5  ;;  %v5127_v63 = vld [vmem:[#allocation12 + $0x58] sm:$0xff]  ;;  %v356_v12 = vadd.f32 %v6197_v27, %v355_v29 }
  0xd5   :  { %v495_v3 = vsel %vm494_vm14, %v5339_v6, %v491_v49  ;;  %v503_v7 = vmul.f32 %v6274_v53, %v6252_v10  ;;  %vm508_vm3 = vweird.f32 %v6274_v53  ;;  %1838 = vmatpush.bf16.msrb.mxu0 %v5127_v63 }
  0xd6   :  { %v500_v14 = vsel %vm6265_vm13, %v499_v50, %v495_v3  ;;  %5352 = vrcp.f32 %v6281_v11  ;;  %2959 = vperm.xlu2 %5323, %v2932_v1   ;;  %v6298_v36 = vld [vmem:[#allocation2 + $0x1a] sm:$0xff]  ;;  %v6304_v40 = vpop.eup %5348  ;;  %v526_v44 = vand.u32 2147483647, %v6281_v11  ;;  %4775 = vmatmul.msk.bf16.vlgmr.msrb.gmra.mxu3 %vm772_vm2, %v1442_v33  ;;  %vm6331_vm6 = vmor %vm507_vm15, %vm508_vm3  ;;  %vm522_vm7 = vweird.f32 %v6281_v11 }
  0xd7   :  { %802 = vst.msk [vmem:[#allocation2 + $0x24] sm:$0xff] %vm772_vm2, %v500_v14  ;;  %v504_v20 = vsub.f32 1.0, %v503_v7  ;;  %2954 = vperm.xlu1 %5322, %v2931_v2   ;;  %2463 = vperm.xlu0 %5321, %v2436_v13   ;;  %5354 = vpow2.f32 %v4701_v54  ;;  %v638_v51 = vmul.f32 %v6304_v40, %v6269_v42  ;;  %v6323_v54 = vld [vmem:[#allocation2 + $0x12] sm:$0xff]  ;;  %v6325_v1 = vpop.eup %5350  ;;  %v661_v2 = vand.u32 2147483647, %v6272_v52  ;;  %v2437_v13 = vld [vmem:[#allocation6 + $0x400] sm:$0xff] }
  0xd8   :  { %v328_v28 = vpop.f32.mrf.mxu0  ;;  %v6300_v38 = vpop.permute.xlu2 %1388  ;;  %v4710_v3 = vmul.f32 -1.442695, %v353_v48  ;;  %v1028_v7 = vpack.c.bf16 %v6298_v36, %v6323_v54  ;;  %v2116_v14 = vld [vmem:[#allocation6 + $0x360] sm:$0xff]  ;;  %vm643_vm8 = vweird.f32 %v6304_v40  ;;  %v663_v33 = vand.u32 2147483648, %v6272_v52 }
  0xd9   :  { %v505_v30 = vmul.f32 %v6274_v53, %v504_v20  ;;  %v6302_v39 = vpop.permute.xlu1 %1338  ;;  %v6315_v49 = vpop.permute.xlu0 %1333  ;;  %v329_v34 = vadd.f32 %v6197_v27, %v328_v28  ;;  %v639_v16 = vsub.f32 1.0, %v638_v51  ;;  %v653_v20 = vmul.f32 %v6325_v1, %v6272_v52  ;;  %v2115_v28 = vld [vmem:[#allocation6 + $0x358] sm:$0xff]  ;;  %vm6361_vm10 = vmor %vm642_vm1, %vm643_vm8 }
  0xda   :  { %5356 = vpow2.f32 %v4710_v3  ;;  %4730 = vmatmul.msk.bf16.gmra.mxu1 %vm772_vm2, %v1028_v7  ;;  %vm658_vm9 = vweird.f32 %v6325_v1  ;;  %v528_v63 = vand.u32 2147483648, %v6281_v11  ;;  %v4711_v3 = vmul.f32 -1.442695, %v356_v12  ;;  %v2934_v52 = vld [vmem:[#allocation6 + $0x558] sm:$0xff] }
  0xdb   :  { %v506_v50 = vadd.f32 %v6274_v53, %v505_v30  ;;  %v640_v48 = vmul.f32 %v6304_v40, %v639_v16  ;;  %v4702_v51 = vmul.f32 -1.442695, %v329_v34  ;;  %v5126_v16 = vld [vmem:[#allocation12 + $0x50] sm:$0xff]  ;;  %vm6381_vm12 = vmor %vm657_vm5, %vm658_vm9  ;;  %vm6392_vm13 = vcmp.eq.f32.partialorder %v661_v2, 8.507059e+37  ;;  %v6406_v2 = vld [vmem:[#allocation2 + $0x1c] sm:$0xff] }
  0xdc   :  { %v6340_v15 = vpop.eup %5352  ;;  %1839 = vmatpush.bf16.msrb.mxu0 %v5126_v16  ;;  %vm6402_vm14 = vcmp.eq.f32.partialorder %v526_v44, 8.507059e+37  ;;  %v529_v41 = vor.u32 1.1754944e-38, %v528_v63 }
  0xdd   :  { %v510_v10 = vsel %vm6331_vm6, %v6274_v53, %v506_v50  ;;  %v518_v29 = vmul.f32 %v6340_v15, %v6281_v11  ;;  %v5355_v53 = vpop.eup %5354  ;;  %v654_v50 = vsub.f32 1.0, %v653_v20  ;;  %v641_v34 = vadd.f32 %v6304_v40, %v640_v48 }
  0xde   :  { %v515_v30 = vsel %vm6291_vm0, %v514_v26, %v510_v10  ;;  %2468 = vperm.xlu2 %5323, %v2437_v13   ;;  %v6366_v5 = vadd.f32 1.0, %v5355_v53  ;;  %5358 = vpow2.f32 %v4702_v51  ;;  %vm523_vm11 = vweird.f32 %v6340_v15 }
  0xdf   :  { %803 = vst.msk [vmem:[#allocation2 + $0x2c] sm:$0xff] %vm772_vm2, %v515_v30  ;;  %2151 = vperm.xlu1 %5322, %v2116_v14   ;;  %v519_v26 = vsub.f32 1.0, %v518_v29  ;;  %2146 = vperm.xlu0 %5321, %v2115_v28   ;;  %v655_v13 = vmul.f32 %v6325_v1, %v654_v50  ;;  %v664_v28 = vor.u32 1.1754944e-38, %v663_v33  ;;  %v358_v29 = vpop.f32.mrf.mxu3  ;;  %v645_v53 = vsel %vm6361_vm10, %v6304_v40, %v641_v34  ;;  %v1275_v33 = vld [vmem:[#allocation2 + $0x14] sm:$0xff]  ;;  %vm524_vm15 = vmor %vm522_vm7, %vm523_vm11 }
  0xe0   :  { %v331_v7 = vpop.f32.mrf.mxu0  ;;  %v6371_v42 = vpop.permute.xlu2 %1645  ;;  %5360 = vrcp.f32 %v6366_v5  ;;  %v1424_v34 = vmul.f32 %v6315_v49, %v6406_v2  ;;  %v359_v11 = vadd.f32 %v6197_v27, %v358_v29  ;;  %v541_v49 = vand.u32 2147483647, %v6366_v5 }
  0xe1   :  { %v332_v14 = vadd.f32 %v6197_v27, %v331_v7  ;;  %v6373_v10 = vpop.permute.xlu1 %1353  ;;  %v520_v20 = vmul.f32 %v6340_v15, %v519_v26  ;;  %v6386_v30 = vpop.permute.xlu0 %1348  ;;  %v656_v48 = vadd.f32 %v6325_v1, %v655_v13  ;;  %5362 = vpow2.f32 %v4711_v3  ;;  %v2933_v3 = vld [vmem:[#allocation6 + $0x550] sm:$0xff]  ;;  %v2438_v13 = vld [vmem:[#allocation6 + $0x408] sm:$0xff] }
  0xe2   :  { %v5357_v51 = vpop.eup %5356  ;;  %v650_v26 = vsel %vm6306_vm4, %v6310_v43, %v645_v53  ;;  %v1423_v53 = vmul.f32 %v6219_v59, %v1275_v33  ;;  %v543_v59 = vand.u32 2147483648, %v6366_v5  ;;  %vm537_vm0 = vweird.f32 %v6366_v5 }
  0xe3   :  { %v521_v7 = vadd.f32 %v6340_v15, %v520_v20  ;;  %v4703_v6 = vmul.f32 -1.442695, %v332_v14  ;;  %812 = vst.msk [vmem:[#allocation2 + $0x74] sm:$0xff] %vm772_vm2, %v650_v26  ;;  %v660_v43 = vsel %vm6381_vm12, %v6325_v1, %v656_v48  ;;  %v6416_v44 = vadd.f32 1.0, %v5357_v51  ;;  %v5125_v20 = vld [vmem:[#allocation12 + $0x48] sm:$0xff] }
  0xe4   :  { %v665_v16 = vsel %vm6392_vm13, %v664_v28, %v660_v43  ;;  %v5359_v63 = vpop.eup %5358  ;;  %1840 = vmatpush.bf16.msrb.mxu0 %v5125_v20  ;;  %v4712_v26 = vmul.f32 -1.442695, %v359_v11  ;;  %vm6458_vm1 = vcmp.eq.f32.partialorder %v541_v49, 8.507059e+37  ;;  %v544_v11 = vor.u32 1.1754944e-38, %v543_v59 }
  0xe5   :  { %v525_v14 = vsel %vm524_vm15, %v6340_v15, %v521_v7  ;;  %5364 = vpow2.f32 %v4703_v6  ;;  %813 = vst.msk [vmem:[#allocation2 + $0x7c] sm:$0xff] %vm772_vm2, %v665_v16  ;;  %v6430_v15 = vld [vmem:[#allocation2 + $0x24] sm:$0xff]  ;;  %v6438_v29 = vadd.f32 1.0, %v5359_v63  ;;  %vm672_vm4 = vweird.f32 %v6416_v44 }
  0xe6   :  { %v530_v1 = vsel %vm6402_vm14, %v529_v41, %v525_v14  ;;  %5366 = vrcp.f32 %v6416_v44  ;;  %2969 = vperm.xlu2 %5323, %v2934_v52   ;;  %v6432_v12 = vld [vmem:[#allocation2 + $0x2a] sm:$0xff]  ;;  %v6434_v28 = vpop.eup %5360  ;;  %v1443_v52 = vpack.c.bf16 %v1424_v34, %v1423_v53  ;;  %v6442_v7 = vld [vmem:[#allocation2 + $0x22] sm:$0xff]  ;;  %v2439_v53 = vld [vmem:[#allocation6 + $0x410] sm:$0xff] }
  0xe7   :  { %2964 = vperm.xlu1 %5322, %v2933_v3   ;;  %804 = vst.msk [vmem:[#allocation2 + $0x34] sm:$0xff] %vm772_vm2, %v530_v1  ;;  %2473 = vperm.xlu0 %5321, %v2438_v13   ;;  %v5363_v50 = vpop.eup %5362  ;;  %v1278_v51 = vld [vmem:[#allocation2 + $0x2c] sm:$0xff]  ;;  %v533_v33 = vmul.f32 %v6434_v28, %v6366_v5  ;;  %5368 = vrcp.f32 %v6438_v29  ;;  %v6451_v3 = vmul.f32 %v6302_v39, %v6430_v15  ;;  %v361_v63 = vpop.f32.mrf.mxu3  ;;  %v2118_v1 = vld [vmem:[#allocation6 + $0x370] sm:$0xff]  ;;  %vm538_vm3 = vweird.f32 %v6434_v28 }
  0xe8   :  { %v334_v48 = vpop.f32.mrf.mxu0  ;;  %v6444_v40 = vpop.permute.xlu2 %1398  ;;  %v1029_v41 = vpack.c.bf16 %v6432_v12, %v6442_v7  ;;  %v6462_v14 = vadd.f32 1.0, %v5363_v50  ;;  %4776 = vmatmul.msk.bf16.gmra.mxu3 %vm772_vm2, %v1443_v52  ;;  %v6466_v39 = vmul.f32 %v6229_v21, %v1278_v51  ;;  %5370 = vpow2.f32 %v4712_v26  ;;  %vm539_vm5 = vmor %vm537_vm0, %vm538_vm3 }
  0xe9   :  { %v6446_v6 = vpop.permute.xlu1 %1368  ;;  %v6455_v43 = vpop.permute.xlu0 %1363  ;;  %v534_v13 = vsub.f32 1.0, %v533_v33  ;;  %v335_v20 = vadd.f32 %v6197_v27, %v334_v48  ;;  %v676_v50 = vand.u32 2147483647, %v6416_v44  ;;  %v678_v52 = vand.u32 2147483648, %v6416_v44 }
  0xea   :  { %v556_v59 = vand.u32 2147483647, %v6438_v29  ;;  %5372 = vrcp.f32 %v6462_v14  ;;  %4731 = vmatmul.msk.bf16.gmra.mxu1 %vm772_vm2, %v1029_v41  ;;  %v558_v51 = vand.u32 2147483648, %v6438_v29  ;;  %vm552_vm8 = vweird.f32 %v6438_v29 }
  0xeb   :  { %v5365_v16 = vpop.eup %5364  ;;  %v535_v49 = vmul.f32 %v6434_v28, %v534_v13  ;;  %v362_v13 = vadd.f32 %v6197_v27, %v361_v63  ;;  %vm6492_vm7 = vcmp.eq.f32.partialorder %v676_v50, 8.507059e+37  ;;  %vm687_vm12 = vweird.f32 %v6462_v14 }
  0xec   :  { %v5367_v33 = vpop.eup %5366  ;;  %v6480_v26 = vadd.f32 1.0, %v5365_v16  ;;  %vm6516_vm10 = vcmp.eq.f32.partialorder %v556_v59, 8.507059e+37 }
  0xed   :  { %v668_v21 = vmul.f32 %v5367_v33, %v6416_v44  ;;  %v536_v48 = vadd.f32 %v6434_v28, %v535_v49  ;;  %v6483_v55 = vpop.eup %5368  ;;  %vm673_vm6 = vweird.f32 %v5367_v33  ;;  %v4704_v49 = vmul.f32 -1.442695, %v335_v20  ;;  %v2936_v44 = vld [vmem:[#allocation6 + $0x568] sm:$0xff] }
  0xee   :  { %2478 = vperm.xlu2 %5323, %v2439_v53   ;;  %v679_v53 = vor.u32 1.1754944e-38, %v678_v52  ;;  %v5371_v58 = vpop.eup %5370  ;;  %5374 = vrcp.f32 %v6480_v26  ;;  %vm6512_vm9 = vmor %vm672_vm4, %vm673_vm6  ;;  %vm553_vm11 = vweird.f32 %v6483_v55 }
  0xef   :  { %2161 = vperm.xlu1 %5322, %v2118_v1   ;;  %v669_v45 = vsub.f32 1.0, %v668_v21  ;;  %2156 = vperm.xlu0 %5321, %v2117_v25   ;;  %v540_v57 = vsel %vm539_vm5, %v6434_v28, %v536_v48  ;;  %v548_v1 = vmul.f32 %v6483_v55, %v6438_v29  ;;  %v6522_v41 = vadd.f32 1.0, %v5371_v58  ;;  %vm554_vm14 = vmor %vm552_vm8, %vm553_vm11 }
  0xf0   :  { %v337_v16 = vpop.f32.mrf.mxu0  ;;  %v6498_v5 = vpop.permute.xlu2 %1403  ;;  %v545_v20 = vsel %vm6458_vm1, %v544_v11, %v540_v57  ;;  %v4713_v57 = vmul.f32 -1.442695, %v362_v13  ;;  %5376 = vpow2.f32 %v4704_v49  ;;  %v2440_v13 = vld [vmem:[#allocation6 + $0x418] sm:$0xff]  ;;  %v693_v58 = vand.u32 2147483648, %v6462_v14 }
  0xf1   :  { %v6500_v21 = vpop.permute.xlu1 %1383  ;;  %v670_v25 = vmul.f32 %v5367_v33, %v669_v45  ;;  %v6506_v28 = vpop.permute.xlu0 %1378  ;;  %805 = vst.msk [vmem:[#allocation2 + $0x3c] sm:$0xff] %vm772_vm2, %v545_v20  ;;  %v549_v52 = vsub.f32 1.0, %v548_v1  ;;  %v559_v45 = vor.u32 1.1754944e-38, %v558_v51  ;;  %v338_v20 = vadd.f32 %v6197_v27, %v337_v16 }
  0xf2   :  { %v6520_v11 = vpop.eup %5372  ;;  %v691_v51 = vand.u32 2147483647, %v6462_v14  ;;  %5378 = vrcp.f32 %v6522_v41  ;;  %v364_v49 = vpop.f32.mrf.mxu3  ;;  %vm567_vm1 = vweird.f32 %v6480_v26  ;;  %vm702_vm4 = vweird.f32 %v6522_v41 }
  0xf3   :  { %v671_v48 = vadd.f32 %v5367_v33, %v670_v25  ;;  %v550_v23 = vmul.f32 %v6483_v55, %v549_v52  ;;  %v683_v59 = vmul.f32 %v6520_v11, %v6462_v14  ;;  %vm688_vm13 = vweird.f32 %v6520_v11 }
  0xf4   :  { %v6539_v24 = vpop.eup %5374  ;;  %5380 = vpow2.f32 %v4713_v57  ;;  %v4705_v63 = vmul.f32 -1.442695, %v338_v20  ;;  %vm6550_vm15 = vcmp.eq.f32.partialorder %v691_v51, 8.507059e+37  ;;  %vm6564_vm0 = vmor %vm687_vm12, %vm688_vm13  ;;  %v694_v51 = vor.u32 1.1754944e-38, %v693_v58  ;;  %v6582_v58 = vld [vmem:[#allocation2 + $0x32] sm:$0xff] }
  0xf5   :  { %v675_v1 = vsel %vm6512_vm9, %v5367_v33, %v671_v48  ;;  %v551_v25 = vadd.f32 %v6483_v55, %v550_v23  ;;  %v684_v52 = vsub.f32 1.0, %v683_v59  ;;  %v573_v33 = vand.u32 2147483648, %v6480_v26 }
  0xf6   :  { %v680_v16 = vsel %vm6492_vm7, %v679_v53, %v675_v1  ;;  %2979 = vperm.xlu2 %5323, %v2936_v44   ;;  %v365_v23 = vadd.f32 %v6197_v27, %v364_v49  ;;  %v563_v29 = vmul.f32 %v6539_v24, %v6480_v26  ;;  %v5377_v57 = vpop.eup %5376  ;;  %5382 = vpow2.f32 %v4705_v63 }
  0xf7   :  { %2974 = vperm.xlu1 %5322, %v2935_v31   ;;  %814 = vst.msk [vmem:[#allocation2 + $0x84] sm:$0xff] %vm772_vm2, %v680_v16  ;;  %2483 = vperm.xlu0 %5321, %v2440_v13   ;;  %v555_v50 = vsel %vm554_vm14, %v6483_v55, %v551_v25  ;;  %v685_v31 = vmul.f32 %v6520_v11, %v684_v52  ;;  %v571_v49 = vand.u32 2147483647, %v6480_v26  ;;  %v6576_v14 = vadd.f32 1.0, %v5377_v57 }
  0xf8   :  { %v340_v53 = vpop.f32.mrf.mxu0  ;;  %v6556_v44 = vpop.permute.xlu2 %1680  ;;  %v560_v20 = vsel %vm6516_vm10, %v559_v45, %v555_v50  ;;  %v6569_v13 = vld [vmem:[#allocation2 + $0x3a] sm:$0xff]  ;;  %v564_v45 = vsub.f32 1.0, %v563_v29  ;;  %v8458_v16 = vpack.c.bf16 %v6466_v39, %v6451_v3  ;;  %v574_v52 = vor.u32 1.1754944e-38, %v573_v33  ;;  %v2441_v29 = vld [vmem:[#allocation6 + $0x420] sm:$0xff] }
  0xf9   :  { %v1641_v59 = vpop.permute.xlu1 %1640  ;;  %v6571_v1 = vpop.permute.xlu0 %1393  ;;  %806 = vst.msk [vmem:[#allocation2 + $0x44] sm:$0xff] %vm772_vm2, %v560_v20  ;;  %v686_v34 = vadd.f32 %v6520_v11, %v685_v31  ;;  %v4714_v63 = vmul.f32 -1.442695, %v365_v23  ;;  %v341_v50 = vadd.f32 %v6197_v27, %v340_v53  ;;  %v1030_v31 = vpack.c.bf16 %v6569_v13, %v6582_v58  ;;  %v2120_v20 = vld [vmem:[#allocation6 + $0x380] sm:$0xff]  ;;  %v2119_v33 = vld [vmem:[#allocation6 + $0x378] sm:$0xff] }
  0xfa   :  { %4777 = vmatmul.msk.bf16.gmra.mxu3 %vm772_vm2, %v8458_v16  ;;  %v6584_v25 = vpop.eup %5378  ;;  %v565_v3 = vmul.f32 %v6539_v24, %v564_v45  ;;  %vm568_vm3 = vweird.f32 %v6539_v24  ;;  %v708_v16 = vand.u32 2147483648, %v6522_v41  ;;  %5384 = vrcp.f32 %v6576_v14 }
  0xfb   :  { %v690_v57 = vsel %vm6564_vm0, %v6520_v11, %v686_v34  ;;  %v698_v39 = vmul.f32 %v6584_v25, %v6522_v41  ;;  %v5381_v23 = vpop.eup %5380  ;;  %4732 = vmatmul.msk.bf16.gmra.mxu1 %vm772_vm2, %v1030_v31  ;;  %vm703_vm5 = vweird.f32 %v6584_v25  ;;  %v706_v34 = vand.u32 2147483647, %v6522_v41  ;;  %vm569_vm6 = vmor %vm567_vm1, %vm568_vm3 }
  0xfc   :  { %v695_v53 = vsel %vm6550_vm15, %v694_v51, %v690_v57  ;;  %v566_v11 = vadd.f32 %v6539_v24, %v565_v3  ;;  %v5383_v48 = vpop.eup %5382  ;;  %v6610_v51 = vadd.f32 1.0, %v5381_v23  ;;  %5386 = vpow2.f32 %v4714_v63  ;;  %v367_v57 = vpop.f32.mrf.mxu3  ;;  %vm6627_vm8 = vmor %vm702_vm4, %vm703_vm5  ;;  %v2938_v23 = vld [vmem:[#allocation6 + $0x578] sm:$0xff] }
  0xfd   :  { %815 = vst.msk [vmem:[#allocation2 + $0x8c] sm:$0xff] %vm772_vm2, %v695_v53  ;;  %v699_v55 = vsub.f32 1.0, %v698_v39  ;;  %v4706_v45 = vmul.f32 -1.442695, %v341_v50  ;;  %v1743_v31 = vmul.f32 %v1641_v59, %v6323_v54  ;;  %vm572_vm7 = vcmp.eq.f32.partialorder %v571_v49, 8.507059e+37  ;;  %v6614_v39 = vld [vmem:[#allocation2 + $0x3c] sm:$0xff] }
  0xfe   :  { %2488 = vperm.xlu2 %5323, %v2441_v29   ;;  %v570_v3 = vsel %vm569_vm6, %v6539_v24, %v566_v11  ;;  %v1744_v63 = vmul.f32 %v6371_v42, %v6298_v36  ;;  %v709_v24 = vor.u32 1.1754944e-38, %v708_v16  ;;  %5388 = vrcp.f32 %v6610_v51  ;;  %v6635_v49 = vld [vmem:[#allocation2 + $0x34] sm:$0xff] }
  0xff   :  { %2171 = vperm.xlu1 %5322, %v2120_v20   ;;  %2166 = vperm.xlu0 %5321, %v2119_v33   ;;  %v700_v29 = vmul.f32 %v6584_v25, %v699_v55  ;;  %v575_v26 = vsel %vm572_vm7, %v574_v52, %v570_v3  ;;  %vm707_vm9 = vcmp.eq.f32.partialorder %v706_v34, 8.507059e+37  ;;  %v6638_v36 = vadd.f32 1.0, %v5383_v48  ;;  %v2937_v16 = vld [vmem:[#allocation6 + $0x570] sm:$0xff]  ;;  %v2442_v34 = vld [vmem:[#allocation6 + $0x428] sm:$0xff] }
 0x100   :  { %v6617_v20 = vpop.permute.xlu2 %1690  ;;  %807 = vst.msk [vmem:[#allocation2 + $0x4c] sm:$0xff] %vm772_vm2, %v575_v26  ;;  %v5385_v42 = vpop.eup %5384  ;;  %v1428_v41 = vmul.f32 %v6373_v10, %v6614_v39  ;;  %5390 = vpow2.f32 %v4706_v45  ;;  %v1764_v50 = vpack.c.bf16 %v1744_v63, %v1743_v31  ;;  %v368_v33 = vadd.f32 %v6197_v27, %v367_v57 }
 0x101   :  { %v6619_v53 = vpop.permute.xlu1 %1655  ;;  %v6632_v59 = vpop.permute.xlu0 %1650  ;;  %v701_v52 = vadd.f32 %v6584_v25, %v700_v29  ;;  %v578_v55 = vmul.f32 %v5385_v42, %v6576_v14  ;;  %v1427_v29 = vmul.f32 %v6386_v30, %v6635_v49  ;;  %v586_v10 = vand.u32 2147483647, %v6576_v14 }
 0x102   :  { %v343_v3 = vpop.f32.mrf.mxu0  ;;  %v5387_v48 = vpop.eup %5386  ;;  %5392 = vrcp.f32 %v6638_v36  ;;  %4798 = vmatmul.msk.bf16.vlgmr.msrb.gmra.mxu0 %vm772_vm2, %v1764_v50  ;;  %v588_v63 = vand.u32 2147483648, %v6576_v14  ;;  %v4715_v30 = vmul.f32 -1.442695, %v368_v33  ;;  %vm583_vm10 = vweird.f32 %v5385_v42 }
 0x103   :  { %v705_v11 = vsel %vm6627_vm8, %v6584_v25, %v701_v52  ;;  %v579_v45 = vsub.f32 1.0, %v578_v55  ;;  %v6653_v31 = vadd.f32 1.0, %v5387_v48  ;;  %v1445_v57 = vpack.c.bf16 %v1428_v41, %v1427_v29 }
 0x104   :  { %v710_v26 = vsel %vm707_vm9, %v709_v24, %v705_v11  ;;  %v6655_v25 = vpop.eup %5388  ;;  %v344_v54 = vadd.f32 %v6197_v27, %v343_v3  ;;  %v721_v50 = vand.u32 2147483647, %v6610_v51  ;;  %vm582_vm11 = vweird.f32 %v6576_v14 }
 0x105   :  { %816 = vst.msk [vmem:[#allocation2 + $0x94] sm:$0xff] %vm772_vm2, %v710_v26  ;;  %v580_v24 = vmul.f32 %v5385_v42, %v579_v45  ;;  %v713_v52 = vmul.f32 %v6655_v25, %v6610_v51  ;;  %vm6667_vm12 = vcmp.eq.f32.partialorder %v586_v10, 8.507059e+37  ;;  %v723_v27 = vand.u32 2147483648, %v6610_v51  ;;  %vm584_vm15 = vmor %vm582_vm11, %vm583_vm10  ;;  %v2443_v10 = vld [vmem:[#allocation6 + $0x430] sm:$0xff] }
 0x106   :  { %2989 = vperm.xlu2 %5323, %v2938_v23   ;;  %5394 = vrcp.f32 %v6653_v31  ;;  %vm717_vm13 = vweird.f32 %v6610_v51  ;;  %vm718_vm14 = vweird.f32 %v6655_v25  ;;  %v589_v48 = vor.u32 1.1754944e-38, %v588_v63  ;;  %v2122_v45 = vld [vmem:[#allocation6 + $0x390] sm:$0xff] }
 0x107   :  { %2984 = vperm.xlu1 %5322, %v2937_v16   ;;  %2493 = vperm.xlu0 %5321, %v2442_v34   ;;  %v5391_v16 = vpop.eup %5390  ;;  %v581_v55 = vadd.f32 %v5385_v42, %v580_v24  ;;  %v714_v3 = vsub.f32 1.0, %v713_v52  ;;  %v5130_v34 = vld [vmem:[#allocation12 + $0x70] sm:$0xff]  ;;  %5396 = vpow2.f32 %v4715_v30  ;;  %v4707_v26 = vmul.f32 -1.442695, %v344_v54  ;;  %vm6696_vm1 = vmor %vm717_vm13, %vm718_vm14  ;;  %v5129_v54 = vld [vmem:[#allocation12 + $0x68] sm:$0xff] }
 0x108   :  { %v6662_v11 = vpop.permute.xlu2 %1700  ;;  %v6678_v14 = vpop.eup %5392  ;;  %v6681_v29 = vadd.f32 1.0, %v5391_v16  ;;  %vm6684_vm0 = vcmp.eq.f32.partialorder %v721_v50, 8.507059e+37  ;;  %2012 = vmatpush.bf16.msrb.mxu1 %v5130_v34  ;;  %v724_v30 = vor.u32 1.1754944e-38, %v723_v27  ;;  %vm597_vm3 = vweird.f32 %v6638_v36  ;;  %v6713_v34 = vld [vmem:[#allocation2 + $0x4a] sm:$0xff] }
 0x109   :  { %v6664_v23 = vpop.permute.xlu1 %1665  ;;  %v6673_v33 = vpop.permute.xlu0 %1660  ;;  %v585_v24 = vsel %vm584_vm15, %v5385_v42, %v581_v55  ;;  %v715_v52 = vmul.f32 %v6655_v25, %v714_v3  ;;  %v601_v41 = vand.u32 2147483647, %v6638_v36  ;;  %v603_v55 = vand.u32 2147483648, %v6638_v36 }
 0x10a   :  { %4778 = vmatmul.msk.bf16.gmra.mxu3 %vm772_vm2, %v1445_v57  ;;  %v593_v57 = vmul.f32 %v6678_v14, %v6638_v36  ;;  %v590_v63 = vsel %vm6667_vm12, %v589_v48, %v585_v24  ;;  %5398 = vrcp.f32 %v6681_v29  ;;  %vm732_vm4 = vweird.f32 %v6653_v31  ;;  %v6715_v48 = vld [vmem:[#allocation2 + $0x4c] sm:$0xff]  ;;  %v6733_v24 = vld [vmem:[#allocation2 + $0x42] sm:$0xff] }
 0x10b   :  { %808 = vst.msk [vmem:[#allocation2 + $0x54] sm:$0xff] %vm772_vm2, %v590_v63  ;;  %v716_v50 = vadd.f32 %v6655_v25, %v715_v52  ;;  %5400 = vpow2.f32 %v4707_v26  ;;  %v1746_v27 = vmul.f32 %v6619_v53, %v6432_v12  ;;  %v1745_v3 = vmul.f32 %v6632_v59, %v6442_v7  ;;  %v6737_v63 = vld [vmem:[#allocation2 + $0x44] sm:$0xff] }
 0x10c   :  { %v594_v16 = vsub.f32 1.0, %v593_v57  ;;  %v6706_v51 = vpop.eup %5394  ;;  %vm598_vm5 = vweird.f32 %v6678_v14  ;;  %2013 = vmatpush.bf16.msrb.mxu1 %v5129_v54  ;;  %v736_v59 = vand.u32 2147483647, %v6653_v31  ;;  %v5128_v57 = vld [vmem:[#allocation12 + $0x60] sm:$0xff]  ;;  %vm602_vm8 = vcmp.eq.f32.partialorder %v601_v41, 8.507059e+37 }
 0x10d   :  { %v728_v26 = vmul.f32 %v6706_v51, %v6653_v31  ;;  %v5397_v7 = vpop.eup %5396  ;;  %vm733_vm6 = vweird.f32 %v6706_v51  ;;  %vm599_vm7 = vmor %vm597_vm3, %vm598_vm5  ;;  %v1765_v61 = vpack.c.bf16 %v1746_v27, %v1745_v3  ;;  %v1429_v4 = vmul.f32 %v6245_v56, %v6737_v63 }
 0x10e   :  { %2498 = vperm.xlu2 %5323, %v2443_v10   ;;  %v720_v10 = vsel %vm6696_vm1, %v6655_v25, %v716_v50  ;;  %v738_v25 = vand.u32 2147483648, %v6653_v31  ;;  %v6741_v18 = vadd.f32 1.0, %v5397_v7  ;;  %vm6761_vm9 = vmor %vm732_vm4, %vm733_vm6  ;;  %vm6769_vm10 = vcmp.eq.f32.partialorder %v736_v59, 8.507059e+37  ;;  %v5118_v31 = vld [vmem:[#allocation12 + $0x10] sm:$0xff] }
 0x10f   :  { %2181 = vperm.xlu1 %5322, %v2122_v45   ;;  %2176 = vperm.xlu0 %5321, %v2121_v62   ;;  %v595_v45 = vmul.f32 %v6678_v14, %v594_v16  ;;  %v725_v62 = vsel %vm6684_vm0, %v724_v30, %v720_v10  ;;  %v729_v54 = vsub.f32 1.0, %v728_v26  ;;  %v1031_v30 = vpack.c.bf16 %v6713_v34, %v6733_v24 }
 0x110   :  { %v6724_v12 = vpop.permute.xlu2 %1715  ;;  %817 = vst.msk [vmem:[#allocation2 + $0x9c] sm:$0xff] %vm772_vm2, %v725_v62  ;;  %v5399_v50 = vpop.eup %5398  ;;  %v1430_v16 = vmul.f32 %v6455_v43, %v6715_v48  ;;  %v604_v10 = vor.u32 1.1754944e-38, %v603_v55  ;;  %v2940_v62 = vld [vmem:[#allocation6 + $0x588] sm:$0xff]  ;;  %v739_v41 = vor.u32 1.1754944e-38, %v738_v25  ;;  %5402 = vrcp.f32 %v6741_v18  ;;  %2014 = vmatpush.bf16.msrb.mxu1 %v5128_v57  ;;  %1215 = vmatpush.bf16.msrb.mxu2 %v5118_v31 }
 0x111   :  { %v6726_v53 = vpop.permute.xlu1 %1675  ;;  %v6735_v52 = vpop.permute.xlu0 %1670  ;;  %v596_v42 = vadd.f32 %v6678_v14, %v595_v45  ;;  %v730_v26 = vmul.f32 %v6706_v51, %v729_v54  ;;  %v608_v7 = vmul.f32 %v5399_v50, %v6681_v29  ;;  %4733 = vmatmul.msk.bf16.gmra.mxu1 %vm772_vm2, %v1031_v30  ;;  %vm613_vm11 = vweird.f32 %v5399_v50 }
 0x112   :  { %v5401_v43 = vpop.eup %5400  ;;  %4799 = vmatmul.msk.bf16.gmra.mxu0 %vm772_vm2, %v1765_v61  ;;  %v1446_v3 = vpack.c.bf16 %v1430_v16, %v1429_v4  ;;  %v616_v59 = vand.u32 2147483647, %v6681_v29  ;;  %vm612_vm12 = vweird.f32 %v6681_v29  ;;  %vm747_vm15 = vweird.f32 %v6741_v18 }
 0x113   :  { %v600_v45 = vsel %vm599_vm7, %v6678_v14, %v596_v42  ;;  %v731_v55 = vadd.f32 %v6706_v51, %v730_v26  ;;  %v609_v27 = vsub.f32 1.0, %v608_v7  ;;  %v618_v42 = vand.u32 2147483648, %v6681_v29  ;;  %vm614_vm13 = vmor %vm612_vm12, %vm613_vm11  ;;  %v2124_v26 = vld [vmem:[#allocation6 + $0x3a0] sm:$0xff]  ;;  %v2123_v7 = vld [vmem:[#allocation6 + $0x398] sm:$0xff] }
 0x114   :  { %v605_v36 = vsel %vm602_vm8, %v604_v10, %v600_v45  ;;  %v6774_v25 = vadd.f32 1.0, %v5401_v43  ;;  %v2445_v10 = vld [vmem:[#allocation6 + $0x440] sm:$0xff]  ;;  %vm617_vm14 = vcmp.eq.f32.partialorder %v616_v59, 8.507059e+37  ;;  %v1748_v56 = vmul.f32 %v6664_v23, %v6569_v13 }
 0x115   :  { %809 = vst.msk [vmem:[#allocation2 + $0x5c] sm:$0xff] %vm772_vm2, %v605_v36  ;;  %v735_v61 = vsel %vm6761_vm9, %v6706_v51, %v731_v55  ;;  %v610_v57 = vmul.f32 %v5399_v50, %v609_v27  ;;  %v619_v16 = vor.u32 1.1754944e-38, %v618_v42  ;;  %v753_v36 = vand.u32 2147483648, %v6741_v18  ;;  %v6799_v55 = vld [vmem:[#allocation2 + $0x52] sm:$0xff] }
 0x116   :  { %2999 = vperm.xlu2 %5323, %v2940_v62   ;;  %v740_v4 = vsel %vm6769_vm10, %v739_v41, %v735_v61  ;;  %5404 = vrcp.f32 %v6774_v25  ;;  %v5403_v51 = vpop.eup %5402  ;;  %v751_v41 = vand.u32 2147483647, %v6741_v18  ;;  %v1747_v27 = vmul.f32 %v6673_v33, %v6582_v58 }
 0x117   :  { %2994 = vperm.xlu1 %5322, %v2939_v46   ;;  %2503 = vperm.xlu0 %5321, %v2444_v8   ;;  %818 = vst.msk [vmem:[#allocation2 + $0xa4] sm:$0xff] %vm772_vm2, %v740_v4  ;;  %v611_v8 = vadd.f32 %v5399_v50, %v610_v57  ;;  %v743_v45 = vmul.f32 %v5403_v51, %v6741_v18  ;;  %vm748_vm0 = vweird.f32 %v5403_v51  ;;  %v754_v13 = vor.u32 1.1754944e-38, %v753_v36  ;;  %v2942_v18 = vld [vmem:[#allocation6 + $0x598] sm:$0xff]  ;;  %v2446_v36 = vld [vmem:[#allocation6 + $0x448] sm:$0xff] }
 0x118   :  { %v6780_v54 = vpop.permute.xlu2 %1725  ;;  %vm6814_vm1 = vmor %vm747_vm15, %vm748_vm0  ;;  %vm752_vm3 = vcmp.eq.f32.partialorder %v751_v41, 8.507059e+37  ;;  %vm627_vm5 = vweird.f32 %v6774_v25  ;;  %vm798_vm8 = vcmask 386048  }
 0x119   :  { %v6782_v30 = vpop.permute.xlu1 %1408  ;;  %v6787_v46 = vpop.permute.xlu0 %1685  ;;  %v615_v62 = vsel %vm614_vm13, %v5399_v50, %v611_v8  ;;  %v744_v29 = vsub.f32 1.0, %v743_v45  ;;  %v6822_v8 = vld [vmem:[#allocation2 + $0x54] sm:$0xff] }
 0x11a   :  { %4779 = vmatmul.msk.bf16.gmra.mxu3 %vm772_vm2, %v1446_v3  ;;  %v620_v43 = vsel %vm617_vm14, %v619_v16, %v615_v62  ;;  %8473 = vst [vmem:[#allocation51_spill] sm:$0xff] %v6822_v8  ;;  %v631_v16 = vand.u32 2147483647, %v6774_v25  ;;  %v1766_v62 = vpack.c.bf16 %v1748_v56, %v1747_v27  ;;  %v1431_v41 = vmul.f32 %v6446_v6, %v6822_v8 }
 0x11b   :  { %810 = vst.msk [vmem:[#allocation2 + $0x64] sm:$0xff] %vm772_vm2, %v620_v43  ;;  %v745_v31 = vmul.f32 %v5403_v51, %v744_v29  ;;  %v2941_v43 = vld [vmem:[#allocation6 + $0x590] sm:$0xff] }
 0x11c   :  { %v6794_v14 = vld [vmem:[#allocation2 + $0x5a] sm:$0xff]  ;;  %v5405_v50 = vpop.eup %5404  ;;  %vm632_vm7 = vcmp.eq.f32.partialorder %v631_v16, 8.507059e+37 }
 0x11d   :  { %v623_v3 = vmul.f32 %v5405_v50, %v6774_v25  ;;  %v1032_v42 = vpack.c.bf16 %v6794_v14, %v6799_v55  ;;  %v6820_v23 = vld [vmem:[#allocation2 + $0x5c] sm:$0xff]  ;;  %v746_v33 = vadd.f32 %v5403_v51, %v745_v31  ;;  %vm628_vm4 = vweird.f32 %v5405_v50  ;;  %v1917_v16 = vld [vmem:[#allocation2 + $0x14] sm:$0xff] }
 0x11e   :  { %2508 = vperm.xlu2 %5323, %v2445_v10   ;;  %v633_v10 = vand.u32 2147483648, %v6774_v25  ;;  %vm629_vm6 = vmor %vm627_vm5, %vm628_vm4  ;;  %v2447_v25 = vld [vmem:[#allocation6 + $0x450] sm:$0xff] }
 0x11f   :  { %2191 = vperm.xlu1 %5322, %v2124_v26   ;;  %2186 = vperm.xlu0 %5321, %v2123_v7   ;;  %v624_v4 = vsub.f32 1.0, %v623_v3  ;;  %v750_v45 = vsel %vm6814_vm1, %v5403_v51, %v746_v33  ;;  %v1432_v7 = vmul.f32 %v6262_v37, %v6820_v23  ;;  %v5117_v51 = vld [vmem:[#allocation12 + $0x8] sm:$0xff] }
 0x120   :  { %v6808_v61 = vpop.permute.xlu2 %1740  ;;  %v755_v29 = vsel %vm752_vm3, %v754_v13, %v750_v45  ;;  %v634_v27 = vor.u32 1.1754944e-38, %v633_v10  ;;  %1216 = vmatpush.bf16.msrb.mxu2 %v5117_v51  ;;  %v2126_v13 = vld [vmem:[#allocation6 + $0x3b0] sm:$0xff]  ;;  %v2125_v33 = vld [vmem:[#allocation6 + $0x3a8] sm:$0xff]  ;;  %v5494_v51 = vld [vmem:[#allocation11] ss:$0 sm:$0xff] }
 0x121   :  { %v6810_v57 = vpop.permute.xlu1 %1413  ;;  %v6818_v58 = vpop.permute.xlu0 %1695  ;;  %v625_v26 = vmul.f32 %v5405_v50, %v624_v4  ;;  %4734 = vmatmul.msk.bf16.gmra.mxu1 %vm772_vm2, %v1032_v42  ;;  %819 = vst.msk [vmem:[#allocation2 + $0xac] sm:$0xff] %vm772_vm2, %v755_v29  ;;  %v1447_v31 = vpack.c.bf16 %v1432_v7, %v1431_v41  ;;  %v1749_v4 = vmul.f32 %v6735_v52, %v6733_v24  ;;  %v2943_v29 = vld [vmem:[#allocation6 + $0x5a0] sm:$0xff]  ;;  %v2448_v41 = vld [vmem:[#allocation6 + $0x458] sm:$0xff] }
 0x122   :  { %4800 = vmatmul.msk.bf16.gmra.mxu0 %vm772_vm2, %v1766_v62  ;;  %v6863_v52 = vld [vmem:[#allocation2 + $0x64] sm:$0xff] }
 0x123   :  { %v626_v56 = vadd.f32 %v5405_v50, %v625_v26 }
 0x125   :  { %v630_v37 = vsel %vm629_vm6, %v5405_v50, %v626_v56  ;;  %v1750_v50 = vmul.f32 %v6726_v53, %v6713_v34  ;;  %v1938_v53 = vpack.c.bf16 %v6406_v2, %v1917_v16  ;;  %v370_v56 = vpop.f32.mrf.mxu3  ;;  %v1433_v2 = vmul.f32 %v6506_v28, %v6863_v52  ;;  %v2449_v28 = vld [vmem:[#allocation6 + $0x460] sm:$0xff] }
 0x126   :  { %3009 = vperm.xlu2 %5323, %v2942_v18   ;;  %v635_v6 = vsel %vm632_vm7, %v634_v27, %v630_v37  ;;  %v6852_v18 = vld [vmem:[#allocation2 + $0x62] sm:$0xff]  ;;  %v371_v27 = vadd.f32 %v5494_v51, %v370_v56  ;;  %v8474_v37 = vmov 0.0   ;;  %v1752_v16 = vmul.f32 %v6787_v46, %v6794_v14  ;;  %v2091_v14 = vld [vmem:[#allocation2 + $0x16] sm:$0xff] }
 0x127   :  { %3004 = vperm.xlu1 %5322, %v2941_v43   ;;  %2513 = vperm.xlu0 %5321, %v2446_v36   ;;  %811 = vst.msk [vmem:[#allocation2 + $0x6c] sm:$0xff] %vm772_vm2, %v635_v6  ;;  %v1767_v24 = vpack.c.bf16 %v1750_v50, %v1749_v4  ;;  %v2944_v43 = vld [vmem:[#allocation6 + $0x5a8] sm:$0xff]  ;;  %v2127_v50 = vld [vmem:[#allocation6 + $0x3b8] sm:$0xff] }
 0x128   :  { %v6836_v3 = vpop.permute.xlu2 %2458  ;;  %799 = vst.msk [vmem:[#allocation2 + $0xc8] sm:$0x3] %vm798_vm8, %v8474_v37  ;;  %v6891_v56 = vld [vmem:[#allocation2 + $0x7c] sm:$0xff] }
 0x129   :  { %v6838_v42 = vpop.permute.xlu1 %1710  ;;  %v6840_v59 = vpop.permute.xlu0 %1705 }
 0x12a   :  { %4780 = vmatmul.msk.bf16.gmra.mxu3 %vm772_vm2, %v1447_v31 }
 0x12e   :  { %2518 = vperm.xlu2 %5323, %v2447_v25   ;;  %v6854_v45 = vld [vmem:[#allocation2 + $0x6a] sm:$0xff]  ;;  %v4716_v25 = vmul.f32 -1.442695, %v371_v27  ;;  %v6881_v4 = vld [vmem:[#allocation2 + $0x72] sm:$0xff] }
 0x12f   :  { %2201 = vperm.xlu1 %5322, %v2126_v13   ;;  %2196 = vperm.xlu0 %5321, %v2125_v33   ;;  %v6858_v7 = vld [vmem:[#allocation2 + $0x6c] sm:$0xff]  ;;  %v1033_v34 = vpack.c.bf16 %v6854_v45, %v6852_v18 }
 0x130   :  { %v6848_v10 = vpop.permute.xlu2 %2959  ;;  %v1434_v36 = vmul.f32 %v6500_v21, %v6858_v7  ;;  %5406 = vpow2.f32 %v4716_v25  ;;  %v2128_v33 = vld [vmem:[#allocation6 + $0x3c0] sm:$0xff] }
 0x131   :  { %v6850_v62 = vpop.permute.xlu1 %1720  ;;  %v6856_v26 = vpop.permute.xlu0 %1418  ;;  %4735 = vmatmul.msk.bf16.vlgmr.msra.gmra.mxu2 %vm772_vm2, %v1033_v34  ;;  %4821 = vmatmul.msk.bf16.vlgmr.msrb.gmra.mxu1 %vm772_vm2, %v1938_v53  ;;  %v6885_v34 = vld [vmem:[#allocation2 + $0x2c] sm:$0xff] }
 0x132   :  { %4801 = vmatmul.msk.bf16.gmra.mxu0 %vm772_vm2, %v1767_v24  ;;  %v1448_v31 = vpack.c.bf16 %v1434_v36, %v1433_v2  ;;  %v1287_v24 = vld [vmem:[#allocation2 + $0x74] sm:$0xff] }
 0x133   :  { %v6893_v2 = vld [vmem:[#allocation2 + $0x7a] sm:$0xff] }
 0x134   :  { %v1034_v37 = vpack.c.bf16 %v6893_v2, %v6881_v4 }
 0x136   :  { %3019 = vperm.xlu2 %5323, %v2944_v43   ;;  %v5407_v53 = vpop.eup %5406 }
 0x137   :  { %3014 = vperm.xlu1 %5322, %v2943_v29   ;;  %2523 = vperm.xlu0 %5321, %v2448_v41   ;;  %v2092_v29 = vld [vmem:[#allocation2 + $0x1e] sm:$0xff]  ;;  %v1751_v41 = vmul.f32 %v6556_v44, %v6799_v55  ;;  %v456_v27 = vadd.f32 1.0, %v5407_v53  ;;  %v1435_v44 = vmul.f32 %v6300_v38, %v1287_v24  ;;  %v1436_v55 = vmul.f32 %v6571_v1, %v6891_v56  ;;  %v6913_v1 = vld [vmem:[#allocation2 + $0x30] sm:$0xff] }
 0x138   :  { %v6874_v6 = vpop.permute.xlu2 %2468  ;;  %v2945_v53 = vld [vmem:[#allocation6 + $0x5b0] sm:$0xff] }
 0x139   :  { %v6876_v21 = vpop.permute.xlu1 %1735  ;;  %v6878_v13 = vpop.permute.xlu0 %1730  ;;  %5408 = vrcp.f32 %v456_v27  ;;  %v1449_v38 = vpack.c.bf16 %v1436_v55, %v1435_v44  ;;  %v2451_v44 = vld [vmem:[#allocation6 + $0x470] sm:$0xff]  ;;  %v768_v55 = vand.u32 2147483648, %v456_v27  ;;  %vm762_vm9 = vweird.f32 %v456_v27 }
 0x13a   :  { %4781 = vmatmul.msk.bf16.gmra.mxu3 %vm772_vm2, %v1448_v31  ;;  %v1939_v31 = vpack.c.bf16 %v6885_v34, %v6430_v15  ;;  %v5116_v15 = vld [vmem:[#allocation12] sm:$0xff] }
 0x13b   :  { %1217 = vmatpush.bf16.msrb.mxu2 %v5116_v15 }
 0x13e   :  { %2528 = vperm.xlu2 %5323, %v2449_v28   ;;  %v1768_v28 = vpack.c.bf16 %v1752_v16, %v1751_v41  ;;  %v6911_v16 = vpop.f32.mrf.mxu1  ;;  %v6917_v41 = vld [vmem:[#allocation2 + $0x28] sm:$0xff] }
 0x13f   :  { %2211 = vperm.xlu1 %5322, %v2128_v33   ;;  %2206 = vperm.xlu0 %5321, %v2127_v50   ;;  %v2946_v33 = vld [vmem:[#allocation6 + $0x5b8] sm:$0xff]  ;;  %8477 = vst [vmem:[#allocation54_spill] sm:$0xff] %v6911_v16 }
 0x140   :  { %v6887_v43 = vpop.permute.xlu2 %2969  ;;  %v6933_v16 = vld [vmem:[#allocation2 + $0x82] sm:$0xff] }
 0x141   :  { %v2142_v36 = vpop.permute.xlu1 %2141  ;;  %v2137_v46 = vpop.permute.xlu0 %2136  ;;  %4736 = vmatmul.msk.bf16.gmra.mxu2 %vm772_vm2, %v1034_v37  ;;  %4822 = vmatmul.msk.bf16.gmra.mxu1 %vm772_vm2, %v1939_v31 }
 0x142   :  { %v6895_v51 = vmul.f32 %v2142_v36, %v2092_v29  ;;  %v6901_v25 = vmul.f32 %v2137_v46, %v2091_v14  ;;  %v2450_v36 = vld [vmem:[#allocation6 + $0x468] sm:$0xff]  ;;  %4802 = vmatmul.msk.bf16.gmra.mxu0 %vm772_vm2, %v1768_v28  ;;  %v5409_v46 = vpop.eup %5408  ;;  %v6921_v14 = vmul.f32 %v6848_v10, %v6913_v1  ;;  %v766_v10 = vand.u32 2147483647, %v456_v27 }
 0x143   :  { %v758_v28 = vmul.f32 %v5409_v46, %v456_v27  ;;  %vm763_vm10 = vweird.f32 %v5409_v46 }
 0x144   :  { %8475 = vst [vmem:[#allocation52_spill] sm:$0xff] %v6895_v51  ;;  %vm6937_vm11 = vmor %vm762_vm9, %vm763_vm10  ;;  %vm767_vm12 = vcmp.eq.f32.partialorder %v766_v10, 8.507059e+37 }
 0x145   :  { %8476 = vst [vmem:[#allocation53_spill] sm:$0xff] %v6901_v25  ;;  %v759_v15 = vsub.f32 1.0, %v758_v28  ;;  %v769_v25 = vor.u32 1.1754944e-38, %v768_v55  ;;  %v1289_v28 = vld [vmem:[#allocation2 + $0x84] sm:$0xff] }
 0x146   :  { %3029 = vperm.xlu2 %5323, %v2946_v33   ;;  %8478 = vst [vmem:[#allocation55_spill] sm:$0xff] %v6921_v14  ;;  %v1940_v14 = vpack.c.bf16 %v6614_v39, %v6635_v49  ;;  %v2947_v49 = vld [vmem:[#allocation6 + $0x5c0] sm:$0xff]  ;;  %v6975_v33 = vld [vmem:[#allocation2 + $0x38] sm:$0xff]  ;;  %v2950_v39 = vld [vmem:[#allocation6 + $0x5d8] sm:$0xff] }
 0x147   :  { %3024 = vperm.xlu1 %5322, %v2945_v53   ;;  %2533 = vperm.xlu0 %5321, %v2450_v36   ;;  %v2130_v53 = vld [vmem:[#allocation6 + $0x3d0] sm:$0xff]  ;;  %v2129_v36 = vld [vmem:[#allocation6 + $0x3c8] sm:$0xff]  ;;  %v760_v50 = vmul.f32 %v5409_v46, %v759_v15 }
 0x148   :  { %v6915_v24 = vpop.permute.xlu2 %2478 }
 0x149   :  { %v2955_v29 = vpop.permute.xlu1 %2954  ;;  %v6926_v31 = vpop.permute.xlu0 %2463  ;;  %v761_v15 = vadd.f32 %v5409_v46, %v760_v50 }
 0x14a   :  { %v6924_v37 = vmul.f32 %v2955_v29, %v6917_v41  ;;  %4782 = vmatmul.msk.bf16.gmra.mxu3 %vm772_vm2, %v1449_v38  ;;  %v1754_v29 = vmul.f32 %v6818_v58, %v6854_v45  ;;  %v6935_v38 = vpop.f32.mrf.mxu1  ;;  %v1290_v58 = vld [vmem:[#allocation2 + $0x8c] sm:$0xff]  ;;  %v1753_v45 = vmul.f32 %v6617_v20, %v6852_v18 }
 0x14b   :  { %8480 = vst [vmem:[#allocation57_spill] sm:$0xff] %v6935_v38  ;;  %v6947_v38 = vld [vmem:[#allocation2 + $0x8a] sm:$0xff]  ;;  %v765_v20 = vsel %vm6937_vm11, %v5409_v46, %v761_v15  ;;  %v1438_v8 = vmul.f32 %v6498_v5, %v1290_v58 }
 0x14c   :  { %8479 = vst [vmem:[#allocation56_spill] sm:$0xff] %v6924_v37  ;;  %v6952_v37 = vld [vmem:[#allocation2 + $0x26] sm:$0xff]  ;;  %v1035_v55 = vpack.c.bf16 %v6947_v38, %v6933_v16  ;;  %v1769_v18 = vpack.c.bf16 %v1754_v29, %v1753_v45  ;;  %v770_v10 = vsel %vm767_vm12, %v769_v25, %v765_v20  ;;  %v6995_v20 = vld [vmem:[#allocation2 + $0x92] sm:$0xff] }
 0x14d   :  { %820 = vst.msk [vmem:[#allocation2 + $0xb4] sm:$0x3] %vm798_vm8, %v770_v10  ;;  %v2453_v15 = vld [vmem:[#allocation6 + $0x480] sm:$0xff]  ;;  %v2131_v45 = vld [vmem:[#allocation6 + $0x3d8] sm:$0xff] }
 0x14e   :  { %2538 = vperm.xlu2 %5323, %v2451_v44   ;;  %v6943_v44 = vld [vmem:[#allocation2 + $0x2e] sm:$0xff]  ;;  %v6997_v10 = vld [vmem:[#allocation2 + $0x3e] sm:$0xff] }
 0x14f   :  { %2221 = vperm.xlu1 %5322, %v2130_v53   ;;  %2216 = vperm.xlu0 %5321, %v2129_v36   ;;  %v2132_v58 = vld [vmem:[#allocation6 + $0x3e0] sm:$0xff] }
 0x150   :  { %v6941_v51 = vpop.permute.xlu2 %2979 }
 0x151   :  { %v2152_v27 = vpop.permute.xlu1 %2151  ;;  %v2147_v36 = vpop.permute.xlu0 %2146  ;;  %4737 = vmatmul.msk.bf16.gmra.mxu2 %vm772_vm2, %v1035_v55  ;;  %4823 = vmatmul.msk.bf16.gmra.mxu1 %vm772_vm2, %v1940_v14 }
 0x152   :  { %v6950_v53 = vmul.f32 %v2152_v27, %v6943_v44  ;;  %v6959_v50 = vmul.f32 %v2147_v36, %v6952_v37  ;;  %v1437_v27 = vmul.f32 %v6444_v40, %v1289_v28  ;;  %v2452_v36 = vld [vmem:[#allocation6 + $0x478] sm:$0xff]  ;;  %4803 = vmatmul.msk.bf16.gmra.mxu0 %vm772_vm2, %v1769_v18 }
 0x153   :  { %v6971_v40 = vld [vmem:[#allocation2 + $0x40] sm:$0xff] }
 0x154   :  { %8483 = vst [vmem:[#allocation58_spill] sm:$0xff] %v6950_v53  ;;  %v1450_v25 = vpack.c.bf16 %v1438_v8, %v1437_v27  ;;  %v6979_v14 = vmul.f32 %v6887_v43, %v6971_v40  ;;  %v1756_v43 = vmul.f32 %v6840_v59, %v6893_v2  ;;  %v1755_v27 = vmul.f32 %v6662_v11, %v6881_v4  ;;  %v7021_v4 = vld [vmem:[#allocation2 + $0x94] sm:$0xff]  ;;  %v1293_v53 = vld [vmem:[#allocation2 + $0xa4] sm:$0x3] }
 0x155   :  { %8484 = vst [vmem:[#allocation59_spill] sm:$0xff] %v6959_v50  ;;  %v1941_v2 = vpack.c.bf16 %v6715_v48, %v6737_v63  ;;  %v2949_v8 = vld [vmem:[#allocation6 + $0x5d0] sm:$0xff]  ;;  %v5136_v50 = vld [vmem:[#allocation12 + $0xa0] sm:$0xff] }
 0x156   :  { %3039 = vperm.xlu2 %5323, %v2948_v47   ;;  %v7036_v48 = vld [vmem:[#allocation2 + $0x48] sm:$0xff]  ;;  %2656 = vmatpush.bf16.msra.mxu3 %v5136_v50 }
 0x157   :  { %3034 = vperm.xlu1 %5322, %v2947_v49   ;;  %2543 = vperm.xlu0 %5321, %v2452_v36   ;;  %v6986_v47 = vpop.f32.mrf.mxu1  ;;  %v7001_v49 = vld [vmem:[#allocation2 + $0x9a] sm:$0xff]  ;;  %v2951_v50 = vld [vmem:[#allocation6 + $0x5e0] sm:$0x3] }
 0x158   :  { %v6973_v5 = vpop.permute.xlu2 %2488  ;;  %8485 = vst [vmem:[#allocation60_spill] sm:$0xff] %v6986_v47  ;;  %v7003_v36 = vld [vmem:[#allocation2 + $0x9c] sm:$0xff]  ;;  %v1036_v59 = vpack.c.bf16 %v7001_v49, %v6995_v20 }
 0x159   :  { %v2965_v46 = vpop.permute.xlu1 %2964  ;;  %v6984_v28 = vpop.permute.xlu0 %2473  ;;  %v1440_v47 = vmul.f32 %v6810_v57, %v7003_v36 }
 0x15a   :  { %v6982_v29 = vmul.f32 %v2965_v46, %v6975_v33  ;;  %4783 = vmatmul.msk.bf16.gmra.mxu3 %vm772_vm2, %v1450_v25  ;;  %v6991_v55 = vpop.f32.mrf.mxu3 }
 0x15b   :  { %8486 = vst [vmem:[#allocation61_spill] sm:$0xff] %v6991_v55  ;;  %v5133_v55 = vld [vmem:[#allocation12 + $0x88] sm:$0xff] }
 0x15c   :  { %2334 = vmatpush.bf16.msra.mxu2 %v5133_v55 }
 0x15e   :  { %2548 = vperm.xlu2 %5323, %v2453_v15   ;;  %v7008_v15 = vld [vmem:[#allocation2 + $0x36] sm:$0xff] }
 0x15f   :  { %2231 = vperm.xlu1 %5322, %v2132_v58   ;;  %2226 = vperm.xlu0 %5321, %v2131_v45   ;;  %v7014_v58 = vpop.f32.mrf.mxu1 }
 0x160   :  { %8488 = vst [vmem:[#allocation63_spill] sm:$0xff] %v7014_v58  ;;  %v7016_v45 = vpop.permute.xlu2 %2989  ;;  %v2454_v58 = vld [vmem:[#allocation6 + $0x488] sm:$0xff] }
 0x161   :  { %v2162_v18 = vpop.permute.xlu1 %2161  ;;  %v2157_v46 = vpop.permute.xlu0 %2156  ;;  %4738 = vmatmul.msk.bf16.gmra.mxu2 %vm772_vm2, %v1036_v59  ;;  %4824 = vmatmul.msk.bf16.gmra.mxu1 %vm772_vm2, %v1941_v2  ;;  %v7034_v59 = vld [vmem:[#allocation2 + $0x50] sm:$0xff] }
 0x162   :  { %v7006_v25 = vmul.f32 %v2162_v18, %v6997_v10  ;;  %v7019_v11 = vmul.f32 %v2157_v46, %v7008_v15  ;;  %v1770_v18 = vpack.c.bf16 %v1756_v43, %v1755_v27  ;;  %v7030_v46 = vpop.f32.mrf.mxu3  ;;  %v5139_v43 = vld [vmem:[#allocation12 + $0xb8] sm:$0xff]  ;;  %v1439_v27 = vmul.f32 %v6782_v30, %v7021_v4 }
 0x163   :  { %8490 = vst [vmem:[#allocation65_spill] sm:$0xff] %v7030_v46  ;;  %2830 = vmatpush.bf16.msra.mxu0 %v5139_v43  ;;  %v2133_v43 = vld [vmem:[#allocation6 + $0x3e8] sm:$0x3] }
 0x164   :  { %8487 = vst [vmem:[#allocation62_spill] sm:$0xff] %v7006_v25  ;;  %4804 = vmatmul.msk.bf16.gmra.mxu0 %vm772_vm2, %v1770_v18  ;;  %v1451_v57 = vpack.c.bf16 %v1440_v47, %v1439_v27  ;;  %v7040_v18 = vmul.f32 %v6941_v51, %v7034_v59  ;;  %v5142_v47 = vld [vmem:[#allocation12 + $0xd0] sm:$0xff] }
 0x165   :  { %8489 = vst [vmem:[#allocation64_spill] sm:$0xff] %v7019_v11  ;;  %v5135_v11 = vld [vmem:[#allocation12 + $0x98] sm:$0xff]  ;;  %v5134_v51 = vld [vmem:[#allocation12 + $0x90] sm:$0xff]  ;;  %3152 = vmatpush.bf16.msra.mxu1 %v5142_v47 }
 0x166   :  { %3049 = vperm.xlu2 %5323, %v2950_v39   ;;  %2657 = vmatpush.bf16.msra.mxu3 %v5135_v11  ;;  %v7058_v25 = vld [vmem:[#allocation2 + $0x4e] sm:$0xff] }
 0x167   :  { %3044 = vperm.xlu1 %5322, %v2949_v8   ;;  %2553 = vperm.xlu0 %5321, %v2454_v58   ;;  %v7047_v39 = vpop.f32.mrf.mxu1  ;;  %v2455_v58 = vld [vmem:[#allocation6 + $0x490] sm:$0x3]  ;;  %v1758_v8 = vmul.f32 %v6724_v12, %v6947_v38 }
 0x168   :  { %8492 = vst [vmem:[#allocation67_spill] sm:$0xff] %v7047_v39  ;;  %v7052_v55 = vpop.permute.xlu2 %2498  ;;  %v1026_v39 = vld [vmem:[#allocation2 + $0xa2] sm:$0x3]  ;;  %v1925_v11 = vld [vmem:[#allocation2 + $0x54] sm:$0xff] }
 0x169   :  { %v2975_v2 = vpop.permute.xlu1 %2974  ;;  %v7045_v30 = vpop.permute.xlu0 %2483 }
 0x16a   :  { %v7043_v46 = vmul.f32 %v2975_v2, %v7036_v48  ;;  %4784 = vmatmul.msk.bf16.gmra.mxu3 %vm772_vm2, %v1451_v57  ;;  %v1757_v2 = vmul.f32 %v6838_v42, %v6933_v16  ;;  %v1942_v42 = vpack.c.bf16 %v6820_v23, %v1925_v11  ;;  %v7112_v11 = vld [vmem:[#allocation2 + $0x56] sm:$0xff] }
 0x16b   :  { %v7054_v27 = vpop.f32.mrf.mxu3  ;;  %2658 = vmatpush.bf16.msra.mxu3 %v5134_v51  ;;  %v1441_v51 = vmul.f32 %v6856_v26, %v1293_v53 }
 0x16c   :  { %8491 = vst [vmem:[#allocation66_spill] sm:$0xff] %v7043_v46  ;;  %v1037_v46 = vpack.c.bf16 %v1026_v39, %v1026_v39 }
 0x16d   :  { %8493 = vst [vmem:[#allocation68_spill] sm:$0xff] %v7054_v27 }
 0x16e   :  { %3054 = vperm.xlu2 %5323, %v2951_v50   ;;  %v7065_v50 = vld [vmem:[#allocation2 + $0x46] sm:$0xff] }
 0x16f   :  { %2558 = vperm.xlu1 %5322, %v2455_v58   ;;  %2236 = vperm.xlu0 %5321, %v2133_v43   ;;  %v1771_v58 = vpack.c.bf16 %v1758_v8, %v1757_v2  ;;  %v7071_v43 = vpop.f32.mrf.mxu1  ;;  %v7083_v2 = vld [vmem:[#allocation2 + $0x58] sm:$0xff] }
 0x170   :  { %8496 = vst [vmem:[#allocation71_spill] sm:$0xff] %v7071_v43  ;;  %v3000_v39 = vpop.permute.xlu2 %2999  ;;  %v7105_v43 = vld [vmem:[#allocation2 + $0x5e] sm:$0xff] }
 0x171   :  { %v2172_v57 = vpop.permute.xlu1 %2171  ;;  %v2167_v27 = vpop.permute.xlu0 %2166  ;;  %4739 = vmatmul.msk.bf16.gmra.mxu2 %vm772_vm2, %v1037_v46  ;;  %4825 = vmatmul.msk.bf16.gmra.mxu1 %vm772_vm2, %v1942_v42 }
 0x172   :  { %v7063_v47 = vmul.f32 %v2172_v57, %v7058_v25  ;;  %v7069_v16 = vmul.f32 %v2167_v27, %v7065_v50  ;;  %v1452_v57 = vpack.c.bf16 %v1441_v51, %v1441_v51  ;;  %v7081_v27 = vld [vmem:[#allocation2 + $0x60] sm:$0xff]  ;;  %v1759_v51 = vmul.f32 %v6850_v62, %v6995_v20 }
 0x173   :  { %v7079_v38 = vpop.f32.mrf.mxu3  ;;  %v7087_v26 = vmul.f32 %v7016_v45, %v7081_v27 }
 0x174   :  { %8494 = vst [vmem:[#allocation69_spill] sm:$0xff] %v7063_v47  ;;  %4805 = vmatmul.msk.bf16.gmra.mxu0 %vm772_vm2, %v1771_v58 }
 0x175   :  { %8495 = vst [vmem:[#allocation70_spill] sm:$0xff] %v7069_v16  ;;  %v2562_v16 = vmul.f32 %v6926_v31, %v6885_v34  ;;  %v7136_v31 = vld [vmem:[#allocation2 + $0x70] sm:$0xff] }
 0x176   :  { %8497 = vst [vmem:[#allocation72_spill] sm:$0xff] %v7079_v38 }
 0x177   :  { %8498 = vst [vmem:[#allocation73_spill] sm:$0xff] %v7087_v26  ;;  %v5138_v26 = vld [vmem:[#allocation12 + $0xb0] sm:$0xff] }
 0x178   :  { %v7097_v42 = vpop.f32.mrf.mxu1  ;;  %v7103_v12 = vpop.permute.xlu2 %2508  ;;  %2831 = vmatpush.bf16.msra.mxu0 %v5138_v26 }
 0x179   :  { %v2985_v8 = vpop.permute.xlu1 %2984  ;;  %v7092_v46 = vpop.permute.xlu0 %2493  ;;  %8500 = vst [vmem:[#allocation75_spill] sm:$0xff] %v7097_v42  ;;  %v1943_v42 = vpack.c.bf16 %v6858_v7, %v6863_v52 }
 0x17a   :  { %v7090_v53 = vmul.f32 %v2985_v8, %v7083_v2  ;;  %4785 = vmatmul.msk.bf16.gmra.mxu3 %vm772_vm2, %v1452_v57  ;;  %v1760_v8 = vmul.f32 %v6780_v54, %v7001_v49  ;;  %v8505_v54 = vpack.c.bf16 %v6193_v22, %v6187_v17  ;;  %v7138_v22 = vld [vmem:[#allocation2 + $0x68] sm:$0xff] }
 0x17c   :  { %8499 = vst [vmem:[#allocation74_spill] sm:$0xff] %v7090_v53  ;;  %v1772_v20 = vpack.c.bf16 %v1760_v8, %v1759_v51  ;;  %v7163_v53 = vld [vmem:[#allocation2 + $0x6e] sm:$0xff] }
 0x17d   :  { %v7099_v58 = vpop.f32.mrf.mxu3 }
 0x17e   :  { %8501 = vst [vmem:[#allocation76_spill] sm:$0xff] %v7099_v58 }
 0x17f   :  { %v7116_v58 = vpop.f32.mrf.mxu0 }
 0x180   :  { %8503 = vst [vmem:[#allocation78_spill] sm:$0xff] %v7116_v58  ;;  %v7134_v8 = vpop.f32.mrf.mxu1  ;;  %v3010_v49 = vpop.permute.xlu2 %3009 }
 0x181   :  { %v2182_v45 = vpop.permute.xlu1 %2181  ;;  %v2177_v38 = vpop.permute.xlu0 %2176  ;;  %4752 = vmatmul.msk.bf16.vlgmr.msrb.gmra.mxu2 %vm772_vm2, %v8505_v54  ;;  %4826 = vmatmul.msk.bf16.gmra.mxu1 %vm772_vm2, %v1943_v42  ;;  %8507 = vst [vmem:[#allocation81_spill] sm:$0xff] %v7134_v8  ;;  %v7143_v42 = vmul.f32 %v3000_v39, %v7136_v31 }
 0x182   :  { %v7110_v57 = vmul.f32 %v2182_v45, %v7105_v43  ;;  %v7119_v62 = vmul.f32 %v2177_v38, %v7112_v11  ;;  %v5495_v38 = vld [vmem:[#allocation2 + $0x24] sm:$0xff] }
 0x183   :  { %v2561_v51 = vmul.f32 %v5495_v38, %v6836_v3  ;;  %v824_v38 = vld [vmem:[#allocation2 + $0x18] sm:$0xff] }
 0x184   :  { %8502 = vst [vmem:[#allocation77_spill] sm:$0xff] %v7110_v57  ;;  %4806 = vmatmul.msk.bf16.gmra.mxu0 %vm772_vm2, %v1772_v20  ;;  %v971_v39 = vmul.f32 %v6191_v19, %v824_v38  ;;  %v7158_v57 = vld [vmem:[#allocation2 + $0x74] sm:$0xff] }
 0x185   :  { %8504 = vst [vmem:[#allocation79_spill] sm:$0xff] %v7119_v62  ;;  %v7131_v45 = vpop.f32.mrf.mxu3  ;;  %v2582_v34 = vpack.c.bf16 %v2562_v16, %v2561_v51  ;;  %v1614_v16 = vld [vmem:[#allocation2 + $0xaa] sm:$0xff]  ;;  %v1613_v51 = vld [vmem:[#allocation2 + $0xa2] sm:$0xff] }
 0x186   :  { %8506 = vst [vmem:[#allocation80_spill] sm:$0xff] %v7131_v45  ;;  %v823_v45 = vld [vmem:[#allocation2 + $0x10] sm:$0xff]  ;;  %v1762_v62 = vmul.f32 %v6876_v21, %v1614_v16 }
 0x187   :  { %v7145_v20 = vpop.f32.mrf.mxu0 }
 0x188   :  { %8508 = vst [vmem:[#allocation82_spill] sm:$0xff] %v7145_v20  ;;  %v1761_v20 = vmul.f32 %v6878_v13, %v1613_v51  ;;  %v7172_v13 = vld [vmem:[#allocation2 + $0x66] sm:$0xff] }
 0x189   :  { %v2995_v17 = vpop.permute.xlu1 %2994  ;;  %v7140_v54 = vpop.permute.xlu0 %2503 }
 0x18a   :  { %4867 = vmatmul.msk.bf16.vlgmr.msra.gmra.mxu3 %vm772_vm2, %v2582_v34  ;;  %v7149_v3 = vmul.f32 %v2995_v17, %v7138_v22  ;;  %v970_v34 = vmul.f32 %v6185_v9, %v823_v45  ;;  %v1773_v38 = vpack.c.bf16 %v1762_v62, %v1761_v20  ;;  %v2416_v9 = vld [vmem:[#allocation2 + $0x3c] sm:$0xff]  ;;  %v5496_v62 = vld [vmem:[#allocation2 + $0x34] sm:$0xff] }
 0x18b   :  { %v2564_v16 = vmul.f32 %v6984_v28, %v2416_v9  ;;  %v2563_v20 = vmul.f32 %v5496_v62, %v6874_v6  ;;  %v7219_v62 = vld [vmem:[#allocation2 + $0x7e] sm:$0xff] }
 0x18c   :  { %8509 = vst [vmem:[#allocation83_spill] sm:$0xff] %v7149_v3  ;;  %v990_v8 = vpack.c.bf16 %v971_v39, %v970_v34  ;;  %v5137_v39 = vld [vmem:[#allocation12 + $0xa8] sm:$0xff]  ;;  %v7188_v34 = vld [vmem:[#allocation2 + $0x80] sm:$0xff] }
 0x18d   :  { %v7153_v58 = vpop.f32.mrf.mxu3  ;;  %v2583_v26 = vpack.c.bf16 %v2564_v16, %v2563_v20  ;;  %2832 = vmatpush.bf16.msra.mxu0 %v5137_v39  ;;  %v1615_v16 = vld [vmem:[#allocation2 + $0xb2] sm:$0x3]  ;;  %v825_v20 = vld [vmem:[#allocation2 + $0x20] sm:$0xff] }
 0x18e   :  { %8510 = vst [vmem:[#allocation84_spill] sm:$0xff] %v7153_v58  ;;  %v7161_v17 = vpop.f32.mrf.mxu1  ;;  %v1944_v58 = vpack.c.bf16 %v6891_v56, %v7158_v57  ;;  %v7180_v56 = vpop.permute.xlu2 %2518 }
 0x18f   :  { %8511 = vst [vmem:[#allocation85_spill] sm:$0xff] %v7161_v17  ;;  %v7167_v3 = vpop.f32.mrf.mxu0  ;;  %v7212_v17 = vld [vmem:[#allocation2 + $0x84] sm:$0xff] }
 0x190   :  { %8512 = vst [vmem:[#allocation86_spill] sm:$0xff] %v7167_v3 }
 0x191   :  { %v2192_v47 = vpop.permute.xlu1 %2191  ;;  %v2187_v21 = vpop.permute.xlu0 %2186  ;;  %4753 = vmatmul.msk.bf16.gmra.mxu2 %vm772_vm2, %v990_v8  ;;  %4827 = vmatmul.msk.bf16.gmra.mxu1 %vm772_vm2, %v1944_v58  ;;  %v7192_v58 = vld [vmem:[#allocation2 + $0x78] sm:$0xff] }
 0x192   :  { %v7170_v19 = vmul.f32 %v2192_v47, %v7163_v53  ;;  %v7175_v45 = vmul.f32 %v2187_v21, %v7172_v13  ;;  %v7195_v21 = vmul.f32 %v3010_v49, %v7188_v34  ;;  %v973_v49 = vmul.f32 %v6917_v41, %v6159_v0 }
 0x194   :  { %8513 = vst [vmem:[#allocation87_spill] sm:$0xff] %v7170_v19  ;;  %4807 = vmatmul.msk.bf16.gmra.mxu0 %vm772_vm2, %v1773_v38 }
 0x195   :  { %8514 = vst [vmem:[#allocation88_spill] sm:$0xff] %v7175_v45  ;;  %v7185_v51 = vpop.f32.mrf.mxu3 }
 0x196   :  { %8515 = vst [vmem:[#allocation89_spill] sm:$0xff] %v7185_v51  ;;  %v7190_v28 = vpop.f32.mrf.mxu1  ;;  %v3020_v39 = vpop.permute.xlu2 %3019  ;;  %v972_v51 = vmul.f32 %v6140_v60, %v825_v20  ;;  %v2418_v60 = vld [vmem:[#allocation2 + $0x4c] sm:$0xff] }
 0x197   :  { %8516 = vst [vmem:[#allocation90_spill] sm:$0xff] %v7190_v28  ;;  %v7197_v38 = vpop.f32.mrf.mxu0  ;;  %v1763_v28 = vmul.f32 %v6808_v61, %v1615_v16  ;;  %v7228_v16 = vld [vmem:[#allocation2 + $0x76] sm:$0xff] }
 0x198   :  { %8517 = vst [vmem:[#allocation91_spill] sm:$0xff] %v7197_v38 }
 0x199   :  { %v3005_v8 = vpop.permute.xlu1 %3004  ;;  %v7203_v6 = vpop.permute.xlu0 %2513  ;;  %v1774_v19 = vpack.c.bf16 %v1763_v28, %v1763_v28  ;;  %v2565_v28 = vmul.f32 %v6915_v24, %v6737_v63 }
 0x19a   :  { %4868 = vmatmul.msk.bf16.gmra.mxu3 %vm772_vm2, %v2583_v26  ;;  %v7201_v9 = vmul.f32 %v3005_v8, %v7192_v58  ;;  %v7214_v26 = vld [vmem:[#allocation2 + $0x8c] sm:$0xff]  ;;  %v5132_v8 = vld [vmem:[#allocation12 + $0x80] sm:$0xff] }
 0x19b   :  { %2335 = vmatpush.bf16.msra.mxu2 %v5132_v8  ;;  %v1945_v45 = vpack.c.bf16 %v7214_v26, %v7212_v17 }
 0x19d   :  { %v7207_v47 = vpop.f32.mrf.mxu3 }
 0x19e   :  { %8518 = vst [vmem:[#allocation92_spill] sm:$0xff] %v7207_v47  ;;  %v7217_v38 = vpop.f32.mrf.mxu1  ;;  %v991_v47 = vpack.c.bf16 %v973_v49, %v972_v51  ;;  %v7243_v8 = vpop.permute.xlu2 %2528 }
 0x19f   :  { %8519 = vst [vmem:[#allocation93_spill] sm:$0xff] %v7217_v38  ;;  %v7223_v0 = vpop.f32.mrf.mxu0  ;;  %v2566_v38 = vmul.f32 %v7045_v30, %v2418_v60  ;;  %v7249_v60 = vld [vmem:[#allocation2 + $0x88] sm:$0xff] }
 0x1a0   :  { %8520 = vst [vmem:[#allocation94_spill] sm:$0xff] %v7223_v0 }
 0x1a1   :  { %v2202_v3 = vpop.permute.xlu1 %2201  ;;  %v2197_v41 = vpop.permute.xlu0 %2196  ;;  %4754 = vmatmul.msk.bf16.gmra.mxu2 %vm772_vm2, %v991_v47  ;;  %4828 = vmatmul.msk.bf16.gmra.mxu1 %vm772_vm2, %v1945_v45  ;;  %v2584_v49 = vpack.c.bf16 %v2566_v38, %v2565_v28  ;;  %v5141_v45 = vld [vmem:[#allocation12 + $0xc8] sm:$0xff] }
 0x1a2   :  { %v7226_v61 = vmul.f32 %v2202_v3, %v7219_v62  ;;  %v7231_v20 = vmul.f32 %v2197_v41, %v7228_v16  ;;  %v7245_v41 = vld [vmem:[#allocation2 + $0x90] sm:$0xff]  ;;  %3153 = vmatpush.bf16.msra.mxu1 %v5141_v45  ;;  %v1946_v45 = vpack.c.bf16 %v7003_v36, %v7021_v4 }
 0x1a4   :  { %8521 = vst [vmem:[#allocation95_spill] sm:$0xff] %v7226_v61  ;;  %4808 = vmatmul.msk.bf16.gmra.mxu0 %vm772_vm2, %v1774_v19  ;;  %v7252_v19 = vmul.f32 %v3020_v39, %v7245_v41  ;;  %v974_v39 = vmul.f32 %v6913_v1, %v6204_v35  ;;  %v2756_v35 = vpack.c.bf16 %v6943_v44, %v6952_v37 }
 0x1a5   :  { %8522 = vst [vmem:[#allocation96_spill] sm:$0xff] %v7231_v20  ;;  %v7239_v51 = vpop.f32.mrf.mxu3  ;;  %v7281_v20 = vld [vmem:[#allocation2 + $0x86] sm:$0xff] }
 0x1a6   :  { %8523 = vst [vmem:[#allocation97_spill] sm:$0xff] %v7239_v51  ;;  %v7247_v30 = vpop.f32.mrf.mxu1 }
 0x1a7   :  { %8524 = vst [vmem:[#allocation98_spill] sm:$0xff] %v7247_v30  ;;  %v7254_v3 = vpop.f32.mrf.mxu0  ;;  %v975_v30 = vmul.f32 %v6975_v33, %v6202_v32  ;;  %v3030_v32 = vpop.permute.xlu2 %3029  ;;  %v2568_v33 = vmul.f32 %v7092_v46, %v6820_v23  ;;  %v7303_v46 = vld [vmem:[#allocation2 + $0x98] sm:$0xff] }
 0x1a8   :  { %8525 = vst [vmem:[#allocation99_spill] sm:$0xff] %v7254_v3  ;;  %v7272_v3 = vld [vmem:[#allocation2 + $0x8e] sm:$0xff] }
 0x1a9   :  { %v3015_v47 = vpop.permute.xlu1 %3014  ;;  %v7260_v24 = vpop.permute.xlu0 %2523 }
 0x1aa   :  { %4869 = vmatmul.msk.bf16.gmra.mxu3 %vm772_vm2, %v2584_v49  ;;  %v7258_v63 = vmul.f32 %v3015_v47, %v7249_v60  ;;  %v992_v47 = vpack.c.bf16 %v975_v30, %v974_v39 }
 0x1ad   :  { %v7264_v28 = vpop.f32.mrf.mxu3 }
 0x1ae   :  { %8526 = vst [vmem:[#allocation100_spill] sm:$0xff] %v7264_v28  ;;  %v7270_v51 = vpop.f32.mrf.mxu1 }
 0x1af   :  { %8527 = vst [vmem:[#allocation101_spill] sm:$0xff] %v7270_v51  ;;  %v7276_v0 = vpop.f32.mrf.mxu0 }
 0x1b0   :  { %8528 = vst [vmem:[#allocation102_spill] sm:$0xff] %v7276_v0  ;;  %v2924_v0 = vld [vmem:[#allocation2 + $0xa0] sm:$0xff] }
 0x1b1   :  { %v2212_v49 = vpop.permute.xlu1 %2211  ;;  %v2207_v28 = vpop.permute.xlu0 %2206  ;;  %4755 = vmatmul.msk.bf16.gmra.mxu2 %vm772_vm2, %v992_v47  ;;  %4829 = vmatmul.msk.bf16.gmra.mxu1 %vm772_vm2, %v1946_v45  ;;  %v7305_v47 = vmul.f32 %v3030_v32, %v2924_v0  ;;  %v2429_v32 = vld [vmem:[#allocation2 + $0xa4] sm:$0xff] }
 0x1b2   :  { %v7279_v38 = vmul.f32 %v2212_v49, %v7272_v3  ;;  %v7286_v1 = vmul.f32 %v2207_v28, %v7281_v20  ;;  %v8532_v49 = vld [vmem:[#allocation51_spill] sm:$0xff] }
 0x1b3   :  { %v2567_v37 = vmul.f32 %v6973_v5, %v8532_v49  ;;  %v1936_v49 = vld [vmem:[#allocation2 + $0xac] sm:$0xff]  ;;  %v5140_v5 = vld [vmem:[#allocation12 + $0xc0] sm:$0xff] }
 0x1b4   :  { %8529 = vst [vmem:[#allocation103_spill] sm:$0xff] %v7279_v38  ;;  %4890 = vmatmul.msk.bf16.vlgmr.msra.gmra.mxu0 %vm772_vm2, %v2756_v35  ;;  %v7299_v44 = vpop.f32.mrf.mxu2  ;;  %v7327_v38 = vld [vmem:[#allocation2 + $0x9e] sm:$0xff]  ;;  %3154 = vmatpush.bf16.msra.mxu1 %v5140_v5 }
 0x1b5   :  { %8530 = vst [vmem:[#allocation104_spill] sm:$0xff] %v7286_v1  ;;  %v7295_v39 = vpop.f32.mrf.mxu3  ;;  %v2585_v28 = vpack.c.bf16 %v2568_v33, %v2567_v37  ;;  %v2539_v33 = vpop.permute.xlu2 %2538 }
 0x1b6   :  { %8531 = vst [vmem:[#allocation105_spill] sm:$0xff] %v7295_v39  ;;  %v7301_v51 = vpop.f32.mrf.mxu1 }
 0x1b7   :  { %8533 = vst [vmem:[#allocation51_spill] sm:$0xff] %v7299_v44  ;;  %v7307_v45 = vpop.f32.mrf.mxu0  ;;  %v8538_v44 = vld [vmem:[#allocation44_spill] sm:$0xff] }
 0x1b8   :  { %8534 = vst [vmem:[#allocation106_spill] sm:$0xff] %v7301_v51  ;;  %v977_v0 = vmul.f32 %v7036_v48, %v8538_v44  ;;  %v7334_v44 = vld [vmem:[#allocation2 + $0x96] sm:$0xff] }
 0x1b9   :  { %v3025_v23 = vpop.permute.xlu1 %3024  ;;  %8535 = vst [vmem:[#allocation107_spill] sm:$0xff] %v7307_v45  ;;  %v7313_v30 = vpop.permute.xlu0 %2533  ;;  %v8540_v45 = vld [vmem:[#allocation38_spill] sm:$0xff] }
 0x1ba   :  { %4870 = vmatmul.msk.bf16.gmra.mxu3 %vm772_vm2, %v2585_v28  ;;  %v7311_v35 = vmul.f32 %v3025_v23, %v7303_v46  ;;  %v976_v28 = vmul.f32 %v6971_v40, %v8540_v45  ;;  %v1947_v23 = vpack.c.bf16 %v1936_v49, %v2429_v32  ;;  %v2570_v45 = vmul.f32 %v7140_v54, %v6858_v7 }
 0x1bc   :  { %8536 = vst [vmem:[#allocation108_spill] sm:$0xff] %v7311_v35  ;;  %v7321_v39 = vpop.f32.mrf.mxu2  ;;  %v993_v61 = vpack.c.bf16 %v977_v0, %v976_v28  ;;  %v2926_v28 = vld [vmem:[#allocation2 + $0xb0] sm:$0xff] }
 0x1bd   :  { %v7317_v37 = vpop.f32.mrf.mxu3  ;;  %8539 = vst [vmem:[#allocation44_spill] sm:$0xff] %v7321_v39  ;;  %v2757_v39 = vpack.c.bf16 %v6997_v10, %v7008_v15  ;;  %v2569_v10 = vmul.f32 %v7052_v55, %v6863_v52  ;;  %v3040_v15 = vpop.permute.xlu2 %3039 }
 0x1be   :  { %8537 = vst [vmem:[#allocation109_spill] sm:$0xff] %v7317_v37  ;;  %v7325_v51 = vpop.f32.mrf.mxu1 }
 0x1bf   :  { %v7329_v35 = vpop.f32.mrf.mxu0  ;;  %v2586_v7 = vpack.c.bf16 %v2570_v45, %v2569_v10  ;;  %v1937_v45 = vld [vmem:[#allocation2 + $0xb4] sm:$0x3] }
 0x1c0   :  { %8541 = vst [vmem:[#allocation38_spill] sm:$0xff] %v7329_v35  ;;  %v7363_v35 = vmul.f32 %v2539_v33, %v2429_v32  ;;  %v8549_v33 = vld [vmem:[#allocation43_spill] sm:$0xff]  ;;  %v1948_v32 = vpack.c.bf16 %v1937_v45, %v1937_v45  ;;  %v2571_v45 = vmul.f32 %v7103_v12, %v7158_v57 }
 0x1c1   :  { %v2222_v1 = vpop.permute.xlu1 %2221  ;;  %v2217_v48 = vpop.permute.xlu0 %2216  ;;  %4756 = vmatmul.msk.bf16.gmra.mxu2 %vm772_vm2, %v993_v61  ;;  %4830 = vmatmul.msk.bf16.gmra.mxu1 %vm772_vm2, %v1947_v23  ;;  %v7356_v23 = vmul.f32 %v3040_v15, %v2926_v28  ;;  %v8547_v28 = vld [vmem:[#allocation39_spill] sm:$0xff] }
 0x1c2   :  { %v7332_v37 = vmul.f32 %v2222_v1, %v7327_v38  ;;  %v7339_v40 = vmul.f32 %v2217_v48, %v7334_v44  ;;  %v2925_v48 = vld [vmem:[#allocation2 + $0xa8] sm:$0xff] }
 0x1c4   :  { %4891 = vmatmul.msk.bf16.gmra.mxu0 %vm772_vm2, %v2757_v39  ;;  %v7352_v5 = vpop.f32.mrf.mxu2 }
 0x1c5   :  { %v7348_v0 = vpop.f32.mrf.mxu3  ;;  %8543 = vst [vmem:[#allocation111_spill] sm:$0xff] %v7352_v5  ;;  %v979_v5 = vmul.f32 %v7083_v2, %v8547_v28  ;;  %v2424_v28 = vld [vmem:[#allocation2 + $0x7c] sm:$0xff] }
 0x1c6   :  { %8542 = vst [vmem:[#allocation110_spill] sm:$0xff] %v7348_v0  ;;  %v7354_v54 = vpop.f32.mrf.mxu1 }
 0x1c7   :  { %8544 = vst [vmem:[#allocation112_spill] sm:$0xff] %v7354_v54  ;;  %v7358_v39 = vpop.f32.mrf.mxu0 }
 0x1c8   :  { %8545 = vst [vmem:[#allocation113_spill] sm:$0xff] %v7358_v39 }
 0x1c9   :  { %v3035_v61 = vpop.permute.xlu1 %3034  ;;  %v2544_v0 = vpop.permute.xlu0 %2543 }
 0x1ca   :  { %4871 = vmatmul.msk.bf16.gmra.mxu3 %vm772_vm2, %v2586_v7  ;;  %v7361_v1 = vmul.f32 %v3035_v61, %v2925_v48  ;;  %v7365_v52 = vmul.f32 %v2544_v0, %v1936_v49  ;;  %v7377_v48 = vld [vmem:[#allocation2 + $0xae] sm:$0xff]  ;;  %v978_v49 = vmul.f32 %v7034_v59, %v8549_v33  ;;  %v7381_v0 = vld [vmem:[#allocation2 + $0xa6] sm:$0xff]  ;;  %v2572_v59 = vmul.f32 %v7203_v6, %v2424_v28  ;;  %v5131_v6 = vld [vmem:[#allocation12 + $0x78] sm:$0xff] }
 0x1cb   :  { %2336 = vmatpush.bf16.msra.mxu2 %v5131_v6  ;;  %v8556_v28 = vld [vmem:[#allocation46_spill] sm:$0xff]  ;;  %v8558_v6 = vld [vmem:[#allocation55_spill] sm:$0xff] }
 0x1cc   :  { %v7375_v7 = vpop.f32.mrf.mxu2  ;;  %v994_v39 = vpack.c.bf16 %v979_v5, %v978_v49  ;;  %v980_v12 = vmul.f32 %v7081_v27, %v8556_v28  ;;  %v2759_v5 = vpack.c.bf16 %v7105_v43, %v7112_v11 }
 0x1cd   :  { %v7371_v15 = vpop.f32.mrf.mxu3  ;;  %8548 = vst [vmem:[#allocation39_spill] sm:$0xff] %v7375_v7  ;;  %v2758_v7 = vpack.c.bf16 %v7058_v25, %v7065_v50  ;;  %v2587_v50 = vpack.c.bf16 %v2572_v59, %v2571_v45 }
 0x1ce   :  { %8546 = vst [vmem:[#allocation114_spill] sm:$0xff] %v7371_v15  ;;  %v7383_v61 = vpop.f32.mrf.mxu1 }
 0x1cf   :  { %v7385_v10 = vpop.f32.mrf.mxu0 }
 0x1d1   :  { %v2232_v55 = vpop.permute.xlu1 %2231  ;;  %v2227_v2 = vpop.permute.xlu0 %2226  ;;  %4757 = vmatmul.msk.bf16.gmra.mxu2 %vm772_vm2, %v994_v39  ;;  %4831 = vmatmul.msk.bf16.gmra.mxu1 %vm772_vm2, %v1948_v32 }
 0x1d2   :  { %v7388_v15 = vmul.f32 %v2232_v55, %v7377_v48  ;;  %v7393_v54 = vmul.f32 %v2227_v2, %v7381_v0 }
 0x1d4   :  { %4892 = vmatmul.msk.bf16.gmra.mxu0 %vm772_vm2, %v2758_v7  ;;  %v7405_v25 = vpop.f32.mrf.mxu2  ;;  %v8554_v7 = vld [vmem:[#allocation45_spill] sm:$0xff] }
 0x1d5   :  { %v7401_v55 = vpop.f32.mrf.mxu3  ;;  %8551 = vst [vmem:[#allocation115_spill] sm:$0xff] %v7405_v25  ;;  %v981_v32 = vmul.f32 %v7138_v22, %v8554_v7  ;;  %v8559_v22 = vld [vmem:[#allocation56_spill] sm:$0xff] }
 0x1d6   :  { %8550 = vst [vmem:[#allocation43_spill] sm:$0xff] %v7401_v55  ;;  %v7407_v33 = vpop.f32.mrf.mxu1  ;;  %v8560_v7 = vpack.c.bf16 %v8558_v6, %v8559_v22  ;;  %v8567_v6 = vld [vmem:[#allocation48_spill] sm:$0xff] }
 0x1d7   :  { %v7409_v49 = vpop.f32.mrf.mxu0  ;;  %v995_v59 = vpack.c.bf16 %v981_v32, %v980_v12  ;;  %v2573_v32 = vmul.f32 %v7180_v56, %v7212_v17  ;;  %v8565_v12 = vld [vmem:[#allocation40_spill] sm:$0xff]  ;;  %v983_v22 = vmul.f32 %v7192_v58, %v8567_v6 }
 0x1d8   :  { %8552 = vst [vmem:[#allocation116_spill] sm:$0xff] %v7409_v49  ;;  %v8658_v49 = vld [vmem:[#allocation101_spill] sm:$0xff] }
 0x1da   :  { %4872 = vmatmul.msk.bf16.gmra.mxu3 %vm772_vm2, %v2587_v50  ;;  %v2574_v50 = vmul.f32 %v7260_v24, %v7214_v26 }
 0x1dc   :  { %v7416_v2 = vpop.f32.mrf.mxu2  ;;  %v2588_v43 = vpack.c.bf16 %v2574_v50, %v2573_v32  ;;  %v2576_v32 = vmul.f32 %v7313_v30, %v7003_v36 }
 0x1dd   :  { %v7412_v39 = vpop.f32.mrf.mxu3  ;;  %8555 = vst [vmem:[#allocation45_spill] sm:$0xff] %v7416_v2 }
 0x1de   :  { %8553 = vst [vmem:[#allocation117_spill] sm:$0xff] %v7412_v39  ;;  %v7420_v57 = vpop.f32.mrf.mxu1 }
 0x1e1   :  { %v7422_v45 = vpop.f32.mrf.mxu0  ;;  %4758 = vmatmul.msk.bf16.gmra.mxu2 %vm772_vm2, %v995_v59  ;;  %4913 = vmatmul.msk.bf16.vlgmr.msra.gmra.mxu1 %vm772_vm2, %v8560_v7  ;;  %v982_v59 = vmul.f32 %v7136_v31, %v8565_v12  ;;  %v2760_v7 = vpack.c.bf16 %v7163_v53, %v7172_v13  ;;  %v8569_v31 = vpack.c.bf16 %v6979_v14, %v6982_v29  ;;  %v8574_v14 = vld [vmem:[#allocation47_spill] sm:$0xff] }
 0x1e2   :  { %8557 = vst [vmem:[#allocation46_spill] sm:$0xff] %v7422_v45  ;;  %v984_v29 = vmul.f32 %v7188_v34, %v8574_v14  ;;  %v8581_v14 = vpack.c.bf16 %v7365_v52, %v7363_v35  ;;  %v2549_v35 = vpop.permute.xlu2 %2548  ;;  %v2431_v52 = vld [vmem:[#allocation2 + $0xb4] sm:$0xff] }
 0x1e3   :  { %v996_v56 = vpack.c.bf16 %v983_v22, %v982_v59  ;;  %v8575_v59 = vld [vmem:[#allocation41_spill] sm:$0xff] }
 0x1e4   :  { %4893 = vmatmul.msk.bf16.gmra.mxu0 %vm772_vm2, %v2759_v5  ;;  %v7438_v28 = vpop.f32.mrf.mxu2  ;;  %v985_v6 = vmul.f32 %v7249_v60, %v8575_v59 }
 0x1e5   :  { %v7434_v27 = vpop.f32.mrf.mxu3  ;;  %8562 = vst [vmem:[#allocation56_spill] sm:$0xff] %v7438_v28 }
 0x1e6   :  { %8561 = vst [vmem:[#allocation55_spill] sm:$0xff] %v7434_v27  ;;  %v7440_v11 = vpop.f32.mrf.mxu1 }
 0x1e9   :  { %v7442_v26 = vpop.f32.mrf.mxu0 }
 0x1ea   :  { %8563 = vst [vmem:[#allocation118_spill] sm:$0xff] %v7442_v26  ;;  %4873 = vmatmul.msk.bf16.gmra.mxu3 %vm772_vm2, %v2588_v43  ;;  %v2575_v43 = vmul.f32 %v7243_v8, %v7021_v4  ;;  %v997_v4 = vpack.c.bf16 %v985_v6, %v984_v29  ;;  %v8583_v29 = vld [vmem:[#allocation49_spill] sm:$0xff]  ;;  %v3050_v27 = vpop.permute.xlu2 %3049  ;;  %v8645_v26 = vld [vmem:[#allocation103_spill] sm:$0xff] }
 0x1eb   :  { %v987_v59 = vmul.f32 %v7303_v46, %v8583_v29 }
 0x1ec   :  { %v7449_v5 = vpop.f32.mrf.mxu2  ;;  %v2589_v53 = vpack.c.bf16 %v2576_v32, %v2575_v43  ;;  %v8577_v32 = vld [vmem:[#allocation66_spill] sm:$0xff] }
 0x1ed   :  { %v7445_v24 = vpop.f32.mrf.mxu3  ;;  %8566 = vst [vmem:[#allocation40_spill] sm:$0xff] %v7449_v5 }
 0x1ee   :  { %8564 = vst [vmem:[#allocation119_spill] sm:$0xff] %v7445_v24  ;;  %v7453_v17 = vpop.f32.mrf.mxu1 }
 0x1f1   :  { %v7455_v50 = vpop.f32.mrf.mxu0  ;;  %4759 = vmatmul.msk.bf16.gmra.mxu2 %vm772_vm2, %v996_v56  ;;  %4914 = vmatmul.msk.bf16.gmra.mxu1 %vm772_vm2, %v8569_v31  ;;  %v8578_v31 = vpack.c.bf16 %v7040_v18, %v8577_v32 }
 0x1f2   :  { %8568 = vst [vmem:[#allocation48_spill] sm:$0xff] %v7455_v50 }
 0x1f4   :  { %4894 = vmatmul.msk.bf16.gmra.mxu0 %vm772_vm2, %v2760_v7  ;;  %v7471_v12 = vpop.f32.mrf.mxu2  ;;  %v2761_v7 = vpack.c.bf16 %v7219_v62, %v7228_v16  ;;  %v8582_v16 = vld [vmem:[#allocation50_spill] sm:$0xff] }
 0x1f5   :  { %v7467_v58 = vpop.f32.mrf.mxu3  ;;  %8571 = vst [vmem:[#allocation121_spill] sm:$0xff] %v7471_v12  ;;  %v986_v18 = vmul.f32 %v7245_v41, %v8582_v16  ;;  %v8586_v41 = vld [vmem:[#allocation73_spill] sm:$0xff]  ;;  %v8587_v16 = vld [vmem:[#allocation74_spill] sm:$0xff] }
 0x1f6   :  { %8570 = vst [vmem:[#allocation120_spill] sm:$0xff] %v7467_v58  ;;  %v7473_v13 = vpop.f32.mrf.mxu1  ;;  %v8588_v46 = vpack.c.bf16 %v8586_v41, %v8587_v16 }
 0x1f7   :  { %v998_v32 = vpack.c.bf16 %v987_v59, %v986_v18  ;;  %v2579_v18 = vmul.f32 %v2549_v35, %v2431_v52  ;;  %v7528_v59 = vpop.permute.xlu1 %3044  ;;  %v2433_v35 = vld [vmem:[#allocation2 + $0xc4] sm:$0x3] }
 0x1f9   :  { %v7475_v36 = vpop.f32.mrf.mxu0 }
 0x1fa   :  { %8572 = vst [vmem:[#allocation122_spill] sm:$0xff] %v7475_v36  ;;  %4874 = vmatmul.msk.bf16.gmra.mxu3 %vm772_vm2, %v2589_v53 }
 0x1fc   :  { %v1157_v22 = vpop.f32.mrf.mxu2 }
 0x1fd   :  { %v7478_v30 = vpop.f32.mrf.mxu3  ;;  %v2554_v22 = vpop.permute.xlu0 %2553 }
 0x1fe   :  { %8573 = vst [vmem:[#allocation123_spill] sm:$0xff] %v7478_v30  ;;  %v7484_v56 = vpop.f32.mrf.mxu1 }
 0x1ff   :  { %v2559_v41 = vpop.permute.xlu1 %2558 }
 0x201   :  { %v7486_v8 = vpop.f32.mrf.mxu0  ;;  %4760 = vmatmul.msk.bf16.gmra.mxu2 %vm772_vm2, %v997_v4  ;;  %4915 = vmatmul.msk.bf16.gmra.mxu1 %vm772_vm2, %v8578_v31  ;;  %v2432_v4 = vld [vmem:[#allocation2 + $0xbc] sm:$0xff] }
 0x202   :  { %8576 = vst [vmem:[#allocation47_spill] sm:$0xff] %v7486_v8  ;;  %v2928_v8 = vld [vmem:[#allocation2 + $0xc0] sm:$0xff] }
 0x204   :  { %4895 = vmatmul.msk.bf16.gmra.mxu0 %vm772_vm2, %v2761_v7  ;;  %v7496_v60 = vpop.f32.mrf.mxu2 }
 0x205   :  { %v1572_v34 = vpop.f32.mrf.mxu3 }
 0x206   :  { %v7498_v43 = vpop.f32.mrf.mxu1  ;;  %v2762_v34 = vpack.c.bf16 %v7272_v3, %v7281_v20  ;;  %v841_v3 = vld [vmem:[#allocation2 + $0xa0] sm:$0x3] }
 0x207   :  { %8579 = vst [vmem:[#allocation41_spill] sm:$0xff] %v7498_v43 }
 0x209   :  { %v7500_v53 = vpop.f32.mrf.mxu0 }
 0x20a   :  { %8580 = vst [vmem:[#allocation66_spill] sm:$0xff] %v7500_v53  ;;  %4875 = vmatmul.msk.bf16.gmra.mxu3 %vm772_vm2, %v8581_v14  ;;  %v2580_v14 = vmul.f32 %v2554_v22, %v2432_v4  ;;  %v8591_v4 = vld [vmem:[#allocation42_spill] sm:$0xff] }
 0x20c   :  { %v7512_v6 = vpop.f32.mrf.mxu2  ;;  %v2591_v12 = vpack.c.bf16 %v2580_v14, %v2579_v18  ;;  %v2763_v14 = vpack.c.bf16 %v7327_v38, %v7334_v44  ;;  %v2581_v18 = vmul.f32 %v2559_v41, %v2433_v35  ;;  %v8599_v35 = vld [vmem:[#allocation53_spill] sm:$0xff] }
 0x20d   :  { %v7506_v62 = vpop.f32.mrf.mxu3 }
 0x20e   :  { %v7514_v7 = vpop.f32.mrf.mxu1 }
 0x20f   :  { %8584 = vst [vmem:[#allocation50_spill] sm:$0xff] %v7514_v7 }
 0x211   :  { %v7516_v31 = vpop.f32.mrf.mxu0  ;;  %4761 = vmatmul.msk.bf16.gmra.mxu2 %vm772_vm2, %v998_v32  ;;  %4916 = vmatmul.msk.bf16.gmra.mxu1 %vm772_vm2, %v8588_v46  ;;  %v988_v32 = vmul.f32 %v8591_v4, %v841_v3 }
 0x212   :  { %8585 = vst [vmem:[#allocation49_spill] sm:$0xff] %v7516_v31 }
 0x213   :  { %v999_v16 = vpack.c.bf16 %v988_v32, %v988_v32  ;;  %v2592_v32 = vpack.c.bf16 %v2581_v18, %v2581_v18 }
 0x214   :  { %4896 = vmatmul.msk.bf16.gmra.mxu0 %vm772_vm2, %v2762_v34  ;;  %v7530_v30 = vpop.f32.mrf.mxu2 }
 0x215   :  { %v7526_v29 = vpop.f32.mrf.mxu3 }
 0x216   :  { %v7532_v58 = vpop.f32.mrf.mxu1 }
 0x217   :  { %8589 = vst [vmem:[#allocation73_spill] sm:$0xff] %v7532_v58 }
 0x219   :  { %v7534_v20 = vpop.f32.mrf.mxu0 }
 0x21a   :  { %8590 = vst [vmem:[#allocation74_spill] sm:$0xff] %v7534_v20  ;;  %4876 = vmatmul.msk.bf16.gmra.mxu3 %vm772_vm2, %v2591_v12  ;;  %v8594_v12 = vld [vmem:[#allocation83_spill] sm:$0xff] }
 0x21b   :  { %v8595_v20 = vpack.c.bf16 %v7143_v42, %v8594_v12  ;;  %v2764_v42 = vpack.c.bf16 %v7377_v48, %v7381_v0 }
 0x21c   :  { %v7540_v34 = vpop.f32.mrf.mxu2 }
 0x21d   :  { %v7537_v22 = vpop.f32.mrf.mxu3 }
 0x21e   :  { %v7542_v52 = vpop.f32.mrf.mxu1 }
 0x21f   :  { %8592 = vst [vmem:[#allocation42_spill] sm:$0xff] %v7542_v52 }
 0x221   :  { %v7544_v46 = vpop.f32.mrf.mxu0  ;;  %4762 = vmatmul.msk.bf16.gmra.mxu2 %vm772_vm2, %v999_v16  ;;  %4917 = vmatmul.msk.bf16.gmra.mxu1 %vm772_vm2, %v8595_v20  ;;  %v8598_v20 = vld [vmem:[#allocation52_spill] sm:$0xff] }
 0x222   :  { %8593 = vst [vmem:[#allocation124_spill] sm:$0xff] %v7544_v46  ;;  %v8600_v16 = vpack.c.bf16 %v8598_v20, %v8599_v35  ;;  %v8604_v20 = vld [vmem:[#allocation58_spill] sm:$0xff]  ;;  %v8605_v35 = vld [vmem:[#allocation59_spill] sm:$0xff] }
 0x224   :  { %4897 = vmatmul.msk.bf16.gmra.mxu0 %vm772_vm2, %v2763_v14  ;;  %v7556_v4 = vpop.f32.mrf.mxu2  ;;  %v8601_v14 = vpack.c.bf16 %v7195_v21, %v7201_v9  ;;  %v8607_v21 = vpack.c.bf16 %v7252_v19, %v7258_v63  ;;  %v8613_v19 = vld [vmem:[#allocation108_spill] sm:$0xff] }
 0x225   :  { %v7554_v3 = vpop.f32.mrf.mxu3  ;;  %v8614_v63 = vpack.c.bf16 %v7305_v47, %v8613_v19  ;;  %v8619_v47 = vpack.c.bf16 %v7356_v23, %v7361_v1  ;;  %v8624_v23 = vld [vmem:[#allocation77_spill] sm:$0xff] }
 0x226   :  { %v7558_v31 = vpop.f32.mrf.mxu1 }
 0x227   :  { %8596 = vst [vmem:[#allocation83_spill] sm:$0xff] %v7558_v31 }
 0x229   :  { %v1894_v46 = vpop.f32.mrf.mxu0 }
 0x22a   :  { %4877 = vmatmul.msk.bf16.gmra.mxu3 %vm772_vm2, %v2592_v32 }
 0x22c   :  { %v7563_v44 = vpop.f32.mrf.mxu2 }
 0x22d   :  { %v7561_v38 = vpop.f32.mrf.mxu3 }
 0x22e   :  { %v7565_v41 = vpop.f32.mrf.mxu1 }
 0x22f   :  { %8597 = vst [vmem:[#allocation125_spill] sm:$0xff] %v7565_v41  ;;  %v8616_v41 = vld [vmem:[#allocation69_spill] sm:$0xff] }
 0x231   :  { %4844 = vmatmul.msk.bf16.vlgmr.msra.gmra.mxu2 %vm772_vm2, %v8600_v16  ;;  %4918 = vmatmul.msk.bf16.gmra.mxu1 %vm772_vm2, %v8601_v14  ;;  %v8606_v16 = vpack.c.bf16 %v8604_v20, %v8605_v35  ;;  %v8610_v20 = vld [vmem:[#allocation62_spill] sm:$0xff]  ;;  %v8611_v35 = vld [vmem:[#allocation64_spill] sm:$0xff] }
 0x234   :  { %4898 = vmatmul.msk.bf16.gmra.mxu0 %vm772_vm2, %v2764_v42  ;;  %v7580_v18 = vpop.f32.mrf.mxu2 }
 0x235   :  { %v7578_v46 = vpop.f32.mrf.mxu3 }
 0x236   :  { %v7582_v12 = vpop.f32.mrf.mxu1 }
 0x237   :  { %8602 = vst [vmem:[#allocation52_spill] sm:$0xff] %v7582_v12 }
 0x23c   :  { %v7586_v48 = vpop.f32.mrf.mxu2 }
 0x23d   :  { %v7584_v32 = vpop.f32.mrf.mxu3 }
 0x23e   :  { %v7588_v0 = vpop.f32.mrf.mxu1 }
 0x23f   :  { %8603 = vst [vmem:[#allocation53_spill] sm:$0xff] %v7588_v0 }
 0x241   :  { %4845 = vmatmul.msk.bf16.gmra.mxu2 %vm772_vm2, %v8606_v16  ;;  %4919 = vmatmul.msk.bf16.gmra.mxu1 %vm772_vm2, %v8607_v21  ;;  %v8612_v16 = vpack.c.bf16 %v8610_v20, %v8611_v35  ;;  %v8617_v20 = vld [vmem:[#allocation70_spill] sm:$0xff] }
 0x242   :  { %v8618_v35 = vpack.c.bf16 %v8616_v41, %v8617_v20 }
 0x244   :  { %v7600_v42 = vpop.f32.mrf.mxu2 }
 0x245   :  { %v7598_v9 = vpop.f32.mrf.mxu3 }
 0x246   :  { %v7602_v14 = vpop.f32.mrf.mxu1 }
 0x247   :  { %8608 = vst [vmem:[#allocation58_spill] sm:$0xff] %v7602_v14 }
 0x24c   :  { %v7606_v12 = vpop.f32.mrf.mxu2 }
 0x24d   :  { %v7604_v5 = vpop.f32.mrf.mxu3 }
 0x24e   :  { %v7608_v0 = vpop.f32.mrf.mxu1 }
 0x24f   :  { %8609 = vst [vmem:[#allocation59_spill] sm:$0xff] %v7608_v0 }
 0x251   :  { %4846 = vmatmul.msk.bf16.gmra.mxu2 %vm772_vm2, %v8612_v16  ;;  %4920 = vmatmul.msk.bf16.gmra.mxu1 %vm772_vm2, %v8614_v63  ;;  %v2927_v63 = vld [vmem:[#allocation2 + $0xb8] sm:$0xff] }
 0x252   :  { %v3075_v41 = vmul.f32 %v7528_v59, %v2927_v63  ;;  %v3055_v59 = vpop.permute.xlu2 %3054  ;;  %v2929_v63 = vld [vmem:[#allocation2 + $0xc8] sm:$0x3] }
 0x254   :  { %v7620_v24 = vpop.f32.mrf.mxu2 }
 0x255   :  { %v7618_v21 = vpop.f32.mrf.mxu3 }
 0x256   :  { %v2068_v14 = vpop.f32.mrf.mxu1 }
 0x25c   :  { %v7624_v28 = vpop.f32.mrf.mxu2 }
 0x25d   :  { %v7622_v53 = vpop.f32.mrf.mxu3 }
 0x25e   :  { %8615 = vst [vmem:[#allocation62_spill] sm:$0xff] %v7622_v53  ;;  %v7626_v0 = vpop.f32.mrf.mxu1  ;;  %v8659_v53 = vld [vmem:[#allocation60_spill] sm:$0xff] }
 0x261   :  { %4847 = vmatmul.msk.bf16.gmra.mxu2 %vm772_vm2, %v8618_v35  ;;  %4921 = vmatmul.msk.bf16.gmra.mxu1 %vm772_vm2, %v8619_v47  ;;  %v3076_v35 = vmul.f32 %v3050_v27, %v2928_v8  ;;  %v8625_v47 = vld [vmem:[#allocation79_spill] sm:$0xff]  ;;  %v3077_v27 = vmul.f32 %v3055_v59, %v2929_v63 }
 0x262   :  { %v8626_v39 = vpack.c.bf16 %v8624_v23, %v8625_v47  ;;  %v8631_v23 = vld [vmem:[#allocation87_spill] sm:$0xff] }
 0x263   :  { %v3087_v1 = vpack.c.bf16 %v3076_v35, %v3075_v41  ;;  %v3088_v35 = vpack.c.bf16 %v3077_v27, %v3077_v27  ;;  %v8638_v27 = vld [vmem:[#allocation95_spill] sm:$0xff] }
 0x264   :  { %v7638_v19 = vpop.f32.mrf.mxu2 }
 0x265   :  { %v7636_v16 = vpop.f32.mrf.mxu3  ;;  %8621 = vst [vmem:[#allocation108_spill] sm:$0xff] %v7638_v19  ;;  %v7731_v19 = vld [vmem:[#allocation14] ss:$0 sm:$0xff] }
 0x266   :  { %8620 = vst [vmem:[#allocation64_spill] sm:$0xff] %v7636_v16  ;;  %v7640_v14 = vpop.f32.mrf.mxu1 }
 0x26c   :  { %v7645_v20 = vpop.f32.mrf.mxu2 }
 0x26d   :  { %v7642_v2 = vpop.f32.mrf.mxu3  ;;  %8623 = vst [vmem:[#allocation70_spill] sm:$0xff] %v7645_v20  ;;  %v8653_v20 = vld [vmem:[#allocation57_spill] sm:$0xff] }
 0x26e   :  { %8622 = vst [vmem:[#allocation69_spill] sm:$0xff] %v7642_v2  ;;  %v7647_v31 = vpop.f32.mrf.mxu1  ;;  %v8646_v2 = vld [vmem:[#allocation104_spill] sm:$0xff] }
 0x271   :  { %4848 = vmatmul.msk.bf16.gmra.mxu2 %vm772_vm2, %v8626_v39  ;;  %4922 = vmatmul.msk.bf16.gmra.mxu1 %vm772_vm2, %v3087_v1  ;;  %v8632_v39 = vld [vmem:[#allocation88_spill] sm:$0xff] }
 0x272   :  { %v8633_v47 = vpack.c.bf16 %v8631_v23, %v8632_v39  ;;  %v2834_v23 = vpop.f32.mrf.mxu0 }
 0x274   :  { %v7656_v25 = vpop.f32.mrf.mxu2 }
 0x275   :  { %v7654_v36 = vpop.f32.mrf.mxu3  ;;  %8628 = vst [vmem:[#allocation79_spill] sm:$0xff] %v7656_v25  ;;  %v8647_v25 = vpack.c.bf16 %v8645_v26, %v8646_v2  ;;  %v1222_v2 = vadd.f32 %v7512_v6, %v8653_v20  ;;  %v8654_v26 = vld [vmem:[#allocation78_spill] sm:$0xff]  ;;  %v1225_v6 = vadd.f32 %v7530_v30, %v8659_v53 }
 0x276   :  { %8627 = vst [vmem:[#allocation77_spill] sm:$0xff] %v7654_v36  ;;  %v7658_v52 = vpop.f32.mrf.mxu1  ;;  %v8660_v20 = vld [vmem:[#allocation82_spill] sm:$0xff] }
 0x27c   :  { %v7662_v8 = vpop.f32.mrf.mxu2 }
 0x27d   :  { %v7660_v55 = vpop.f32.mrf.mxu3  ;;  %8630 = vst [vmem:[#allocation127_spill] sm:$0xff] %v7662_v8  ;;  %v8639_v8 = vld [vmem:[#allocation96_spill] sm:$0xff] }
 0x27e   :  { %8629 = vst [vmem:[#allocation126_spill] sm:$0xff] %v7660_v55  ;;  %v7664_v41 = vpop.f32.mrf.mxu1  ;;  %v8640_v58 = vpack.c.bf16 %v8638_v27, %v8639_v8 }
 0x281   :  { %4849 = vmatmul.msk.bf16.gmra.mxu2 %vm772_vm2, %v8633_v47  ;;  %4923 = vmatmul.msk.bf16.gmra.mxu1 %vm772_vm2, %v3088_v35 }
 0x284   :  { %v7673_v50 = vpop.f32.mrf.mxu2 }
 0x285   :  { %v7671_v1 = vpop.f32.mrf.mxu3  ;;  %8635 = vst [vmem:[#allocation88_spill] sm:$0xff] %v7673_v50  ;;  %v2836_v50 = vpop.f32.mrf.mxu0 }
 0x286   :  { %8634 = vst [vmem:[#allocation87_spill] sm:$0xff] %v7671_v1  ;;  %v7675_v36 = vpop.f32.mrf.mxu1 }
 0x28c   :  { %v7679_v59 = vpop.f32.mrf.mxu2 }
 0x28d   :  { %v7677_v55 = vpop.f32.mrf.mxu3  ;;  %8637 = vst [vmem:[#allocation129_spill] sm:$0xff] %v7679_v59  ;;  %v2839_v27 = vpop.f32.mrf.mxu0 }
 0x28e   :  { %8636 = vst [vmem:[#allocation128_spill] sm:$0xff] %v7677_v55  ;;  %v7681_v63 = vpop.f32.mrf.mxu1 }
 0x291   :  { %4850 = vmatmul.msk.bf16.gmra.mxu2 %vm772_vm2, %v8640_v58 }
 0x294   :  { %v7689_v35 = vpop.f32.mrf.mxu2 }
 0x295   :  { %v7687_v39 = vpop.f32.mrf.mxu3  ;;  %8642 = vst [vmem:[#allocation96_spill] sm:$0xff] %v7689_v35  ;;  %v7717_v43 = vpop.f32.mrf.mxu0 }
 0x296   :  { %8641 = vst [vmem:[#allocation95_spill] sm:$0xff] %v7687_v39  ;;  %v7691_v47 = vpop.f32.mrf.mxu1  ;;  %v8650_v39 = vld [vmem:[#allocation54_spill] sm:$0xff] }
 0x297   :  { %v1220_v35 = vadd.f32 %v7496_v60, %v8650_v39  ;;  %v8657_v39 = vld [vmem:[#allocation65_spill] sm:$0xff] }
 0x29c   :  { %v7695_v55 = vpop.f32.mrf.mxu2 }
 0x29d   :  { %v7693_v1 = vpop.f32.mrf.mxu3  ;;  %8644 = vst [vmem:[#allocation131_spill] sm:$0xff] %v7695_v55  ;;  %v8652_v55 = vld [vmem:[#allocation61_spill] sm:$0xff] }
 0x29e   :  { %8643 = vst [vmem:[#allocation130_spill] sm:$0xff] %v7693_v1  ;;  %v7697_v59 = vpop.f32.mrf.mxu1  ;;  %v1574_v45 = vadd.f32 %v8652_v55, %v1220_v35 }
 0x2a1   :  { %4851 = vmatmul.msk.bf16.gmra.mxu2 %vm772_vm2, %v8647_v25  ;;  %v1896_v25 = vadd.f32 %v8654_v26, %v1574_v45 }
 0x2a3   :  { %v2070_v55 = vadd.f32 %v8658_v49, %v1896_v25  ;;  %v8662_v49 = vld [vmem:[#allocation106_spill] sm:$0xff] }
 0x2a4   :  { %v7705_v8 = vpop.f32.mrf.mxu2 }
 0x2a5   :  { %v7703_v58 = vpop.f32.mrf.mxu3  ;;  %8649 = vst [vmem:[#allocation104_spill] sm:$0xff] %v7705_v8  ;;  %v8656_v8 = vpack.c.bf16 %v7332_v37, %v7339_v40  ;;  %v7733_v37 = vpop.f32.mrf.mxu0  ;;  %v8661_v40 = vld [vmem:[#allocation68_spill] sm:$0xff] }
 0x2a6   :  { %8648 = vst [vmem:[#allocation103_spill] sm:$0xff] %v7703_v58  ;;  %v7709_v7 = vpop.f32.mrf.mxu1 }
 0x2ac   :  { %v1271_v16 = vpop.f32.mrf.mxu2 }
 0x2ad   :  { %v7711_v1 = vpop.f32.mrf.mxu3 }
 0x2ae   :  { %8651 = vst [vmem:[#allocation54_spill] sm:$0xff] %v7711_v1  ;;  %v7719_v58 = vpop.f32.mrf.mxu1  ;;  %v1575_v1 = vadd.f32 %v8657_v39, %v1222_v2 }
 0x2af   :  { %8655 = vst [vmem:[#allocation61_spill] sm:$0xff] %v7719_v58 }
 0x2b0   :  { %v1897_v26 = vadd.f32 %v8660_v20, %v1575_v1 }
 0x2b1   :  { %4852 = vmatmul.msk.bf16.gmra.mxu2 %vm772_vm2, %v8656_v8  ;;  %v1576_v8 = vadd.f32 %v8661_v40, %v1225_v6  ;;  %v2753_v40 = vld [vmem:[#allocation2 + $0xb6] sm:$0xff] }
 0x2b2   :  { %v2071_v25 = vadd.f32 %v8662_v49, %v1897_v26 }
 0x2b4   :  { %v2338_v16 = vpop.f32.mrf.mxu2 }
 0x2b5   :  { %v2712_v60 = vpop.f32.mrf.mxu3  ;;  %v2392_v35 = vadd.f32 %v2338_v16, %v2070_v55  ;;  %v8664_v16 = vld [vmem:[#allocation86_spill] sm:$0xff] }
 0x2b6   :  { %v7737_v60 = vpop.f32.mrf.mxu1 }
 0x2b7   :  { %v2714_v45 = vadd.f32 %v7506_v62, %v2392_v35  ;;  %v8663_v62 = vld [vmem:[#allocation63_spill] sm:$0xff]  ;;  %v1898_v35 = vadd.f32 %v8664_v16, %v1576_v8 }
 0x2b8   :  { %v1227_v1 = vadd.f32 %v7540_v34, %v8663_v62  ;;  %v2754_v34 = vld [vmem:[#allocation2 + $0xbe] sm:$0xff] }
 0x2b9   :  { %v2888_v58 = vadd.f32 %v2834_v23, %v2714_v45  ;;  %v2765_v8 = vpack.c.bf16 %v2754_v34, %v2753_v40 }
 0x2bb   :  { %v3210_v2 = vadd.f32 %v7626_v0, %v2888_v58  ;;  %v8665_v0 = vpack.c.bf16 %v7388_v15, %v7393_v54  ;;  %v8666_v58 = vld [vmem:[#allocation72_spill] sm:$0xff]  ;;  %4899 = vmatmul.msk.bf16.gmra.mxu0 %vm772_vm2, %v2765_v8  ;;  %v8667_v15 = vld [vmem:[#allocation67_spill] sm:$0xff] }
 0x2bc   :  { %v2340_v39 = vpop.f32.mrf.mxu2  ;;  %v1577_v45 = vadd.f32 %v8666_v58, %v1227_v1  ;;  %v2237_v1 = vpop.permute.xlu0 %2236 }
 0x2bd   :  { %v3235_v30 = vadd.f32 %v7731_v19, %v3210_v2  ;;  %v2393_v53 = vadd.f32 %v2340_v39, %v2071_v25  ;;  %v2072_v2 = vadd.f32 %v7325_v51, %v1898_v35  ;;  %v1230_v39 = vadd.f32 %v7556_v4, %v8667_v15  ;;  %v2111_v51 = vld [vmem:[#allocation2 + $0xb6] sm:$0x3]  ;;  %v8669_v35 = vld [vmem:[#allocation76_spill] sm:$0xff] }
 0x2be   :  { %v7751_v26 = vpop.f32.mrf.mxu1  ;;  %v2259_v16 = vmul.f32 %v2237_v1, %v2111_v51  ;;  %v8672_v15 = vld [vmem:[#allocation71_spill] sm:$0xff]  ;;  %v2755_v1 = vld [vmem:[#allocation2 + $0xc6] sm:$0x3] }
 0x2bf   :  { %v4924_v23 = vmul.f32 -1.442695, %v3235_v30  ;;  %v2715_v55 = vadd.f32 %v7526_v29, %v2393_v53  ;;  %v7754_v29 = vpop.f32.mrf.mxu0  ;;  %v8668_v53 = vld [vmem:[#allocation91_spill] sm:$0xff] }
 0x2c0   :  { %v1899_v62 = vadd.f32 %v8668_v53, %v1577_v45  ;;  %v2270_v8 = vpack.c.bf16 %v2259_v16, %v2259_v16 }
 0x2c1   :  { %5410 = vpow2.f32 %v4924_v23  ;;  %v2889_v6 = vadd.f32 %v2836_v50, %v2715_v55  ;;  %4853 = vmatmul.msk.bf16.gmra.mxu2 %vm772_vm2, %v8665_v0 }
 0x2c3   :  { %v3211_v20 = vadd.f32 %v7640_v14, %v2889_v6  ;;  %v1578_v6 = vadd.f32 %v8669_v35, %v1230_v39 }
 0x2c4   :  { %v2343_v49 = vpop.f32.mrf.mxu2 }
 0x2c5   :  { %v3236_v50 = vadd.f32 %v7731_v19, %v3211_v20  ;;  %v2394_v25 = vadd.f32 %v2343_v49, %v2072_v2  ;;  %v8670_v20 = vld [vmem:[#allocation112_spill] sm:$0xff] }
 0x2c6   :  { %v7764_v58 = vpop.f32.mrf.mxu1  ;;  %v2073_v4 = vadd.f32 %v8670_v20, %v1899_v62 }
 0x2c7   :  { %v5411_v54 = vpop.eup %5410  ;;  %v4925_v14 = vmul.f32 -1.442695, %v3236_v50  ;;  %v2716_v30 = vadd.f32 %v7537_v22, %v2394_v25  ;;  %v7768_v45 = vpop.f32.mrf.mxu0  ;;  %v8671_v50 = vld [vmem:[#allocation94_spill] sm:$0xff] }
 0x2c8   :  { %v3319_v23 = vadd.f32 1.0, %v5411_v54  ;;  %v1900_v25 = vadd.f32 %v8671_v50, %v1578_v6  ;;  %v2766_v6 = vpack.c.bf16 %v2755_v1, %v2755_v1 }
 0x2c9   :  { %5412 = vpow2.f32 %v4925_v14  ;;  %v2890_v55 = vadd.f32 %v2839_v27, %v2716_v30 }
 0x2ca   :  { %5414 = vrcp.f32 %v3319_v23  ;;  %v2074_v51 = vadd.f32 %v7383_v61, %v1900_v25  ;;  %v3349_v16 = vand.u32 2147483647, %v3319_v23  ;;  %v3351_v35 = vand.u32 2147483648, %v3319_v23  ;;  %v8675_v25 = vld [vmem:[#allocation99_spill] sm:$0xff] }
 0x2cb   :  { %v3212_v0 = vadd.f32 %v7647_v31, %v2890_v55  ;;  %v1232_v31 = vadd.f32 %v7563_v44, %v8672_v15  ;;  %v8673_v55 = vld [vmem:[#allocation80_spill] sm:$0xff]  ;;  %4900 = vmatmul.msk.bf16.gmra.mxu0 %vm772_vm2, %v2766_v6  ;;  %vm3345_vm14 = vweird.f32 %v3319_v23 }
 0x2cc   :  { %v2345_v40 = vpop.f32.mrf.mxu2  ;;  %vm3350_vm0 = vcmp.eq.f32.partialorder %v3349_v16, 8.507059e+37 }
 0x2cd   :  { %v3237_v22 = vadd.f32 %v7731_v19, %v3212_v0  ;;  %v2395_v34 = vadd.f32 %v2345_v40, %v2073_v4  ;;  %v1579_v44 = vadd.f32 %v8673_v55, %v1232_v31 }
 0x2cf   :  { %v5413_v2 = vpop.eup %5412  ;;  %v4926_v49 = vmul.f32 -1.442695, %v3237_v22  ;;  %v2717_v27 = vadd.f32 %v7554_v3, %v2395_v34  ;;  %v7780_v3 = vpop.f32.mrf.mxu1  ;;  %v1901_v15 = vadd.f32 %v8675_v25, %v1579_v44 }
 0x2d0   :  { %v5415_v54 = vpop.eup %5414  ;;  %v7774_v39 = vadd.f32 1.0, %v5413_v2  ;;  %v8674_v2 = vld [vmem:[#allocation75_spill] sm:$0xff] }
 0x2d1   :  { %v3341_v14 = vmul.f32 %v5415_v54, %v3319_v23  ;;  %5416 = vpow2.f32 %v4926_v49  ;;  %v2891_v30 = vadd.f32 %v7717_v43, %v2717_v27  ;;  %4854 = vmatmul.msk.bf16.gmra.mxu2 %vm772_vm2, %v2270_v8  ;;  %vm3346_vm13 = vweird.f32 %v5415_v54  ;;  %v7789_v49 = vpop.f32.mrf.mxu0 }
 0x2d2   :  { %5418 = vrcp.f32 %v7774_v39  ;;  %v1235_v8 = vadd.f32 %v7580_v18, %v8674_v2  ;;  %vm3347_vm15 = vmor %vm3345_vm14, %vm3346_vm13  ;;  %v3352_v27 = vor.u32 1.1754944e-38, %v3351_v35  ;;  %v2075_v1 = vadd.f32 %v7407_v33, %v1901_v15  ;;  %v8679_v15 = vld [vmem:[#allocation89_spill] sm:$0xff] }
 0x2d3   :  { %v3342_v53 = vsub.f32 1.0, %v3341_v14  ;;  %v3213_v62 = vadd.f32 %v7658_v52, %v2891_v30  ;;  %v8676_v30 = vld [vmem:[#allocation84_spill] sm:$0xff]  ;;  %vm3360_vm3 = vweird.f32 %v7774_v39 }
 0x2d4   :  { %v2348_v0 = vpop.f32.mrf.mxu2 }
 0x2d5   :  { %v3343_v20 = vmul.f32 %v5415_v54, %v3342_v53  ;;  %v3238_v43 = vadd.f32 %v7731_v19, %v3213_v62  ;;  %v2396_v4 = vadd.f32 %v2348_v0, %v2074_v51  ;;  %v1580_v53 = vadd.f32 %v8676_v30, %v1235_v8  ;;  %v8677_v0 = vld [vmem:[#allocation81_spill] sm:$0xff] }
 0x2d6   :  { %v3366_v62 = vand.u32 2147483648, %v7774_v39 }
 0x2d7   :  { %v5417_v40 = vpop.eup %5416  ;;  %v3344_v52 = vadd.f32 %v5415_v54, %v3343_v20  ;;  %v4927_v22 = vmul.f32 -1.442695, %v3238_v43  ;;  %v2718_v34 = vadd.f32 %v7561_v38, %v2396_v4  ;;  %v7803_v44 = vpop.f32.mrf.mxu1 }
 0x2d8   :  { %v5419_v61 = vpop.eup %5418  ;;  %v7791_v50 = vadd.f32 1.0, %v5417_v40  ;;  %v3367_v4 = vor.u32 1.1754944e-38, %v3366_v62 }
 0x2d9   :  { %v3348_v31 = vsel %vm3347_vm15, %v5415_v54, %v3344_v52  ;;  %v3356_v14 = vmul.f32 %v5419_v61, %v7774_v39  ;;  %5420 = vpow2.f32 %v4927_v22  ;;  %v2892_v18 = vadd.f32 %v7733_v37, %v2718_v34  ;;  %v8678_v52 = vld [vmem:[#allocation102_spill] sm:$0xff] }
 0x2da   :  { %v3353_v23 = vsel %vm3350_vm0, %v3352_v27, %v3348_v31  ;;  %5422 = vrcp.f32 %v7791_v50  ;;  %vm3361_vm1 = vweird.f32 %v5419_v61  ;;  %v3364_v54 = vand.u32 2147483647, %v7774_v39 }
 0x2db   :  { %3655 = vst.msk [vmem:[#allocation3] sm:$0xff] %vm772_vm2, %v3353_v23  ;;  %v3357_v38 = vsub.f32 1.0, %v3356_v14  ;;  %v3214_v55 = vadd.f32 %v7664_v41, %v2892_v18  ;;  %v1237_v37 = vadd.f32 %v7586_v48, %v8677_v0  ;;  %vm3362_vm4 = vmor %vm3360_vm3, %vm3361_vm1  ;;  %v1902_v22 = vadd.f32 %v8678_v52, %v1580_v53  ;;  %v7814_v48 = vpop.f32.mrf.mxu0 }
 0x2dc   :  { %v2350_v16 = vpop.f32.mrf.mxu2  ;;  %vm3365_vm5 = vcmp.eq.f32.partialorder %v3364_v54, 8.507059e+37  ;;  %v3381_v31 = vand.u32 2147483648, %v7791_v50  ;;  %v3379_v23 = vand.u32 2147483647, %v7791_v50  ;;  %vm3375_vm7 = vweird.f32 %v7791_v50 }
 0x2dd   :  { %v3358_v51 = vmul.f32 %v5419_v61, %v3357_v38  ;;  %v2397_v35 = vadd.f32 %v2350_v16, %v2075_v1  ;;  %v3239_v43 = vadd.f32 %v7731_v19, %v3214_v55  ;;  %v8681_v16 = vld [vmem:[#allocation107_spill] sm:$0xff] }
 0x2de   :  { %vm3380_vm10 = vcmp.eq.f32.partialorder %v3379_v23, 8.507059e+37 }
 0x2df   :  { %v5421_v6 = vpop.eup %5420  ;;  %v3359_v20 = vadd.f32 %v5419_v61, %v3358_v51  ;;  %v2719_v41 = vadd.f32 %v7578_v46, %v2397_v35  ;;  %v4928_v8 = vmul.f32 -1.442695, %v3239_v43  ;;  %v1581_v46 = vadd.f32 %v8679_v15, %v1237_v37  ;;  %v7824_v18 = vpop.f32.mrf.mxu1  ;;  %v8680_v51 = vld [vmem:[#allocation85_spill] sm:$0xff]  ;;  %v8683_v15 = vld [vmem:[#allocation90_spill] sm:$0xff] }
 0x2e0   :  { %v5423_v33 = vpop.eup %5422  ;;  %v7809_v40 = vadd.f32 1.0, %v5421_v6  ;;  %v1240_v54 = vadd.f32 %v7600_v42, %v8680_v51 }
 0x2e1   :  { %v3363_v34 = vsel %vm3362_vm4, %v5419_v61, %v3359_v20  ;;  %v3371_v2 = vmul.f32 %v5423_v33, %v7791_v50  ;;  %v2893_v25 = vadd.f32 %v7754_v29, %v2719_v41  ;;  %v2076_v61 = vadd.f32 %v7420_v57, %v1902_v22 }
 0x2e2   :  { %v3368_v27 = vsel %vm3365_vm5, %v3367_v4, %v3363_v34  ;;  %5424 = vrcp.f32 %v7809_v40  ;;  %vm3376_vm6 = vweird.f32 %v5423_v33  ;;  %v3382_v57 = vor.u32 1.1754944e-38, %v3381_v31  ;;  %v8682_v4 = vld [vmem:[#allocation92_spill] sm:$0xff] }
 0x2e3   :  { %3656 = vst.msk [vmem:[#allocation3 + $0x8] sm:$0xff] %vm772_vm2, %v3368_v27  ;;  %v3372_v39 = vsub.f32 1.0, %v3371_v2  ;;  %5426 = vpow2.f32 %v4928_v8  ;;  %v3215_v38 = vadd.f32 %v7675_v36, %v2893_v25  ;;  %vm3377_vm9 = vmor %vm3375_vm7, %vm3376_vm6  ;;  %v1903_v35 = vadd.f32 %v8681_v16, %v1581_v46 }
 0x2e4   :  { %v2353_v30 = vpop.f32.mrf.mxu2  ;;  %v1582_v41 = vadd.f32 %v8682_v4, %v1240_v54  ;;  %v3396_v52 = vand.u32 2147483648, %v7809_v40  ;;  %v3394_v34 = vand.u32 2147483647, %v7809_v40  ;;  %vm3390_vm12 = vweird.f32 %v7809_v40 }
 0x2e5   :  { %v3373_v14 = vmul.f32 %v5423_v33, %v3372_v39  ;;  %v2398_v53 = vadd.f32 %v2353_v30, %v2076_v61  ;;  %v3240_v29 = vadd.f32 %v7731_v19, %v3215_v38  ;;  %v1242_v46 = vadd.f32 %v7606_v12, %v8683_v15  ;;  %v8684_v61 = vld [vmem:[#allocation38_spill] sm:$0xff] }
 0x2e6   :  { %vm3395_vm14 = vcmp.eq.f32.partialorder %v3394_v34, 8.507059e+37 }
 0x2e7   :  { %v3374_v62 = vadd.f32 %v5423_v33, %v3373_v14  ;;  %v2720_v55 = vadd.f32 %v7584_v32, %v2398_v53  ;;  %v4929_v37 = vmul.f32 -1.442695, %v3240_v29  ;;  %v7838_v32 = vpop.f32.mrf.mxu0  ;;  %v7845_v2 = vpop.f32.mrf.mxu1  ;;  %v1904_v14 = vadd.f32 %v8684_v61, %v1582_v41  ;;  %v8685_v29 = vld [vmem:[#allocation97_spill] sm:$0xff] }
 0x2e8   :  { %v5425_v1 = vpop.eup %5424  ;;  %v1583_v51 = vadd.f32 %v8685_v29, %v1242_v46 }
 0x2e9   :  { %v5427_v36 = vpop.eup %5426  ;;  %v3378_v6 = vsel %vm3377_vm9, %v5423_v33, %v3374_v62  ;;  %v3386_v0 = vmul.f32 %v5425_v1, %v7809_v40  ;;  %v2894_v43 = vadd.f32 %v7768_v45, %v2720_v55  ;;  %5428 = vpow2.f32 %v4929_v37  ;;  %v8686_v37 = vld [vmem:[#allocation93_spill] sm:$0xff] }
 0x2ea   :  { %v3383_v20 = vsel %vm3380_vm10, %v3382_v57, %v3378_v6  ;;  %v7833_v50 = vadd.f32 1.0, %v5427_v36  ;;  %v2077_v33 = vadd.f32 %v7440_v11, %v1903_v35  ;;  %vm3391_vm11 = vweird.f32 %v5425_v1 }
 0x2eb   :  { %3657 = vst.msk [vmem:[#allocation3 + $0x10] sm:$0xff] %vm772_vm2, %v3383_v20  ;;  %v3387_v42 = vsub.f32 1.0, %v3386_v0  ;;  %v3216_v45 = vadd.f32 %v7681_v63, %v2894_v43  ;;  %vm3392_vm13 = vmor %vm3390_vm12, %vm3391_vm11  ;;  %v3397_v11 = vor.u32 1.1754944e-38, %v3396_v52 }
 0x2ec   :  { %5430 = vrcp.f32 %v7833_v50  ;;  %v2355_v8 = vpop.f32.mrf.mxu2  ;;  %v3411_v16 = vand.u32 2147483648, %v7833_v50  ;;  %v3409_v6 = vand.u32 2147483647, %v7833_v50  ;;  %vm3405_vm0 = vweird.f32 %v7833_v50 }
 0x2ed   :  { %v3388_v22 = vmul.f32 %v5425_v1, %v3387_v42  ;;  %v2399_v27 = vadd.f32 %v2355_v8, %v2077_v33  ;;  %v3241_v25 = vadd.f32 %v7731_v19, %v3216_v45 }
 0x2ee   :  { %v3412_v33 = vor.u32 1.1754944e-38, %v3411_v16  ;;  %vm3410_vm3 = vcmp.eq.f32.partialorder %v3409_v6, 8.507059e+37 }
 0x2ef   :  { %v3389_v39 = vadd.f32 %v5425_v1, %v3388_v22  ;;  %v2721_v31 = vadd.f32 %v7598_v9, %v2399_v27  ;;  %v5429_v23 = vpop.eup %5428  ;;  %v4930_v38 = vmul.f32 -1.442695, %v3241_v25  ;;  %v2078_v9 = vadd.f32 %v7453_v17, %v1904_v14  ;;  %v7862_v57 = vpop.f32.mrf.mxu1 }
 0x2f0   :  { %v7853_v62 = vadd.f32 1.0, %v5429_v23  ;;  %v7865_v35 = vpop.f32.mrf.mxu0  ;;  %v1245_v17 = vadd.f32 %v7620_v24, %v8686_v37 }
 0x2f1   :  { %v3393_v63 = vsel %vm3392_vm13, %v5425_v1, %v3389_v39  ;;  %v2895_v40 = vadd.f32 %v7789_v49, %v2721_v31  ;;  %5432 = vpow2.f32 %v4930_v38 }
 0x2f2   :  { %v5431_v30 = vpop.eup %5430  ;;  %v3398_v53 = vsel %vm3395_vm14, %v3397_v11, %v3393_v63  ;;  %5434 = vrcp.f32 %v7853_v62  ;;  %v3426_v46 = vand.u32 2147483648, %v7853_v62  ;;  %vm3420_vm5 = vweird.f32 %v7853_v62 }
 0x2f3   :  { %3658 = vst.msk [vmem:[#allocation3 + $0x18] sm:$0xff] %vm772_vm2, %v3398_v53  ;;  %v3401_v12 = vmul.f32 %v5431_v30, %v7833_v50  ;;  %v3217_v54 = vadd.f32 %v7691_v47, %v2895_v40  ;;  %vm3406_vm15 = vweird.f32 %v5431_v30  ;;  %v8687_v47 = vld [vmem:[#allocation113_spill] sm:$0xff] }
 0x2f4   :  { %v2358_v55 = vpop.f32.mrf.mxu2  ;;  %v1905_v43 = vadd.f32 %v8687_v47, %v1583_v51  ;;  %vm3407_vm1 = vmor %vm3405_vm0, %vm3406_vm15  ;;  %v3427_v29 = vor.u32 1.1754944e-38, %v3426_v46  ;;  %v8693_v47 = vld [vmem:[#allocation62_spill] sm:$0xff] }
 0x2f5   :  { %v3402_v1 = vsub.f32 1.0, %v3401_v12  ;;  %v2400_v49 = vadd.f32 %v2358_v55, %v2078_v9  ;;  %v3242_v0 = vadd.f32 %v7731_v19, %v3217_v54 }
 0x2f6   :  { %v2079_v50 = vadd.f32 %v7473_v13, %v1905_v43  ;;  %v3424_v13 = vand.u32 2147483647, %v7853_v62 }
 0x2f7   :  { %v3403_v36 = vmul.f32 %v5431_v30, %v3402_v1  ;;  %v2722_v20 = vadd.f32 %v7604_v5, %v2400_v49  ;;  %v5433_v42 = vpop.eup %5432  ;;  %v4931_v41 = vmul.f32 -1.442695, %v3242_v0  ;;  %v8688_v5 = vld [vmem:[#allocation100_spill] sm:$0xff]  ;;  %v7883_v15 = vpop.f32.mrf.mxu1 }
 0x2f8   :  { %v5435_v52 = vpop.eup %5434  ;;  %v7874_v22 = vadd.f32 1.0, %v5433_v42  ;;  %v1584_v8 = vadd.f32 %v8688_v5, %v1245_v17  ;;  %vm3425_vm7 = vcmp.eq.f32.partialorder %v3424_v13, 8.507059e+37  ;;  %v8691_v17 = vld [vmem:[#allocation51_spill] sm:$0xff]  ;;  %v8694_v42 = vld [vmem:[#allocation116_spill] sm:$0xff] }
 0x2f9   :  { %v3404_v4 = vadd.f32 %v5431_v30, %v3403_v36  ;;  %v2896_v34 = vadd.f32 %v7814_v48, %v2722_v20  ;;  %v3416_v24 = vmul.f32 %v5435_v52, %v7853_v62  ;;  %5436 = vpow2.f32 %v4931_v41  ;;  %v8690_v62 = vld [vmem:[#allocation105_spill] sm:$0xff]  ;;  %v8692_v20 = vld [vmem:[#allocation108_spill] sm:$0xff] }
 0x2fa   :  { %5438 = vrcp.f32 %v7874_v22  ;;  %vm3421_vm4 = vweird.f32 %v5435_v52  ;;  %v1906_v63 = vadd.f32 %v7385_v10, %v1584_v8  ;;  %v3441_v36 = vand.u32 2147483648, %v7874_v22 }
 0x2fb   :  { %v3408_v45 = vsel %vm3407_vm1, %v5431_v30, %v3404_v4  ;;  %v3417_v39 = vsub.f32 1.0, %v3416_v24  ;;  %v3218_v25 = vadd.f32 %v7697_v59, %v2896_v34  ;;  %v8689_v59 = vld [vmem:[#allocation98_spill] sm:$0xff]  ;;  %v7898_v30 = vpop.f32.mrf.mxu0  ;;  %vm3422_vm6 = vmor %vm3420_vm5, %vm3421_vm4  ;;  %vm3435_vm10 = vweird.f32 %v7874_v22 }
 0x2fc   :  { %v3413_v27 = vsel %vm3410_vm3, %v3412_v33, %v3408_v45  ;;  %v2360_v48 = vpop.f32.mrf.mxu2  ;;  %v1247_v14 = vadd.f32 %v7624_v28, %v8689_v59  ;;  %v3442_v45 = vor.u32 1.1754944e-38, %v3441_v36 }
 0x2fd   :  { %3659 = vst.msk [vmem:[#allocation3 + $0x20] sm:$0xff] %vm772_vm2, %v3413_v27  ;;  %v2401_v11 = vadd.f32 %v2360_v48, %v2079_v50  ;;  %v3418_v31 = vmul.f32 %v5435_v52, %v3417_v39  ;;  %v3243_v61 = vadd.f32 %v7731_v19, %v3218_v25  ;;  %v8695_v39 = vld [vmem:[#allocation109_spill] sm:$0xff] }
 0x2fe   :  { %v1585_v9 = vadd.f32 %v8690_v62, %v1247_v14 }
 0x2ff   :  { %v2723_v23 = vadd.f32 %v7618_v21, %v2401_v11  ;;  %v5437_v38 = vpop.eup %5436  ;;  %v3419_v53 = vadd.f32 %v5435_v52, %v3418_v31  ;;  %v4932_v40 = vmul.f32 -1.442695, %v3243_v61  ;;  %v7914_v16 = vpop.f32.mrf.mxu1  ;;  %v8697_v31 = vld [vmem:[#allocation61_spill] sm:$0xff] }
 0x300   :  { %v5439_v12 = vpop.eup %5438  ;;  %v7902_v51 = vadd.f32 1.0, %v5437_v38  ;;  %v1907_v4 = vadd.f32 %v8694_v42, %v1585_v9 }
 0x301   :  { %v2897_v28 = vadd.f32 %v7838_v32, %v2723_v23  ;;  %v3423_v10 = vsel %vm3422_vm6, %v5435_v52, %v3419_v53  ;;  %v3431_v21 = vmul.f32 %v5439_v12, %v7874_v22  ;;  %5440 = vpow2.f32 %v4932_v40  ;;  %v8698_v53 = vld [vmem:[#allocation44_spill] sm:$0xff]  ;;  %v8699_v40 = vld [vmem:[#allocation70_spill] sm:$0xff] }
 0x302   :  { %v3428_v1 = vsel %vm3425_vm7, %v3427_v29, %v3423_v10  ;;  %5442 = vrcp.f32 %v7902_v51  ;;  %v2080_v32 = vadd.f32 %v7484_v56, %v1906_v63  ;;  %vm3436_vm9 = vweird.f32 %v5439_v12  ;;  %v8700_v29 = vld [vmem:[#allocation64_spill] sm:$0xff]  ;;  %v8701_v10 = vld [vmem:[#allocation46_spill] sm:$0xff] }
 0x303   :  { %3660 = vst.msk [vmem:[#allocation3 + $0x28] sm:$0xff] %vm772_vm2, %v3428_v1  ;;  %v3432_v54 = vsub.f32 1.0, %v3431_v21  ;;  %v3219_v55 = vadd.f32 %v7709_v7, %v2897_v28  ;;  %v3439_v56 = vand.u32 2147483647, %v7874_v22  ;;  %v1250_v7 = vadd.f32 %v8692_v20, %v8691_v17  ;;  %vm3437_vm11 = vmor %vm3435_vm10, %vm3436_vm9  ;;  %v2864_v8 = vpop.f32.mrf.mxu0  ;;  %v8696_v22 = vld [vmem:[#allocation41_spill] sm:$0xff]  ;;  %v8703_v17 = vld [vmem:[#allocation50_spill] sm:$0xff] }
 0x304   :  { %v2363_v49 = vpop.f32.mrf.mxu2  ;;  %v2081_v46 = vadd.f32 %v8696_v22, %v1907_v4  ;;  %v3456_v59 = vand.u32 2147483648, %v7902_v51  ;;  %v3454_v63 = vand.u32 2147483647, %v7902_v51  ;;  %vm3450_vm14 = vweird.f32 %v7902_v51 }
 0x305   :  { %v2402_v6 = vadd.f32 %v2363_v49, %v2080_v32  ;;  %v3433_v0 = vmul.f32 %v5439_v12, %v3432_v54  ;;  %v3244_v37 = vadd.f32 %v7731_v19, %v3219_v55  ;;  %vm3440_vm12 = vcmp.eq.f32.partialorder %v3439_v56, 8.507059e+37 }
 0x306   :  { %v1586_v25 = vadd.f32 %v8695_v39, %v1250_v7  ;;  %v3457_v54 = vor.u32 1.1754944e-38, %v3456_v59  ;;  %vm3455_vm0 = vcmp.eq.f32.partialorder %v3454_v63, 8.507059e+37 }
 0x307   :  { %v2724_v43 = vadd.f32 %v8693_v47, %v2402_v6  ;;  %v5441_v41 = vpop.eup %5440  ;;  %v3434_v52 = vadd.f32 %v5439_v12, %v3433_v0  ;;  %v4933_v33 = vmul.f32 -1.442695, %v3244_v37  ;;  %v3208_v61 = vpop.f32.mrf.mxu1  ;;  %v8702_v0 = vld [vmem:[#allocation110_spill] sm:$0xff] }
 0x308   :  { %v5443_v34 = vpop.eup %5442  ;;  %v7924_v24 = vadd.f32 1.0, %v5441_v41  ;;  %v1908_v21 = vadd.f32 %v8701_v10, %v1586_v25 }
 0x309   :  { %v2898_v5 = vadd.f32 %v7865_v35, %v2724_v43  ;;  %v3438_v27 = vsel %vm3437_vm11, %v5439_v12, %v3434_v52  ;;  %v3446_v50 = vmul.f32 %v5443_v34, %v7902_v51  ;;  %5444 = vpow2.f32 %v4933_v33  ;;  %v8704_v33 = vld [vmem:[#allocation111_spill] sm:$0xff] }
 0x30a   :  { %v3443_v48 = vsel %vm3440_vm12, %v3442_v45, %v3438_v27  ;;  %5446 = vrcp.f32 %v7924_v24  ;;  %vm3451_vm13 = vweird.f32 %v5443_v34  ;;  %v1252_v12 = vadd.f32 %v8699_v40, %v8698_v53 }
 0x30b   :  { %3661 = vst.msk [vmem:[#allocation3 + $0x30] sm:$0xff] %vm772_vm2, %v3443_v48  ;;  %v3447_v11 = vsub.f32 1.0, %v3446_v50  ;;  %v3220_v13 = vadd.f32 %v8697_v31, %v2898_v5  ;;  %vm3452_vm15 = vmor %vm3450_vm14, %vm3451_vm13  ;;  %v2082_v51 = vadd.f32 %v8703_v17, %v1908_v21  ;;  %v2866_v20 = vpop.f32.mrf.mxu0  ;;  %v3469_v41 = vand.u32 2147483647, %v7924_v24  ;;  %v8706_v5 = vld [vmem:[#allocation69_spill] sm:$0xff]  ;;  %v8707_v50 = vld [vmem:[#allocation118_spill] sm:$0xff] }
 0x30c   :  { %v2365_v35 = vpop.f32.mrf.mxu2  ;;  %v1587_v56 = vadd.f32 %v8702_v0, %v1252_v12  ;;  %vm3465_vm3 = vweird.f32 %v7924_v24  ;;  %v8710_v21 = vld [vmem:[#allocation39_spill] sm:$0xff] }
 0x30d   :  { %v2403_v14 = vadd.f32 %v2365_v35, %v2081_v46  ;;  %v3448_v23 = vmul.f32 %v5443_v34, %v3447_v11  ;;  %v3245_v38 = vadd.f32 %v7731_v19, %v3220_v13  ;;  %vm3470_vm5 = vcmp.eq.f32.partialorder %v3469_v41, 8.507059e+37  ;;  %v8708_v35 = vld [vmem:[#allocation114_spill] sm:$0xff] }
 0x30e   :  { %v1909_v39 = vadd.f32 %v8707_v50, %v1587_v56  ;;  %v8717_v50 = vld [vmem:[#allocation88_spill] sm:$0xff] }
 0x30f   :  { %v2725_v28 = vadd.f32 %v8700_v29, %v2403_v14  ;;  %v5445_v62 = vpop.eup %5444  ;;  %v3449_v9 = vadd.f32 %v5443_v34, %v3448_v23  ;;  %v4934_v1 = vmul.f32 -1.442695, %v3245_v38  ;;  %v8709_v23 = vld [vmem:[#allocation73_spill] sm:$0xff] }
 0x310   :  { %v5447_v32 = vpop.eup %5446  ;;  %v7941_v55 = vadd.f32 1.0, %v5445_v62  ;;  %v2083_v63 = vadd.f32 %v8709_v23, %v1909_v39  ;;  %v8711_v62 = vld [vmem:[#allocation127_spill] sm:$0xff] }
 0x311   :  { %v2899_v49 = vadd.f32 %v7898_v30, %v2725_v28  ;;  %v3453_v36 = vsel %vm3452_vm15, %v5443_v34, %v3449_v9  ;;  %v3461_v6 = vmul.f32 %v5447_v32, %v7924_v24  ;;  %5448 = vpow2.f32 %v4934_v1  ;;  %v8705_v34 = vld [vmem:[#allocation79_spill] sm:$0xff]  ;;  %v8712_v1 = vld [vmem:[#allocation77_spill] sm:$0xff] }
 0x312   :  { %v3458_v37 = vsel %vm3455_vm0, %v3457_v54, %v3453_v36  ;;  %5450 = vrcp.f32 %v7941_v55  ;;  %v3471_v30 = vand.u32 2147483648, %v7924_v24  ;;  %vm3466_vm1 = vweird.f32 %v5447_v32  ;;  %v8713_v54 = vld [vmem:[#allocation48_spill] sm:$0xff] }
 0x313   :  { %3662 = vst.msk [vmem:[#allocation3 + $0x38] sm:$0xff] %vm772_vm2, %v3458_v37  ;;  %v3462_v7 = vsub.f32 1.0, %v3461_v6  ;;  %v3221_v47 = vadd.f32 %v7737_v60, %v2899_v49  ;;  %v1255_v45 = vadd.f32 %v8705_v34, %v8704_v33  ;;  %vm3467_vm4 = vmor %vm3465_vm3, %vm3466_vm1  ;;  %v2869_v12 = vpop.f32.mrf.mxu0  ;;  %v3484_v28 = vand.u32 2147483647, %v7941_v55 }
 0x314   :  { %v2368_v43 = vpop.f32.mrf.mxu2  ;;  %v3472_v46 = vor.u32 1.1754944e-38, %v3471_v30  ;;  %v1257_v9 = vadd.f32 %v8711_v62, %v8710_v21  ;;  %vm3480_vm7 = vweird.f32 %v7941_v55 }
 0x315   :  { %v2404_v42 = vadd.f32 %v2368_v43, %v2082_v51  ;;  %v3463_v4 = vmul.f32 %v5447_v32, %v3462_v7  ;;  %v3246_v52 = vadd.f32 %v7731_v19, %v3221_v47  ;;  %v1588_v59 = vadd.f32 %v8708_v35, %v1255_v45  ;;  %v8714_v47 = vld [vmem:[#allocation43_spill] sm:$0xff] }
 0x316   :  { %vm3485_vm10 = vcmp.eq.f32.partialorder %v3484_v28, 8.507059e+37  ;;  %v1589_v43 = vadd.f32 %v8714_v47, %v1257_v9 }
 0x317   :  { %v2726_v27 = vadd.f32 %v8706_v5, %v2404_v42  ;;  %v5449_v25 = vpop.eup %5448  ;;  %v3464_v48 = vadd.f32 %v5447_v32, %v3463_v4  ;;  %v4935_v60 = vmul.f32 -1.442695, %v3246_v52  ;;  %v1910_v49 = vadd.f32 %v8713_v54, %v1588_v59  ;;  %v8715_v42 = vld [vmem:[#allocation42_spill] sm:$0xff] }
 0x318   :  { %v5451_v22 = vpop.eup %5450  ;;  %v7958_v11 = vadd.f32 1.0, %v5449_v25  ;;  %v8718_v25 = vld [vmem:[#allocation126_spill] sm:$0xff] }
 0x319   :  { %v2900_v31 = vadd.f32 %v2864_v8, %v2726_v27  ;;  %v3468_v13 = vsel %vm3467_vm4, %v5447_v32, %v3464_v48  ;;  %v3476_v61 = vmul.f32 %v5451_v22, %v7941_v55  ;;  %5452 = vpow2.f32 %v4935_v60  ;;  %v8716_v27 = vld [vmem:[#allocation115_spill] sm:$0xff]  ;;  %v8719_v60 = vld [vmem:[#allocation122_spill] sm:$0xff] }
 0x31a   :  { %v3473_v14 = vsel %vm3470_vm5, %v3472_v46, %v3468_v13  ;;  %5454 = vrcp.f32 %v7958_v11  ;;  %v3486_v8 = vand.u32 2147483648, %v7941_v55  ;;  %vm3481_vm6 = vweird.f32 %v5451_v22 }
 0x31b   :  { %3663 = vst.msk [vmem:[#allocation3 + $0x40] sm:$0xff] %vm772_vm2, %v3473_v14  ;;  %v3477_v24 = vsub.f32 1.0, %v3476_v61  ;;  %v3222_v38 = vadd.f32 %v7751_v26, %v2900_v31  ;;  %vm3482_vm9 = vmor %vm3480_vm7, %vm3481_vm6  ;;  %v2084_v4 = vadd.f32 %v8715_v42, %v1910_v49  ;;  %v3499_v45 = vand.u32 2147483647, %v7958_v11  ;;  %v2871_v31 = vpop.f32.mrf.mxu0  ;;  %v8724_v49 = vld [vmem:[#allocation87_spill] sm:$0xff] }
 0x31c   :  { %v2370_v53 = vpop.f32.mrf.mxu2  ;;  %v3487_v56 = vor.u32 1.1754944e-38, %v3486_v8  ;;  %v1260_v39 = vadd.f32 %v8717_v50, %v8716_v27  ;;  %vm3495_vm12 = vweird.f32 %v7958_v11  ;;  %v8721_v8 = vld [vmem:[#allocation83_spill] sm:$0xff] }
 0x31d   :  { %v2405_v40 = vadd.f32 %v2370_v53, %v2083_v63  ;;  %v3478_v29 = vmul.f32 %v5451_v22, %v3477_v24  ;;  %v3247_v10 = vadd.f32 %v7731_v19, %v3222_v38  ;;  %vm3500_vm14 = vcmp.eq.f32.partialorder %v3499_v45, 8.507059e+37  ;;  %v8720_v24 = vld [vmem:[#allocation117_spill] sm:$0xff] }
 0x31e   :  { %v1590_v38 = vadd.f32 %v8720_v24, %v1260_v39 }
 0x31f   :  { %v2727_v32 = vadd.f32 %v8712_v1, %v2405_v40  ;;  %v5453_v36 = vpop.eup %5452  ;;  %v3479_v26 = vadd.f32 %v5451_v22, %v3478_v29  ;;  %v4936_v6 = vmul.f32 -1.442695, %v3247_v10  ;;  %v8722_v1 = vld [vmem:[#allocation45_spill] sm:$0xff] }
 0x320   :  { %v5455_v0 = vpop.eup %5454  ;;  %v7974_v37 = vadd.f32 1.0, %v5453_v36 }
 0x321   :  { %v2901_v17 = vadd.f32 %v2866_v20, %v2727_v32  ;;  %v3483_v51 = vsel %vm3482_vm9, %v5451_v22, %v3479_v26  ;;  %v3491_v7 = vmul.f32 %v5455_v0, %v7958_v11  ;;  %5456 = vpow2.f32 %v4936_v6  ;;  %v8723_v32 = vld [vmem:[#allocation129_spill] sm:$0xff]  ;;  %v8725_v26 = vld [vmem:[#allocation47_spill] sm:$0xff] }
 0x322   :  { %v3488_v30 = vsel %vm3485_vm10, %v3487_v56, %v3483_v51  ;;  %5458 = vrcp.f32 %v7974_v37  ;;  %v3501_v20 = vand.u32 2147483648, %v7958_v11  ;;  %vm3496_vm11 = vweird.f32 %v5455_v0 }
 0x323   :  { %3664 = vst.msk [vmem:[#allocation3 + $0x48] sm:$0xff] %vm772_vm2, %v3488_v30  ;;  %v3492_v55 = vsub.f32 1.0, %v3491_v7  ;;  %v3223_v41 = vadd.f32 %v7764_v58, %v2901_v17  ;;  %v1911_v22 = vadd.f32 %v8719_v60, %v1589_v43  ;;  %vm3497_vm13 = vmor %vm3495_vm12, %vm3496_vm11  ;;  %v3514_v62 = vand.u32 2147483647, %v7974_v37  ;;  %v2874_v43 = vpop.f32.mrf.mxu0 }
 0x324   :  { %v2373_v52 = vpop.f32.mrf.mxu2  ;;  %v3502_v35 = vor.u32 1.1754944e-38, %v3501_v20  ;;  %v1262_v54 = vadd.f32 %v8723_v32, %v8722_v1  ;;  %v1912_v6 = vadd.f32 %v8725_v26, %v1590_v38  ;;  %vm3510_vm0 = vweird.f32 %v7974_v37  ;;  %v8736_v26 = vld [vmem:[#allocation95_spill] sm:$0xff] }
 0x325   :  { %v2406_v33 = vadd.f32 %v2373_v52, %v2084_v4  ;;  %v3493_v34 = vmul.f32 %v5455_v0, %v3492_v55  ;;  %v3248_v5 = vadd.f32 %v7731_v19, %v3223_v41  ;;  %v2085_v40 = vadd.f32 %v8721_v8, %v1911_v22  ;;  %v8726_v4 = vld [vmem:[#allocation55_spill] sm:$0xff]  ;;  %v8727_v52 = vld [vmem:[#allocation125_spill] sm:$0xff]  ;;  %v8730_v22 = vld [vmem:[#allocation128_spill] sm:$0xff] }
 0x326   :  { %vm3515_vm3 = vcmp.eq.f32.partialorder %v3514_v62, 8.507059e+37  ;;  %v1591_v55 = vadd.f32 %v8726_v4, %v1262_v54  ;;  %v8734_v54 = vld [vmem:[#allocation40_spill] sm:$0xff] }
 0x327   :  { %v2728_v48 = vadd.f32 %v8718_v25, %v2406_v33  ;;  %v5457_v46 = vpop.eup %5456  ;;  %v3494_v58 = vadd.f32 %v5455_v0, %v3493_v34  ;;  %v4937_v13 = vmul.f32 -1.442695, %v3248_v5  ;;  %v8728_v25 = vld [vmem:[#allocation56_spill] sm:$0xff] }
 0x328   :  { %v5459_v61 = vpop.eup %5458  ;;  %v7990_v59 = vadd.f32 1.0, %v5457_v46  ;;  %v8738_v4 = vld [vmem:[#allocation120_spill] sm:$0xff] }
 0x329   :  { %v2902_v14 = vadd.f32 %v2869_v12, %v2728_v48  ;;  %v3498_v23 = vsel %vm3497_vm13, %v5455_v0, %v3494_v58  ;;  %v3506_v63 = vmul.f32 %v5459_v61, %v7974_v37  ;;  %5460 = vpow2.f32 %v4937_v13  ;;  %v8729_v48 = vld [vmem:[#allocation96_spill] sm:$0xff] }
 0x32a   :  { %v3503_v53 = vsel %vm3500_vm14, %v3502_v35, %v3498_v23  ;;  %5462 = vrcp.f32 %v7990_v59  ;;  %v3516_v12 = vand.u32 2147483648, %v7974_v37  ;;  %vm3511_vm15 = vweird.f32 %v5459_v61 }
 0x32b   :  { %3665 = vst.msk [vmem:[#allocation3 + $0x50] sm:$0xff] %vm772_vm2, %v3503_v53  ;;  %v3507_v11 = vsub.f32 1.0, %v3506_v63  ;;  %v3224_v29 = vadd.f32 %v7780_v3, %v2902_v14  ;;  %vm3512_vm1 = vmor %vm3510_vm0, %vm3511_vm15  ;;  %v2086_v37 = vadd.f32 %v8727_v52, %v1912_v6  ;;  %v3531_v45 = vand.u32 2147483648, %v7990_v59  ;;  %v8732_v53 = vld [vmem:[#allocation119_spill] sm:$0xff]  ;;  %v8739_v52 = vld [vmem:[#allocation53_spill] sm:$0xff] }
 0x32c   :  { %v2375_v28 = vpop.f32.mrf.mxu2  ;;  %v3517_v51 = vor.u32 1.1754944e-38, %v3516_v12  ;;  %v3529_v50 = vand.u32 2147483647, %v7990_v59  ;;  %v1265_v60 = vadd.f32 %v8729_v48, %v8728_v25  ;;  %vm3525_vm5 = vweird.f32 %v7990_v59  ;;  %v8740_v48 = vld [vmem:[#allocation121_spill] sm:$0xff] }
 0x32d   :  { %v2407_v10 = vadd.f32 %v2375_v28, %v2085_v40  ;;  %v3508_v21 = vmul.f32 %v5459_v61, %v3507_v11  ;;  %v3249_v9 = vadd.f32 %v7731_v19, %v3224_v29  ;;  %v3532_v14 = vor.u32 1.1754944e-38, %v3531_v45  ;;  %v8733_v11 = vld [vmem:[#allocation52_spill] sm:$0xff] }
 0x32e   :  { %vm3530_vm7 = vcmp.eq.f32.partialorder %v3529_v50, 8.507059e+37  ;;  %v1592_v8 = vadd.f32 %v8732_v53, %v1265_v60  ;;  %v8741_v60 = vld [vmem:[#allocation104_spill] sm:$0xff] }
 0x32f   :  { %v2729_v36 = vadd.f32 %v8724_v49, %v2407_v10  ;;  %v5461_v0 = vpop.eup %5460  ;;  %v3509_v56 = vadd.f32 %v5459_v61, %v3508_v21  ;;  %v4938_v3 = vmul.f32 -1.442695, %v3249_v9  ;;  %v8735_v49 = vld [vmem:[#allocation131_spill] sm:$0xff] }
 0x330   :  { %v5463_v17 = vpop.eup %5462  ;;  %v8006_v7 = vadd.f32 1.0, %v5461_v0  ;;  %v8737_v0 = vld [vmem:[#allocation49_spill] sm:$0xff] }
 0x331   :  { %v2903_v47 = vadd.f32 %v2871_v31, %v2729_v36  ;;  %v3513_v30 = vsel %vm3512_vm1, %v5459_v61, %v3509_v56  ;;  %v3521_v42 = vmul.f32 %v5463_v17, %v7990_v59  ;;  %5464 = vpow2.f32 %v4938_v3  ;;  %v8731_v31 = vld [vmem:[#allocation66_spill] sm:$0xff]  ;;  %v2876_v59 = vpop.f32.mrf.mxu0 }
 0x332   :  { %v3518_v41 = vsel %vm3515_vm3, %v3517_v51, %v3513_v30  ;;  %5466 = vrcp.f32 %v8006_v7  ;;  %vm3526_vm4 = vweird.f32 %v5463_v17  ;;  %v1913_v58 = vadd.f32 %v8731_v31, %v1591_v55 }
 0x333   :  { %3666 = vst.msk [vmem:[#allocation3 + $0x58] sm:$0xff] %vm772_vm2, %v3518_v41  ;;  %v3522_v20 = vsub.f32 1.0, %v3521_v42  ;;  %v3225_v33 = vadd.f32 %v7803_v44, %v2903_v47  ;;  %vm3527_vm6 = vmor %vm3525_vm5, %vm3526_vm4  ;;  %v3546_v21 = vand.u32 2147483648, %v8006_v7  ;;  %v3544_v1 = vand.u32 2147483647, %v8006_v7 }
 0x334   :  { %v2378_v34 = vpop.f32.mrf.mxu2  ;;  %v2087_v29 = vadd.f32 %v8733_v11, %v1913_v58  ;;  %v1267_v36 = vadd.f32 %v8735_v49, %v8734_v54  ;;  %v1914_v56 = vadd.f32 %v8737_v0, %v1592_v8  ;;  %vm3540_vm10 = vweird.f32 %v8006_v7  ;;  %v8743_v58 = vld [vmem:[#allocation74_spill] sm:$0xff]  ;;  %v8744_v8 = vld [vmem:[#allocation123_spill] sm:$0xff] }
 0x335   :  { %v2408_v5 = vadd.f32 %v2378_v34, %v2086_v37  ;;  %v3523_v27 = vmul.f32 %v5463_v17, %v3522_v20  ;;  %v3250_v39 = vadd.f32 %v7731_v19, %v3225_v33  ;;  %v3547_v47 = vor.u32 1.1754944e-38, %v3546_v21  ;;  %v8746_v54 = vld [vmem:[#allocation103_spill] sm:$0xff] }
 0x336   :  { %vm3545_vm12 = vcmp.eq.f32.partialorder %v3544_v1, 8.507059e+37  ;;  %v1593_v55 = vadd.f32 %v8738_v4, %v1267_v36  ;;  %v2088_v37 = vadd.f32 %v8739_v52, %v1914_v56  ;;  %v8747_v36 = vld [vmem:[#allocation124_spill] sm:$0xff] }
 0x337   :  { %v2730_v46 = vadd.f32 %v8730_v22, %v2408_v5  ;;  %v5465_v13 = vpop.eup %5464  ;;  %v3524_v61 = vadd.f32 %v5463_v17, %v3523_v27  ;;  %v4939_v44 = vmul.f32 -1.442695, %v3250_v39  ;;  %v8048_v39 = vld [vmem:[#allocation14] ss:$0 sm:$0xff]  ;;  %v1270_v22 = vadd.f32 %v8741_v60, %v8740_v48 }
 0x338   :  { %v5467_v35 = vpop.eup %5466  ;;  %v8022_v23 = vadd.f32 1.0, %v5465_v13 }
 0x339   :  { %v2904_v63 = vadd.f32 %v2874_v43, %v2730_v46  ;;  %v3528_v24 = vsel %vm3527_vm6, %v5463_v17, %v3524_v61  ;;  %v3536_v38 = vmul.f32 %v5467_v35, %v8006_v7  ;;  %5468 = vpow2.f32 %v4939_v44  ;;  %v2879_v33 = vpop.f32.mrf.mxu0  ;;  %v8742_v46 = vld [vmem:[#allocation130_spill] sm:$0xff] }
 0x33a   :  { %v3533_v40 = vsel %vm3530_vm7, %v3532_v14, %v3528_v24  ;;  %5470 = vrcp.f32 %v8022_v23  ;;  %vm3541_vm9 = vweird.f32 %v5467_v35  ;;  %v3561_v45 = vand.u32 2147483648, %v8022_v23 }
 0x33b   :  { %3667 = vst.msk [vmem:[#allocation3 + $0x60] sm:$0xff] %vm772_vm2, %v3533_v40  ;;  %v3537_v28 = vsub.f32 1.0, %v3536_v38  ;;  %v3226_v12 = vadd.f32 %v7824_v18, %v2904_v63  ;;  %vm3542_vm11 = vmor %vm3540_vm10, %vm3541_vm9  ;;  %v3559_v50 = vand.u32 2147483647, %v8022_v23  ;;  %vm3555_vm14 = vweird.f32 %v8022_v23 }
 0x33c   :  { %v2380_v10 = vpop.f32.mrf.mxu2  ;;  %v3562_v14 = vor.u32 1.1754944e-38, %v3561_v45  ;;  %v1594_v40 = vadd.f32 %v8744_v8, %v1270_v22 }
 0x33d   :  { %v2409_v62 = vadd.f32 %v2380_v10, %v2087_v29  ;;  %v3538_v9 = vmul.f32 %v5467_v35, %v3537_v28  ;;  %v3251_v32 = vadd.f32 %v7731_v19, %v3226_v12  ;;  %vm3560_vm0 = vcmp.eq.f32.partialorder %v3559_v50, 8.507059e+37  ;;  %v8745_v29 = vld [vmem:[#allocation58_spill] sm:$0xff] }
 0x33f   :  { %v2731_v6 = vadd.f32 %v8736_v26, %v2409_v62  ;;  %v5469_v3 = vpop.eup %5468  ;;  %v3539_v17 = vadd.f32 %v5467_v35, %v3538_v9  ;;  %v4940_v18 = vmul.f32 -1.442695, %v3251_v32  ;;  %v1916_v26 = vadd.f32 %v8747_v36, %v1594_v40 }
 0x340   :  { %v5471_v51 = vpop.eup %5470  ;;  %v8038_v43 = vadd.f32 1.0, %v5469_v3 }
 0x341   :  { %v2905_v30 = vadd.f32 %v2876_v59, %v2731_v6  ;;  %v3543_v42 = vsel %vm3542_vm11, %v5467_v35, %v3539_v17  ;;  %v3551_v19 = vmul.f32 %v5471_v51, %v8022_v23  ;;  %5472 = vpow2.f32 %v4940_v18  ;;  %v2881_v12 = vpop.f32.mrf.mxu0 }
 0x342   :  { %v3548_v41 = vsel %vm3545_vm12, %v3547_v47, %v3543_v42  ;;  %5474 = vrcp.f32 %v8038_v43  ;;  %vm3556_vm13 = vweird.f32 %v5471_v51  ;;  %v3576_v21 = vand.u32 2147483648, %v8038_v43  ;;  %v8748_v42 = vld [vmem:[#allocation59_spill] sm:$0xff] }
 0x343   :  { %3668 = vst.msk [vmem:[#allocation3 + $0x68] sm:$0xff] %vm772_vm2, %v3548_v41  ;;  %v3552_v7 = vsub.f32 1.0, %v3551_v19  ;;  %v3227_v20 = vadd.f32 %v7845_v2, %v2905_v30  ;;  %v1915_v2 = vadd.f32 %v8743_v58, %v1593_v55  ;;  %vm3557_vm15 = vmor %vm3555_vm14, %vm3556_vm13  ;;  %v3574_v1 = vand.u32 2147483647, %v8038_v43 }
 0x344   :  { %v2383_v34 = vpop.f32.mrf.mxu2  ;;  %vm3570_vm3 = vweird.f32 %v8038_v43  ;;  %v3577_v3 = vor.u32 1.1754944e-38, %v3576_v21  ;;  %v2090_v19 = vadd.f32 %v8748_v42, %v1916_v26 }
 0x345   :  { %v2410_v5 = vadd.f32 %v2383_v34, %v2088_v37  ;;  %v3553_v27 = vmul.f32 %v5471_v51, %v3552_v7  ;;  %v3252_v25 = vadd.f32 %v8048_v39, %v3227_v20  ;;  %v2089_v59 = vadd.f32 %v8745_v29, %v1915_v2  ;;  %v8749_v34 = vld [vmem:[#allocation54_spill] sm:$0xff] }
 0x346   :  { %vm3575_vm5 = vcmp.eq.f32.partialorder %v3574_v1, 8.507059e+37 }
 0x347   :  { %v2732_v31 = vadd.f32 %v8742_v46, %v2410_v5  ;;  %v5473_v13 = vpop.eup %5472  ;;  %v3554_v61 = vadd.f32 %v5471_v51, %v3553_v27  ;;  %v4941_v44 = vmul.f32 -1.442695, %v3252_v25 }
 0x348   :  { %v5475_v35 = vpop.eup %5474  ;;  %v3335_v63 = vadd.f32 1.0, %v5473_v13 }
 0x349   :  { %v2906_v24 = vadd.f32 %v2879_v33, %v2732_v31  ;;  %v3558_v38 = vsel %vm3557_vm15, %v5471_v51, %v3554_v61  ;;  %v3566_v53 = vmul.f32 %v5475_v35, %v8038_v43  ;;  %5476 = vpow2.f32 %v4941_v44  ;;  %v2884_v43 = vpop.f32.mrf.mxu0 }
 0x34a   :  { %v3563_v11 = vsel %vm3560_vm0, %v3562_v14, %v3558_v38  ;;  %5478 = vrcp.f32 %v3335_v63  ;;  %vm3571_vm1 = vweird.f32 %v5475_v35  ;;  %v3591_v52 = vand.u32 2147483648, %v3335_v63 }
 0x34b   :  { %3669 = vst.msk [vmem:[#allocation3 + $0x70] sm:$0xff] %vm772_vm2, %v3563_v11  ;;  %v3567_v23 = vsub.f32 1.0, %v3566_v53  ;;  %v3228_v28 = vadd.f32 %v7862_v57, %v2906_v24  ;;  %vm3572_vm4 = vmor %vm3570_vm3, %vm3571_vm1  ;;  %v3589_v20 = vand.u32 2147483647, %v3335_v63  ;;  %vm3585_vm7 = vweird.f32 %v3335_v63 }
 0x34c   :  { %v2385_v10 = vpop.f32.mrf.mxu2  ;;  %v3592_v48 = vor.u32 1.1754944e-38, %v3591_v52 }
 0x34d   :  { %v2411_v62 = vadd.f32 %v2385_v10, %v2089_v59  ;;  %v3568_v9 = vmul.f32 %v5475_v35, %v3567_v23  ;;  %v3253_v32 = vadd.f32 %v8048_v39, %v3228_v28  ;;  %vm3590_vm10 = vcmp.eq.f32.partialorder %v3589_v20, 8.507059e+37 }
 0x34f   :  { %v2733_v49 = vadd.f32 %v8746_v54, %v2411_v62  ;;  %v5477_v6 = vpop.eup %5476  ;;  %v3569_v0 = vadd.f32 %v5475_v35, %v3568_v9  ;;  %v4942_v57 = vmul.f32 -1.442695, %v3253_v32 }
 0x350   :  { %v5479_v56 = vpop.eup %5478  ;;  %v3336_v17 = vadd.f32 1.0, %v5477_v6 }
 0x351   :  { %v2907_v18 = vadd.f32 %v2881_v12, %v2733_v49  ;;  %v3573_v51 = vsel %vm3572_vm4, %v5475_v35, %v3569_v0  ;;  %v3581_v47 = vmul.f32 %v5479_v56, %v3335_v63  ;;  %5480 = vpow2.f32 %v4942_v57  ;;  %v2886_v13 = vpop.f32.mrf.mxu0 }
 0x352   :  { %v3578_v30 = vsel %vm3575_vm5, %v3577_v3, %v3573_v51  ;;  %5482 = vrcp.f32 %v3336_v17  ;;  %vm3586_vm6 = vweird.f32 %v5479_v56  ;;  %v3606_v44 = vand.u32 2147483648, %v3336_v17 }
 0x353   :  { %3670 = vst.msk [vmem:[#allocation3 + $0x78] sm:$0xff] %vm772_vm2, %v3578_v30  ;;  %v3582_v4 = vsub.f32 1.0, %v3581_v47  ;;  %v3229_v55 = vadd.f32 %v7883_v15, %v2907_v18  ;;  %vm3587_vm9 = vmor %vm3585_vm7, %vm3586_vm6  ;;  %v3604_v14 = vand.u32 2147483647, %v3336_v17  ;;  %vm3600_vm12 = vweird.f32 %v3336_v17 }
 0x354   :  { %v2388_v41 = vpop.f32.mrf.mxu2  ;;  %v3607_v40 = vor.u32 1.1754944e-38, %v3606_v44 }
 0x355   :  { %v2412_v37 = vadd.f32 %v2388_v41, %v2090_v19  ;;  %v3583_v7 = vmul.f32 %v5479_v56, %v3582_v4  ;;  %v3254_v33 = vadd.f32 %v8048_v39, %v3229_v55  ;;  %vm3605_vm14 = vcmp.eq.f32.partialorder %v3604_v14, 8.507059e+37 }
 0x357   :  { %v2734_v45 = vadd.f32 %v8749_v34, %v2412_v37  ;;  %v5481_v5 = vpop.eup %5480  ;;  %v3584_v27 = vadd.f32 %v5479_v56, %v3583_v7  ;;  %v4943_v50 = vmul.f32 -1.442695, %v3254_v33 }
 0x358   :  { %v5483_v25 = vpop.eup %5482  ;;  %v3337_v60 = vadd.f32 1.0, %v5481_v5 }
 0x359   :  { %v2908_v15 = vadd.f32 %v2884_v43, %v2734_v45  ;;  %v3588_v22 = vsel %vm3587_vm9, %v5479_v56, %v3584_v27  ;;  %v3596_v46 = vmul.f32 %v5483_v25, %v3336_v17  ;;  %5484 = vpow2.f32 %v4943_v50 }
 0x35a   :  { %v3593_v31 = vsel %vm3590_vm10, %v3592_v48, %v3588_v22  ;;  %5486 = vrcp.f32 %v3337_v60  ;;  %vm3601_vm11 = vweird.f32 %v5483_v25  ;;  %v3621_v28 = vand.u32 2147483648, %v3337_v60 }
 0x35b   :  { %3671 = vst.msk [vmem:[#allocation3 + $0x80] sm:$0xff] %vm772_vm2, %v3593_v31  ;;  %v3597_v58 = vsub.f32 1.0, %v3596_v46  ;;  %v3230_v2 = vadd.f32 %v7914_v16, %v2908_v15  ;;  %vm3602_vm13 = vmor %vm3600_vm12, %vm3601_vm11  ;;  %vm3615_vm0 = vweird.f32 %v3337_v60 }
 0x35c   :  { %v2390_v61 = vpop.f32.mrf.mxu2  ;;  %v3622_v9 = vor.u32 1.1754944e-38, %v3621_v28 }
 0x35d   :  { %v3598_v35 = vmul.f32 %v5483_v25, %v3597_v58  ;;  %v3255_v63 = vadd.f32 %v8048_v39, %v3230_v2  ;;  %v3619_v39 = vand.u32 2147483647, %v3337_v60 }
 0x35f   :  { %v5485_v24 = vpop.eup %5484  ;;  %v3599_v38 = vadd.f32 %v5483_v25, %v3598_v35  ;;  %v4944_v53 = vmul.f32 -1.442695, %v3255_v63  ;;  %vm3620_vm3 = vcmp.eq.f32.partialorder %v3619_v39, 8.507059e+37 }
 0x360   :  { %v5487_v8 = vpop.eup %5486  ;;  %v3338_v11 = vadd.f32 1.0, %v5485_v24 }
 0x361   :  { %v3603_v29 = vsel %vm3602_vm13, %v5483_v25, %v3599_v38  ;;  %v3611_v59 = vmul.f32 %v5487_v8, %v3337_v60  ;;  %5488 = vpow2.f32 %v4944_v53  ;;  %vm3616_vm15 = vweird.f32 %v5487_v8 }
 0x362   :  { %v3608_v16 = vsel %vm3605_vm14, %v3607_v40, %v3603_v29  ;;  %5490 = vrcp.f32 %v3338_v11  ;;  %vm3617_vm1 = vmor %vm3615_vm0, %vm3616_vm15  ;;  %v3636_v26 = vand.u32 2147483648, %v3338_v11  ;;  %v3634_v0 = vand.u32 2147483647, %v3338_v11 }
 0x363   :  { %3672 = vst.msk [vmem:[#allocation3 + $0x88] sm:$0xff] %vm772_vm2, %v3608_v16  ;;  %v3612_v23 = vsub.f32 1.0, %v3611_v59  ;;  %vm3630_vm5 = vweird.f32 %v3338_v11 }
 0x364   :  { %v3637_v3 = vor.u32 1.1754944e-38, %v3636_v26  ;;  %vm3635_vm7 = vcmp.eq.f32.partialorder %v3634_v0, 8.507059e+37 }
 0x365   :  { %v3613_v12 = vmul.f32 %v5487_v8, %v3612_v23 }
 0x367   :  { %v5489_v10 = vpop.eup %5488  ;;  %v3614_v21 = vadd.f32 %v5487_v8, %v3613_v12 }
 0x368   :  { %v5491_v62 = vpop.eup %5490  ;;  %v3339_v1 = vadd.f32 1.0, %v5489_v10 }
 0x369   :  { %v3618_v32 = vsel %vm3617_vm1, %v5487_v8, %v3614_v21  ;;  %v3626_v54 = vmul.f32 %v5491_v62, %v3338_v11  ;;  %vm3631_vm4 = vweird.f32 %v5491_v62 }
 0x36a   :  { %v3623_v49 = vsel %vm3620_vm3, %v3622_v9, %v3618_v32  ;;  %5492 = vrcp.f32 %v3339_v1  ;;  %vm3632_vm6 = vmor %vm3630_vm5, %vm3631_vm4  ;;  %v3651_v30 = vand.u32 2147483648, %v3339_v1  ;;  %v3649_v19 = vand.u32 2147483647, %v3339_v1 }
 0x36b   :  { %3673 = vst.msk [vmem:[#allocation3 + $0x90] sm:$0xff] %vm772_vm2, %v3623_v49  ;;  %v3627_v36 = vsub.f32 1.0, %v3626_v54  ;;  %vm3645_vm10 = vweird.f32 %v3339_v1 }
 0x36c   :  { %v3652_v55 = vor.u32 1.1754944e-38, %v3651_v30  ;;  %vm3650_vm12 = vcmp.eq.f32.partialorder %v3649_v19, 8.507059e+37 }
 0x36d   :  { %v3628_v6 = vmul.f32 %v5491_v62, %v3627_v36 }
 0x36f   :  { %v3629_v57 = vadd.f32 %v5491_v62, %v3628_v6 }
 0x370   :  { %v5493_v56 = vpop.eup %5492 }
 0x371   :  { %v3633_v17 = vsel %vm3632_vm6, %v5491_v62, %v3629_v57  ;;  %v3641_v18 = vmul.f32 %v5493_v56, %v3339_v1  ;;  %vm3646_vm9 = vweird.f32 %v5493_v56 }
 0x372   :  { %v3638_v51 = vsel %vm3635_vm7, %v3637_v3, %v3633_v17  ;;  %vm3647_vm11 = vmor %vm3645_vm10, %vm3646_vm9 }
 0x373   :  { %3674 = vst.msk [vmem:[#allocation3 + $0x98] sm:$0xff] %vm772_vm2, %v3638_v51  ;;  %v3642_v47 = vsub.f32 1.0, %v3641_v18 }
 0x375   :  { %v3643_v42 = vmul.f32 %v5493_v56, %v3642_v47 }
 0x377   :  { %v3644_v4 = vadd.f32 %v5493_v56, %v3643_v42 }
 0x379   :  { %v3648_v43 = vsel %vm3647_vm11, %v5493_v56, %v3644_v4 }
 0x37a   :  { %v3653_v41 = vsel %vm3650_vm12, %v3652_v55, %v3648_v43 }
 0x37b   :  { %3675 = vst.msk [vmem:[#allocation3 + $0xa0] sm:$0x3] %vm798_vm8, %v3653_v41 }
 0x37c   :  { %5877 = dma.done.wait [#allocation5], 20736 }
 0x37d   :  { %5878 = vsyncadd [#allocation5], 4294946560  ;;  %v8079_v52 = vmov 0.0   ;;  %v8081_v37 = vmov 0.0   ;;  %v8083_v7 = vmov 0.0   ;;  %v8085_v20 = vmov 0.0  }
 0x37e   :  { %s8087_s4 = smov 0  }
 0x37f LB: > { %s3694_s17 = smul.u32 48, %s5903_s4  ;;  %s4945_s21 = sshll.u32 %s5903_s4, 1  ;;  %s5903_s4 = sphi %s8087_s4, %s3685_s4   ;;  %v5899_v20 = vphi %v8085_v20, %v8753_v20   ;;  %v5895_v7 = vphi %v8083_v7, %v8752_v7   ;;  %v5891_v37 = vphi %v8081_v37, %v8751_v37   ;;  %v5887_v52 = vphi %v8079_v52, %v8750_v52  }
 0x380   : > { %s3691_s22 = scalar_lea.vmem [#allocation3], %s4945_s21  ;;  %s3685_s4 = sadd.s32 1, %s5903_s4  }
 0x381   : > { %s3695_s18 = sshra.s32 %s3694_s17, 3  ;;  %p3682_p0 = scmp.ge.s32.totalorder %s3685_s4, 27  }
 0x382   : > { %s5143_s19 = sshll.u32 %s3695_s18, 3  ;;  %v3692_v42 = vld [vmem:[%s3691_s22] sm:$0x3] }
 0x383   : > { %s8105_s20 = scalar_lea.vmem [#allocation4], %s5143_s19 }
 0x384   : > { %v3704_v33 = vld [vmem:[%s8105_s20 + $0x20] sm:$0xff]  ;;  %v3705_v34 = vld [vmem:[%s8105_s20 + $0x28] sm:$0xff]  ;;  %v3702_v22 = vld [vmem:[%s8105_s20 + $0x10] sm:$0xff] }
 0x385   : > { %v3722_v45 = vunpack.c.0.s8 %v3704_v33  ;;  %v3726_v5 = vunpack.c.0.s8 %v3705_v34  ;;  %v3723_v27 = vunpack.c.1.s8 %v3704_v33  ;;  %v3727_v50 = vunpack.c.1.s8 %v3705_v34  ;;  %v3703_v46 = vld [vmem:[%s8105_s20 + $0x18] sm:$0xff]  ;;  %v3700_v59 = vld [vmem:[%s8105_s20] sm:$0xff]  ;;  %v3701_v39 = vld [vmem:[%s8105_s20 + $0x8] sm:$0xff] }
 0x386   : > { %v3724_v25 = vunpack.c.2.s8 %v3704_v33  ;;  %v3728_v48 = vunpack.c.2.s8 %v3705_v34  ;;  %v3725_v60 = vunpack.c.3.s8 %v3704_v33  ;;  %v3729_v15 = vunpack.c.3.s8 %v3705_v34 }
 0x387   : > { %v3746_v31 = vcvt.s32.f32 %v3722_v45  ;;  %v3750_v58 = vcvt.s32.f32 %v3726_v5  ;;  %v3747_v2 = vcvt.s32.f32 %v3723_v27  ;;  %v3751_v13 = vcvt.s32.f32 %v3727_v50 }
 0x388   : > { %v3748_v61 = vcvt.s32.f32 %v3724_v25  ;;  %v3752_v44 = vcvt.s32.f32 %v3728_v48  ;;  %v3749_v35 = vcvt.s32.f32 %v3725_v60  ;;  %v3753_v14 = vcvt.s32.f32 %v3729_v15 }
 0x389   : > { %v3762_v63 = vpack.c.bf16 %v3750_v58, %v3746_v31  ;;  %v3763_v24 = vpack.c.bf16 %v3751_v13, %v3747_v2  ;;  %v3714_v38 = vunpack.c.0.s8 %v3702_v22  ;;  %v3718_v53 = vunpack.c.0.s8 %v3703_v46 }
 0x38a   : > { %v3764_v8 = vpack.c.bf16 %v3752_v44, %v3748_v61  ;;  %v3765_v40 = vpack.c.bf16 %v3753_v14, %v3749_v35  ;;  %v3715_v11 = vunpack.c.1.s8 %v3702_v22  ;;  %v3719_v29 = vunpack.c.1.s8 %v3703_v46 }
 0x38b   : > { %3774 = vmatpush.bf16.msra.mxu0 %v3762_v63  ;;  %3787 = vmatpush.bf16.msra.mxu1 %v3763_v24  ;;  %v3738_v16 = vcvt.s32.f32 %v3714_v38  ;;  %v3742_v23 = vcvt.s32.f32 %v3718_v53  ;;  %v3716_v28 = vunpack.c.2.s8 %v3702_v22  ;;  %v3720_v12 = vunpack.c.2.s8 %v3703_v46 }
 0x38c   : > { %3800 = vmatpush.bf16.msra.mxu2 %v3764_v8  ;;  %3813 = vmatpush.bf16.msra.mxu3 %v3765_v40  ;;  %v3739_v10 = vcvt.s32.f32 %v3715_v11  ;;  %v3743_v21 = vcvt.s32.f32 %v3719_v29  ;;  %v3717_v62 = vunpack.c.3.s8 %v3702_v22  ;;  %v3721_v9 = vunpack.c.3.s8 %v3703_v46 }
 0x38d   : > { %v3758_v1 = vpack.c.bf16 %v3742_v23, %v3738_v16  ;;  %v3740_v32 = vcvt.s32.f32 %v3716_v28  ;;  %v3744_v54 = vcvt.s32.f32 %v3720_v12  ;;  %v3706_v49 = vunpack.c.0.s8 %v3700_v59 }
 0x38e   : > { %v3759_v36 = vpack.c.bf16 %v3743_v21, %v3739_v10  ;;  %v3741_v26 = vcvt.s32.f32 %v3717_v62  ;;  %v3745_v6 = vcvt.s32.f32 %v3721_v9  ;;  %v3710_v0 = vunpack.c.0.s8 %v3701_v39 }
 0x38f   : > { %3775 = vmatpush.bf16.msra.mxu0 %v3758_v1  ;;  %v3760_v57 = vpack.c.bf16 %v3744_v54, %v3740_v32  ;;  %v3730_v56 = vcvt.s32.f32 %v3706_v49  ;;  %v3707_v3 = vunpack.c.1.s8 %v3700_v59  ;;  %v3711_v17 = vunpack.c.1.s8 %v3701_v39 }
 0x390   : > { %3788 = vmatpush.bf16.msra.mxu1 %v3759_v36  ;;  %v3761_v18 = vpack.c.bf16 %v3745_v6, %v3741_v26  ;;  %v3734_v51 = vcvt.s32.f32 %v3710_v0  ;;  %v3708_v47 = vunpack.c.2.s8 %v3700_v59  ;;  %v3712_v30 = vunpack.c.2.s8 %v3701_v39 }
 0x391   : > { %3801 = vmatpush.bf16.msra.mxu2 %v3760_v57  ;;  %v3731_v19 = vcvt.s32.f32 %v3707_v3  ;;  %v3735_v4 = vcvt.s32.f32 %v3711_v17  ;;  %v3709_v55 = vunpack.c.3.s8 %v3700_v59  ;;  %v3713_v43 = vunpack.c.3.s8 %v3701_v39 }
 0x392   : > { %3814 = vmatpush.bf16.msra.mxu3 %v3761_v18  ;;  %v3754_v41 = vpack.c.bf16 %v3734_v51, %v3730_v56  ;;  %v3732_v33 = vcvt.s32.f32 %v3708_v47  ;;  %v3736_v34 = vcvt.s32.f32 %v3712_v30  ;;  %v3693_v50 = vpack.c.bf16 %v3692_v42, %v3692_v42 }
 0x393   : > { %v3755_v45 = vpack.c.bf16 %v3735_v4, %v3731_v19  ;;  %v3733_v5 = vcvt.s32.f32 %v3709_v55  ;;  %v3737_v27 = vcvt.s32.f32 %v3713_v43 }
 0x394   : > { %3776 = vmatpush.bf16.msra.mxu0 %v3754_v41  ;;  %v3756_v25 = vpack.c.bf16 %v3736_v34, %v3732_v33 }
 0x395   : > { %3789 = vmatpush.bf16.msra.mxu1 %v3755_v45  ;;  %v3757_v48 = vpack.c.bf16 %v3737_v27, %v3733_v5 }
 0x396   : > { %3802 = vmatpush.bf16.msra.mxu2 %v3756_v25 }
 0x397   : > { %3815 = vmatpush.bf16.msra.mxu3 %v3757_v48  ;;  %4948 = vmatmul.msk.bf16.vlgmr.msra.gmra.mxu0 %vm772_vm2, %v3693_v50 }
 0x398   : > { %4949 = vmatmul.msk.bf16.vlgmr.msra.gmra.mxu1 %vm772_vm2, %v3693_v50 }
 0x399   : > { %4950 = vmatmul.msk.bf16.vlgmr.msra.gmra.mxu2 %vm772_vm2, %v3693_v50 }
 0x39a   : > { %4951 = vmatmul.msk.bf16.vlgmr.msra.gmra.mxu3 %vm772_vm2, %v3693_v50 }
 0x414   : > { %v3778_v60 = vpop.f32.mrf.mxu0 }
 0x415   : > { %v3821_v15 = vadd.f32 %v5899_v20, %v3778_v60   ;;  %v3791_v22 = vpop.f32.mrf.mxu1 }
 0x416   : > { %v3822_v46 = vadd.f32 %v5895_v7, %v3791_v22  }
 0x417   : > { %v8753_v20 = vmov %v3821_v15 }
 0x418   : > { %v8752_v7 = vmov %v3822_v46 }
 0x41c   : > { %v3804_v31 = vpop.f32.mrf.mxu2  ;;  %v3780_v58 = vpop.f32.mrf.mxu0 }
 0x41d   : > { %v3823_v2 = vadd.f32 %v5891_v37, %v3804_v31   ;;  %v3817_v13 = vpop.f32.mrf.mxu3  ;;  %v3793_v61 = vpop.f32.mrf.mxu1 }
 0x41e   : > { %v3824_v44 = vadd.f32 %v5887_v52, %v3817_v13  }
 0x41f   : > { %v8751_v37 = vmov %v3823_v2 }
 0x420   : > { %v8750_v52 = vmov %v3824_v44 }
 0x421   :  { %3684 = sbr.rel (!%p3682_p0) target bundleno = 895 (0x37f), region = 152 }
 0x424   : > { %v3806_v35 = vpop.f32.mrf.mxu2 }
 0x425   : > { %v3819_v14 = vpop.f32.mrf.mxu3 }
 0x426   :  { %5879 = dma.done.wait [#allocation5 + $0x1], 20736 }
 0x427   :  { %5880 = vsyncadd [#allocation5 + $0x1], 4294946560  ;;  %s8143_s7 = smov 0  }
 0x428 LB: > { %s3842_s23 = smul.u32 48, %s5923_s7  ;;  %s4952_s0 = sshll.u32 %s5923_s7, 1  ;;  %s5923_s7 = sphi %s8143_s7, %s3832_s7   ;;  %v5919_v15 = vphi %v3821_v15, %v8757_v15   ;;  %v5915_v46 = vphi %v3822_v46, %v8756_v46   ;;  %v5911_v2 = vphi %v3823_v2, %v8755_v2   ;;  %v5907_v44 = vphi %v3824_v44, %v8754_v44  }
 0x429   : > { %s4610_s1 = scalar_lea.vmem [#allocation3], %s4952_s0  ;;  %s3832_s7 = sadd.s32 1, %s5923_s7  }
 0x42a   : > { %s3843_s24 = sshra.s32 %s3842_s23, 3  ;;  %v4953_v31 = vld [vmem:[%s4610_s1 + $0x36] sm:$0x3]  ;;  %p3829_p1 = scmp.ge.s32.totalorder %s3832_s7, 27  }
 0x42b   : > { %s5144_s27 = sshll.u32 %s3843_s24, 3 }
 0x42c   : > { %s8161_s28 = scalar_lea.vmem [#allocation4], %s5144_s27 }
 0x42d   : > { %v4960_v52 = vld [vmem:[%s8161_s28 + $0x530] sm:$0xff]  ;;  %v4961_v37 = vld [vmem:[%s8161_s28 + $0x538] sm:$0xff]  ;;  %v4958_v11 = vld [vmem:[%s8161_s28 + $0x520] sm:$0xff] }
 0x42e   : > { %v3871_v7 = vunpack.c.0.s8 %v4960_v52  ;;  %v3875_v20 = vunpack.c.0.s8 %v4961_v37  ;;  %v3872_v63 = vunpack.c.1.s8 %v4960_v52  ;;  %v3876_v24 = vunpack.c.1.s8 %v4961_v37  ;;  %v4959_v29 = vld [vmem:[%s8161_s28 + $0x528] sm:$0xff]  ;;  %v4956_v6 = vld [vmem:[%s8161_s28 + $0x510] sm:$0xff]  ;;  %v4957_v17 = vld [vmem:[%s8161_s28 + $0x518] sm:$0xff] }
 0x42f   : > { %v3873_v38 = vunpack.c.2.s8 %v4960_v52  ;;  %v3877_v53 = vunpack.c.2.s8 %v4961_v37  ;;  %v3874_v8 = vunpack.c.3.s8 %v4960_v52  ;;  %v3878_v40 = vunpack.c.3.s8 %v4961_v37 }
 0x430   : > { %v3895_v59 = vcvt.s32.f32 %v3871_v7  ;;  %v3899_v16 = vcvt.s32.f32 %v3875_v20  ;;  %v3896_v23 = vcvt.s32.f32 %v3872_v63  ;;  %v3900_v28 = vcvt.s32.f32 %v3876_v24 }
 0x431   : > { %v3897_v12 = vcvt.s32.f32 %v3873_v38  ;;  %v3901_v39 = vcvt.s32.f32 %v3877_v53  ;;  %v3898_v10 = vcvt.s32.f32 %v3874_v8  ;;  %v3902_v21 = vcvt.s32.f32 %v3878_v40 }
 0x432   : > { %v3911_v62 = vpack.c.bf16 %v3899_v16, %v3895_v59  ;;  %v3912_v9 = vpack.c.bf16 %v3900_v28, %v3896_v23  ;;  %v3863_v1 = vunpack.c.0.s8 %v4958_v11  ;;  %v3867_v32 = vunpack.c.0.s8 %v4959_v29 }
 0x433   : > { %v3913_v54 = vpack.c.bf16 %v3901_v39, %v3897_v12  ;;  %v3914_v49 = vpack.c.bf16 %v3902_v21, %v3898_v10  ;;  %v3864_v36 = vunpack.c.1.s8 %v4958_v11  ;;  %v3868_v26 = vunpack.c.1.s8 %v4959_v29 }
 0x434   : > { %3923 = vmatpush.bf16.msra.mxu0 %v3911_v62  ;;  %3936 = vmatpush.bf16.msra.mxu1 %v3912_v9  ;;  %v3887_v0 = vcvt.s32.f32 %v3863_v1  ;;  %v3891_v57 = vcvt.s32.f32 %v3867_v32  ;;  %v3865_v56 = vunpack.c.2.s8 %v4958_v11  ;;  %v3869_v3 = vunpack.c.2.s8 %v4959_v29 }
 0x435   : > { %3949 = vmatpush.bf16.msra.mxu2 %v3913_v54  ;;  %3962 = vmatpush.bf16.msra.mxu3 %v3914_v49  ;;  %v3888_v18 = vcvt.s32.f32 %v3864_v36  ;;  %v3892_v51 = vcvt.s32.f32 %v3868_v26  ;;  %v3866_v47 = vunpack.c.3.s8 %v4958_v11  ;;  %v3870_v30 = vunpack.c.3.s8 %v4959_v29 }
 0x436   : > { %v3907_v42 = vpack.c.bf16 %v3891_v57, %v3887_v0  ;;  %v3889_v19 = vcvt.s32.f32 %v3865_v56  ;;  %v3893_v4 = vcvt.s32.f32 %v3869_v3  ;;  %v3855_v55 = vunpack.c.0.s8 %v4956_v6 }
 0x437   : > { %v3908_v43 = vpack.c.bf16 %v3892_v51, %v3888_v18  ;;  %v3890_v41 = vcvt.s32.f32 %v3866_v47  ;;  %v3894_v33 = vcvt.s32.f32 %v3870_v30  ;;  %v3859_v34 = vunpack.c.0.s8 %v4957_v17 }
 0x438   : > { %3924 = vmatpush.bf16.msra.mxu0 %v3907_v42  ;;  %v3909_v45 = vpack.c.bf16 %v3893_v4, %v3889_v19  ;;  %v3879_v5 = vcvt.s32.f32 %v3855_v55  ;;  %v3856_v27 = vunpack.c.1.s8 %v4956_v6  ;;  %v3860_v50 = vunpack.c.1.s8 %v4957_v17 }
 0x439   : > { %3937 = vmatpush.bf16.msra.mxu1 %v3908_v43  ;;  %v3910_v25 = vpack.c.bf16 %v3894_v33, %v3890_v41  ;;  %v3883_v48 = vcvt.s32.f32 %v3859_v34  ;;  %v3857_v60 = vunpack.c.2.s8 %v4956_v6  ;;  %v3861_v22 = vunpack.c.2.s8 %v4957_v17 }
 0x43a   : > { %3950 = vmatpush.bf16.msra.mxu2 %v3909_v45  ;;  %v3880_v58 = vcvt.s32.f32 %v3856_v27  ;;  %v3884_v13 = vcvt.s32.f32 %v3860_v50  ;;  %v3858_v61 = vunpack.c.3.s8 %v4956_v6  ;;  %v3862_v35 = vunpack.c.3.s8 %v4957_v17 }
 0x43b   : > { %3963 = vmatpush.bf16.msra.mxu3 %v3910_v25  ;;  %v3903_v14 = vpack.c.bf16 %v3883_v48, %v3879_v5  ;;  %v3881_v52 = vcvt.s32.f32 %v3857_v60  ;;  %v3885_v37 = vcvt.s32.f32 %v3861_v22  ;;  %v3841_v24 = vpack.c.bf16 %v4953_v31, %v4953_v31 }
 0x43c   : > { %v3904_v7 = vpack.c.bf16 %v3884_v13, %v3880_v58  ;;  %v3882_v20 = vcvt.s32.f32 %v3858_v61  ;;  %v3886_v63 = vcvt.s32.f32 %v3862_v35 }
 0x43d   : > { %3925 = vmatpush.bf16.msra.mxu0 %v3903_v14  ;;  %v3905_v38 = vpack.c.bf16 %v3885_v37, %v3881_v52 }
 0x43e   : > { %3938 = vmatpush.bf16.msra.mxu1 %v3904_v7  ;;  %v3906_v53 = vpack.c.bf16 %v3886_v63, %v3882_v20 }
 0x43f   : > { %3951 = vmatpush.bf16.msra.mxu2 %v3905_v38 }
 0x440   : > { %3964 = vmatpush.bf16.msra.mxu3 %v3906_v53  ;;  %4962 = vmatmul.msk.bf16.vlgmr.msra.gmra.mxu0 %vm772_vm2, %v3841_v24 }
 0x441   : > { %4963 = vmatmul.msk.bf16.vlgmr.msra.gmra.mxu1 %vm772_vm2, %v3841_v24 }
 0x442   : > { %4964 = vmatmul.msk.bf16.vlgmr.msra.gmra.mxu2 %vm772_vm2, %v3841_v24 }
 0x443   : > { %4965 = vmatmul.msk.bf16.vlgmr.msra.gmra.mxu3 %vm772_vm2, %v3841_v24 }
 0x4bd   : > { %v3927_v8 = vpop.f32.mrf.mxu0 }
 0x4be   : > { %v3970_v40 = vadd.f32 %v5919_v15, %v3927_v8   ;;  %v3940_v11 = vpop.f32.mrf.mxu1 }
 0x4bf   : > { %v3971_v29 = vadd.f32 %v5915_v46, %v3940_v11  }
 0x4c0   : > { %v8757_v15 = vmov %v3970_v40 }
 0x4c1   : > { %v8756_v46 = vmov %v3971_v29 }
 0x4c5   : > { %v3953_v59 = vpop.f32.mrf.mxu2  ;;  %v3929_v16 = vpop.f32.mrf.mxu0 }
 0x4c6   : > { %v3972_v23 = vadd.f32 %v5911_v2, %v3953_v59   ;;  %v3966_v28 = vpop.f32.mrf.mxu3  ;;  %v3942_v12 = vpop.f32.mrf.mxu1 }
 0x4c7   : > { %v3973_v39 = vadd.f32 %v5907_v44, %v3966_v28  }
 0x4c8   : > { %v8755_v2 = vmov %v3972_v23 }
 0x4c9   : > { %v8754_v44 = vmov %v3973_v39 }
 0x4ca   :  { %3831 = sbr.rel (!%p3829_p1) target bundleno = 1064 (0x428), region = 163 }
 0x4cd   : > { %v3955_v10 = vpop.f32.mrf.mxu2 }
 0x4ce   : > { %v3968_v21 = vpop.f32.mrf.mxu3 }
 0x4cf   :  { %5881 = dma.done.wait [#allocation5 + $0x2], 20736 }
 0x4d0   :  { %5882 = vsyncadd [#allocation5 + $0x2], 4294946560  ;;  %s8199_s29 = smov 0  }
 0x4d1 LB: > { %s3991_s30 = smul.u32 48, %s5943_s29  ;;  %s4966_s25 = sshll.u32 %s5943_s29, 1  ;;  %s5943_s29 = sphi %s8199_s29, %s3981_s29   ;;  %v5939_v40 = vphi %v3970_v40, %v8761_v40   ;;  %v5935_v29 = vphi %v3971_v29, %v8760_v29   ;;  %v5931_v23 = vphi %v3972_v23, %v8759_v23   ;;  %v5927_v39 = vphi %v3973_v39, %v8758_v39  }
 0x4d2   : > { %s4617_s26 = scalar_lea.vmem [#allocation3], %s4966_s25  ;;  %s3981_s29 = sadd.s32 1, %s5943_s29  }
 0x4d3   : > { %s3992_s12 = sshra.s32 %s3991_s30, 3  ;;  %v4967_v59 = vld [vmem:[%s4617_s26 + $0x6c] sm:$0x3]  ;;  %p3978_p2 = scmp.ge.s32.totalorder %s3981_s29, 27  }
 0x4d4   : > { %s5145_s2 = sshll.u32 %s3992_s12, 3  ;;  %s4571_s17 = sshll.u32 (%p3978_p2), %s8391_s11, 4  ;;  %s4572_s17 = int_to_ptr.hbm [resolvable:$true] %s4571_s17 }
 0x4d5   : > { %s8217_s3 = scalar_lea.vmem [#allocation4], %s5145_s2 }
 0x4d6   : > { %v4974_v15 = vld [vmem:[%s8217_s3 + $0xa40] sm:$0xff]  ;;  %v4975_v46 = vld [vmem:[%s8217_s3 + $0xa48] sm:$0xff]  ;;  %v4972_v36 = vld [vmem:[%s8217_s3 + $0xa30] sm:$0xff] }
 0x4d7   : > { %v4020_v2 = vunpack.c.0.s8 %v4974_v15  ;;  %v4024_v44 = vunpack.c.0.s8 %v4975_v46  ;;  %v4021_v62 = vunpack.c.1.s8 %v4974_v15  ;;  %v4025_v9 = vunpack.c.1.s8 %v4975_v46  ;;  %v4973_v26 = vld [vmem:[%s8217_s3 + $0xa38] sm:$0xff]  ;;  %v4970_v33 = vld [vmem:[%s8217_s3 + $0xa20] sm:$0xff]  ;;  %v4971_v50 = vld [vmem:[%s8217_s3 + $0xa28] sm:$0xff] }
 0x4d8   : > { %v4022_v1 = vunpack.c.2.s8 %v4974_v15  ;;  %v4026_v32 = vunpack.c.2.s8 %v4975_v46  ;;  %v4023_v54 = vunpack.c.3.s8 %v4974_v15  ;;  %v4027_v49 = vunpack.c.3.s8 %v4975_v46 }
 0x4d9   : > { %v4044_v6 = vcvt.s32.f32 %v4020_v2  ;;  %v4048_v0 = vcvt.s32.f32 %v4024_v44  ;;  %v4045_v57 = vcvt.s32.f32 %v4021_v62  ;;  %v4049_v56 = vcvt.s32.f32 %v4025_v9 }
 0x4da   : > { %v4046_v3 = vcvt.s32.f32 %v4022_v1  ;;  %v4050_v17 = vcvt.s32.f32 %v4026_v32  ;;  %v4047_v18 = vcvt.s32.f32 %v4023_v54  ;;  %v4051_v51 = vcvt.s32.f32 %v4027_v49 }
 0x4db   : > { %v4060_v47 = vpack.c.bf16 %v4048_v0, %v4044_v6  ;;  %v4061_v30 = vpack.c.bf16 %v4049_v56, %v4045_v57  ;;  %v4012_v42 = vunpack.c.0.s8 %v4972_v36  ;;  %v4016_v19 = vunpack.c.0.s8 %v4973_v26 }
 0x4dc   : > { %v4062_v4 = vpack.c.bf16 %v4050_v17, %v4046_v3  ;;  %v4063_v55 = vpack.c.bf16 %v4051_v51, %v4047_v18  ;;  %v4013_v43 = vunpack.c.1.s8 %v4972_v36  ;;  %v4017_v41 = vunpack.c.1.s8 %v4973_v26 }
 0x4dd   : > { %4072 = vmatpush.bf16.msra.mxu0 %v4060_v47  ;;  %4085 = vmatpush.bf16.msra.mxu1 %v4061_v30  ;;  %v4036_v34 = vcvt.s32.f32 %v4012_v42  ;;  %v4040_v45 = vcvt.s32.f32 %v4016_v19  ;;  %v4014_v5 = vunpack.c.2.s8 %v4972_v36  ;;  %v4018_v27 = vunpack.c.2.s8 %v4973_v26  ;;  %v5161_v47 = vld [vmem:[%s8389_s9 + $0x78] sm:$0xff] (%p3978_p2)  ;;  %v5176_v19 = vld [vmem:[%s8389_s9 + $0xf0] sm:$0xff] (%p3978_p2) }
 0x4de   : > { %4098 = vmatpush.bf16.msra.mxu2 %v4062_v4  ;;  %4111 = vmatpush.bf16.msra.mxu3 %v4063_v55  ;;  %v4037_v25 = vcvt.s32.f32 %v4013_v43  ;;  %v4041_v48 = vcvt.s32.f32 %v4017_v41  ;;  %v4015_v60 = vunpack.c.3.s8 %v4972_v36  ;;  %v4019_v22 = vunpack.c.3.s8 %v4973_v26  ;;  %v5169_v30 = vld [vmem:[%s8389_s9 + $0xb8] sm:$0xff] (%p3978_p2)  ;;  %v5151_v4 = vld [vmem:[%s8389_s9 + $0x28] sm:$0xff] (%p3978_p2) }
 0x4df   : > { %v4056_v31 = vpack.c.bf16 %v4040_v45, %v4036_v34  ;;  %v4038_v58 = vcvt.s32.f32 %v4014_v5  ;;  %v4042_v13 = vcvt.s32.f32 %v4018_v27  ;;  %v4004_v61 = vunpack.c.0.s8 %v4970_v33  ;;  %v5177_v42 = vld [vmem:[%s8389_s9 + $0xf8] sm:$0xff] (%p3978_p2)  ;;  %v5159_v55 = vld [vmem:[%s8389_s9 + $0x68] sm:$0xff] (%p3978_p2)  ;;  %v5158_v34 = vld [vmem:[%s8389_s9 + $0x60] sm:$0xff] (%p3978_p2) }
 0x4e0   : > { %v4057_v35 = vpack.c.bf16 %v4041_v48, %v4037_v25  ;;  %v4039_v14 = vcvt.s32.f32 %v4015_v60  ;;  %v4043_v52 = vcvt.s32.f32 %v4019_v22  ;;  %v4008_v37 = vunpack.c.0.s8 %v4971_v50  ;;  %v5167_v43 = vld [vmem:[%s8389_s9 + $0xa8] sm:$0xff] (%p3978_p2)  ;;  %v5166_v45 = vld [vmem:[%s8389_s9 + $0xa0] sm:$0xff] (%p3978_p2)  ;;  %v4123_v27 = vld [vmem:[#allocation15] sm:$0xf] (%p3978_p2) }
 0x4e1   : > { %4073 = vmatpush.bf16.msra.mxu0 %v4056_v31  ;;  %v4058_v7 = vpack.c.bf16 %v4042_v13, %v4038_v58  ;;  %v4028_v20 = vcvt.s32.f32 %v4004_v61  ;;  %v4005_v63 = vunpack.c.1.s8 %v4970_v33  ;;  %v4009_v24 = vunpack.c.1.s8 %v4971_v50  ;;  %v5175_v41 = vld [vmem:[%s8389_s9 + $0xe8] sm:$0xff] (%p3978_p2)  ;;  %v5174_v5 = vld [vmem:[%s8389_s9 + $0xe0] sm:$0xff] (%p3978_p2) }
 0x4e2   : > { %4086 = vmatpush.bf16.msra.mxu1 %v4057_v35  ;;  %v4059_v38 = vpack.c.bf16 %v4043_v52, %v4039_v14  ;;  %v4032_v53 = vcvt.s32.f32 %v4008_v37  ;;  %v4006_v8 = vunpack.c.2.s8 %v4970_v33  ;;  %v4010_v11 = vunpack.c.2.s8 %v4971_v50  ;;  %v4137_v25 = vld [vmem:[#allocation17] sm:$0xf] (%p3978_p2) }
 0x4e3   : > { %4099 = vmatpush.bf16.msra.mxu2 %v4058_v7  ;;  %v4029_v16 = vcvt.s32.f32 %v4005_v63  ;;  %v4033_v28 = vcvt.s32.f32 %v4009_v24  ;;  %v4007_v12 = vunpack.c.3.s8 %v4970_v33  ;;  %v4011_v10 = vunpack.c.3.s8 %v4971_v50  ;;  %v5150_v33 = vld [vmem:[%s8389_s9 + $0x20] sm:$0xff] (%p3978_p2)  ;;  %v5149_v7 = vld [vmem:[%s8389_s9 + $0x18] sm:$0xff] (%p3978_p2) }
 0x4e4   : > { %4112 = vmatpush.bf16.msra.mxu3 %v4059_v38  ;;  %v4052_v21 = vpack.c.bf16 %v4032_v53, %v4028_v20  ;;  %v4030_v15 = vcvt.s32.f32 %v4006_v8  ;;  %v4034_v46 = vcvt.s32.f32 %v4010_v11  ;;  %v3990_v9 = vpack.c.bf16 %v4967_v59, %v4967_v59  ;;  %v5157_v20 = vld [vmem:[%s8389_s9 + $0x58] sm:$0xff] (%p3978_p2) }
 0x4e5   : > { %v4053_v2 = vpack.c.bf16 %v4033_v28, %v4029_v16  ;;  %v4031_v44 = vcvt.s32.f32 %v4007_v12  ;;  %v4035_v62 = vcvt.s32.f32 %v4011_v10  ;;  %v4125_v50 = vperm.slane (%p3978_p2), %v4123_v27, 0  ;;  %v5165_v63 = vld [vmem:[%s8389_s9 + $0x98] sm:$0xff] (%p3978_p2)  ;;  %v5148_v12 = vld [vmem:[%s8389_s9 + $0x10] sm:$0xff] (%p3978_p2) }
 0x4e6   : > { %4074 = vmatpush.bf16.msra.mxu0 %v4052_v21  ;;  %v4054_v1 = vpack.c.bf16 %v4034_v46, %v4030_v15  ;;  %v4126_v48 = vperm.slane (%p3978_p2), %v4123_v27, 1  ;;  %v4127_v60 = vperm.slane (%p3978_p2), %v4123_v27, 2  ;;  %v4128_v22 = vperm.slane (%p3978_p2), %v4123_v27, 3  ;;  %v5173_v24 = vld [vmem:[%s8389_s9 + $0xd8] sm:$0xff] (%p3978_p2)  ;;  %v5156_v10 = vld [vmem:[%s8389_s9 + $0x50] sm:$0xff] (%p3978_p2) }
 0x4e7   : > { %4087 = vmatpush.bf16.msra.mxu1 %v4053_v2  ;;  %v4055_v32 = vpack.c.bf16 %v4035_v62, %v4031_v44  ;;  %v4139_v31 = vperm.slane (%p3978_p2), %v4137_v25, 0  ;;  %v4140_v58 = vperm.slane (%p3978_p2), %v4137_v25, 1  ;;  %v4141_v13 = vperm.slane (%p3978_p2), %v4137_v25, 2  ;;  %v5164_v15 = vld [vmem:[%s8389_s9 + $0x90] sm:$0xff] (%p3978_p2)  ;;  %v5147_v2 = vld [vmem:[%s8389_s9 + $0x8] sm:$0xff] (%p3978_p2) }
 0x4e8   : > { %4100 = vmatpush.bf16.msra.mxu2 %v4054_v1  ;;  %v4142_v61 = vperm.slane (%p3978_p2), %v4137_v25, 3  ;;  %v5172_v46 = vld [vmem:[%s8389_s9 + $0xd0] sm:$0xff] (%p3978_p2)  ;;  %v5155_v44 = vld [vmem:[%s8389_s9 + $0x48] sm:$0xff] (%p3978_p2) }
 0x4e9   : > { %4113 = vmatpush.bf16.msra.mxu3 %v4055_v32  ;;  %4976 = vmatmul.msk.bf16.vlgmr.msra.gmra.mxu0 %vm772_vm2, %v3990_v9  ;;  %v5163_v62 = vld [vmem:[%s8389_s9 + $0x88] sm:$0xff] (%p3978_p2) }
 0x4ea   : > { %4977 = vmatmul.msk.bf16.vlgmr.msra.gmra.mxu1 %vm772_vm2, %v3990_v9 }
 0x4eb   : > { %4978 = vmatmul.msk.bf16.vlgmr.msra.gmra.mxu2 %vm772_vm2, %v3990_v9  ;;  %4504 = vmatpush.bf16.msra.mxu1 (%p3978_p2), %v5161_v47 }
 0x4ec   : > { %4979 = vmatmul.msk.bf16.vlgmr.msra.gmra.mxu3 %vm772_vm2, %v3990_v9  ;;  %4517 = vmatpush.bf16.msra.mxu2 (%p3978_p2), %v5169_v30  ;;  %v5171_v9 = vld [vmem:[%s8389_s9 + $0xc8] sm:$0xff] (%p3978_p2) }
 0x4ed   :  { %4530 = vmatpush.bf16.msra.mxu3 (%p3978_p2), %v5177_v42 }
 0x4f1   :  { %4531 = vmatpush.bf16.msra.mxu3 (%p3978_p2), %v5176_v19 }
 0x4f5   :  { %4532 = vmatpush.bf16.msra.mxu3 (%p3978_p2), %v5175_v41 }
 0x4f9   :  { %4533 = vmatpush.bf16.msra.mxu3 (%p3978_p2), %v5174_v5 }
 0x4fd   :  { %4534 = vmatpush.bf16.msra.mxu3 (%p3978_p2), %v5173_v24 }
 0x501   :  { %4535 = vmatpush.bf16.msra.mxu3 (%p3978_p2), %v5172_v46 }
 0x505   :  { %4536 = vmatpush.bf16.msra.mxu3 (%p3978_p2), %v5171_v9 }
 0x566   : > { %v4076_v54 = vpop.f32.mrf.mxu0 }
 0x567   : > { %v4119_v49 = vadd.f32 %v5939_v40, %v4076_v54   ;;  %v4089_v36 = vpop.f32.mrf.mxu1  ;;  %v5146_v54 = vld [vmem:[%s8389_s9] sm:$0xff] (%p3978_p2) }
 0x568   : > { %v4120_v26 = vadd.f32 %v5935_v29, %v4089_v36  }
 0x569   : > { %v8761_v40 = vmov %v4119_v49  ;;  %v4133_v35 = vmul.f32 (%p3978_p2), %v4125_v50, %v4119_v49  ;;  %v5154_v49 = vld [vmem:[%s8389_s9 + $0x40] sm:$0xff] (%p3978_p2) }
 0x56a   : > { %v8760_v29 = vmov %v4120_v26  ;;  %v5153_v40 = vld [vmem:[%s8389_s9 + $0x38] sm:$0xff] (%p3978_p2)  ;;  %v4134_v14 = vmul.f32 (%p3978_p2), %v4126_v48, %v4120_v26 }
 0x56b   :  { %4491 = vmatpush.bf16.msra.mxu0 (%p3978_p2), %v5153_v40  ;;  %v5152_v29 = vld [vmem:[%s8389_s9 + $0x30] sm:$0xff] (%p3978_p2)  ;;  %v4147_v38 = vadd.f32 (%p3978_p2), %v4139_v31, %v4133_v35 }
 0x56c   :  { %v4148_v53 = vadd.f32 (%p3978_p2), %v4140_v58, %v4134_v14 }
 0x56d   :  { %v4980_v59 = vmul.f32 (%p3978_p2), -1.442695, %v4147_v38 }
 0x56e   : > { %v4102_v6 = vpop.f32.mrf.mxu2  ;;  %v4078_v0 = vpop.f32.mrf.mxu0  ;;  %v4981_v16 = vmul.f32 (%p3978_p2), -1.442695, %v4148_v53 }
 0x56f   : > { %v4121_v57 = vadd.f32 %v5931_v23, %v4102_v6   ;;  %v4115_v56 = vpop.f32.mrf.mxu3  ;;  %v4091_v3 = vpop.f32.mrf.mxu1  ;;  %4492 = vmatpush.bf16.msra.mxu0 (%p3978_p2), %v5152_v29  ;;  %5499 = vpow2.f32 (%p3978_p2), %v4980_v59  ;;  %v5162_v6 = vld [vmem:[%s8389_s9 + $0x80] sm:$0xff] (%p3978_p2) }
 0x570   : > { %v4122_v17 = vadd.f32 %v5927_v39, %v4115_v56   ;;  %5501 = vpow2.f32 (%p3978_p2), %v4981_v16  ;;  %v5170_v0 = vld [vmem:[%s8389_s9 + $0xc0] sm:$0xff] (%p3978_p2) }
 0x571   : > { %v8759_v23 = vmov %v4121_v57  ;;  %v4135_v52 = vmul.f32 (%p3978_p2), %v4127_v60, %v4121_v57  ;;  %4537 = vmatpush.bf16.msra.mxu3 (%p3978_p2), %v5170_v0 }
 0x572   : > { %v8758_v39 = vmov %v4122_v17  ;;  %v5160_v23 = vld [vmem:[%s8389_s9 + $0x70] sm:$0xff] (%p3978_p2)  ;;  %v4136_v37 = vmul.f32 (%p3978_p2), %v4128_v22, %v4122_v17 }
 0x573   :  { %3980 = sbr.rel (!%p3978_p2) target bundleno = 1233 (0x4d1), region = 174  ;;  %v5168_v39 = vld [vmem:[%s8389_s9 + $0xb0] sm:$0xff] (%p3978_p2)  ;;  %4505 = vmatpush.bf16.msra.mxu1 (%p3978_p2), %v5160_v23  ;;  %4493 = vmatpush.bf16.msra.mxu0 (%p3978_p2), %v5151_v4  ;;  %v4149_v8 = vadd.f32 (%p3978_p2), %v4141_v13, %v4135_v52  ;;  %s5962_s9 = smov (%p3978_p2), [#allocation20]  }
 0x574   :  { %4518 = vmatpush.bf16.msra.mxu2 (%p3978_p2), %v5168_v39  ;;  %v4150_v11 = vadd.f32 (%p3978_p2), %v4142_v61, %v4136_v37  ;;  %s4569_s6 = sshll.u32 (%p3978_p2), %s5962_s9, 4  ;;  %s4570_s6 = int_to_ptr.vmem [resolvable:$true] %s4569_s6 }
 0x575   :  { %v4982_v28 = vmul.f32 (%p3978_p2), -1.442695, %v4149_v8  ;;  %v5500_v1 = vpop.eup (%p3978_p2), %5499 }
 0x576   : > { %v4104_v18 = vpop.f32.mrf.mxu2  ;;  %v4983_v21 = vmul.f32 (%p3978_p2), -1.442695, %v4150_v11  ;;  %v5502_v32 = vpop.eup (%p3978_p2), %5501  ;;  %v4163_v36 = vadd.f32 (%p3978_p2), 1.0, %v5500_v1 }
 0x577   : > { %v4117_v51 = vpop.f32.mrf.mxu3  ;;  %4506 = vmatpush.bf16.msra.mxu1 (%p3978_p2), %v5159_v55  ;;  %4494 = vmatpush.bf16.msra.mxu0 (%p3978_p2), %v5150_v33  ;;  %5503 = vpow2.f32 (%p3978_p2), %v4982_v28  ;;  %v4164_v57 = vadd.f32 (%p3978_p2), 1.0, %v5502_v32 }
 0x578   :  { %4519 = vmatpush.bf16.msra.mxu2 %v5167_v43  ;;  %5505 = vpow2.f32 %v4983_v21  ;;  %v4176_v18 = vand.u32 2147483647, %v4163_v36  ;;  %v4178_v51 = vand.u32 2147483648, %v4163_v36  ;;  %vm4172_vm2 = vweird.f32 %v4163_v36 }
 0x579   :  { %5507 = vrcp.f32 %v4163_v36  ;;  %v4191_v47 = vand.u32 2147483647, %v4164_v57  ;;  %v4193_v30 = vand.u32 2147483648, %v4164_v57  ;;  %vm4187_vm8 = vweird.f32 %v4164_v57 }
 0x57a   :  { %5509 = vrcp.f32 %v4164_v57  ;;  %vm8343_vm14 = vcmp.eq.f32.partialorder %v4176_v18, 8.507059e+37  ;;  %v4179_v4 = vor.u32 1.1754944e-38, %v4178_v51 }
 0x57b   :  { %4507 = vmatpush.bf16.msra.mxu1 %v5158_v34  ;;  %4495 = vmatpush.bf16.msra.mxu0 %v5149_v7  ;;  %vm8347_vm0 = vcmp.eq.f32.partialorder %v4191_v47, 8.507059e+37  ;;  %v4194_v33 = vor.u32 1.1754944e-38, %v4193_v30 }
 0x57c   :  { %4520 = vmatpush.bf16.msra.mxu2 %v5166_v45 }
 0x57d   :  { %v5504_v26 = vpop.eup %5503 }
 0x57e   :  { %v5506_v56 = vpop.eup %5505  ;;  %v4165_v3 = vadd.f32 1.0, %v5504_v26 }
 0x57f   :  { %4508 = vmatpush.bf16.msra.mxu1 %v5157_v20  ;;  %4496 = vmatpush.bf16.msra.mxu0 %v5148_v12  ;;  %v4166_v17 = vadd.f32 1.0, %v5506_v56  ;;  %v5508_v40 = vpop.eup %5507 }
 0x580   :  { %4521 = vmatpush.bf16.msra.mxu2 %v5165_v63  ;;  %5511 = vrcp.f32 %v4165_v3  ;;  %v5510_v42 = vpop.eup %5509  ;;  %v4168_v29 = vmul.f32 %v5508_v40, %v4163_v36  ;;  %vm4173_vm13 = vweird.f32 %v5508_v40  ;;  %vm4202_vm1 = vweird.f32 %v4165_v3 }
 0x581   :  { %5513 = vrcp.f32 %v4166_v17  ;;  %v4183_v23 = vmul.f32 %v5510_v42, %v4164_v57  ;;  %vm4188_vm15 = vweird.f32 %v5510_v42  ;;  %v4206_v27 = vand.u32 2147483647, %v4165_v3  ;;  %vm8352_vm3 = vmor %vm4172_vm2, %vm4173_vm13 }
 0x582   :  { %v4169_v39 = vsub.f32 1.0, %v4168_v29  ;;  %v4208_v48 = vand.u32 2147483648, %v4165_v3  ;;  %vm4217_vm4 = vweird.f32 %v4166_v17  ;;  %vm8357_vm5 = vmor %vm4187_vm8, %vm4188_vm15  ;;  %v4223_v13 = vand.u32 2147483648, %v4166_v17 }
 0x583   :  { %4509 = vmatpush.bf16.msra.mxu1 %v5156_v10  ;;  %4497 = vmatpush.bf16.msra.mxu0 %v5147_v2  ;;  %v4184_v43 = vsub.f32 1.0, %v4183_v23  ;;  %v4221_v14 = vand.u32 2147483647, %v4166_v17  ;;  %vm8363_vm9 = vcmp.eq.f32.partialorder %v4206_v27, 8.507059e+37 }
 0x584   :  { %4522 = vmatpush.bf16.msra.mxu2 %v5164_v15  ;;  %v4170_v45 = vmul.f32 %v5508_v40, %v4169_v39  ;;  %v4209_v24 = vor.u32 1.1754944e-38, %v4208_v48  ;;  %v4224_v59 = vor.u32 1.1754944e-38, %v4223_v13 }
 0x585   :  { %v4185_v25 = vmul.f32 %v5510_v42, %v4184_v43  ;;  %vm4222_vm12 = vcmp.eq.f32.partialorder %v4221_v14, 8.507059e+37 }
 0x586   :  { %v5512_v55 = vpop.eup %5511  ;;  %v4171_v22 = vadd.f32 %v5508_v40, %v4170_v45 }
 0x587   :  { %4510 = vmatpush.bf16.msra.mxu1 %v5155_v44  ;;  %4498 = vmatpush.bf16.msra.mxu0 %v5146_v54  ;;  %v5514_v34 = vpop.eup %5513  ;;  %v4198_v5 = vmul.f32 %v5512_v55, %v4165_v3  ;;  %vm4203_vm6 = vweird.f32 %v5512_v55  ;;  %v4186_v61 = vadd.f32 %v5510_v42, %v4185_v25  ;;  %v5498_v44 = vld [vmem:[#allocation18] ss:$0 sm:$0xff] }
 0x588   :  { %4523 = vmatpush.bf16.msra.mxu2 %v5163_v62  ;;  %v4213_v60 = vmul.f32 %v5514_v34, %v4166_v17  ;;  %vm4218_vm7 = vweird.f32 %v5514_v34  ;;  %v4175_v52 = vsel %vm8352_vm3, %v5508_v40, %v4171_v22  ;;  %vm4204_vm10 = vmor %vm4202_vm1, %vm4203_vm6 }
 0x589   :  { %v4199_v58 = vsub.f32 1.0, %v4198_v5  ;;  %v4180_v20 = vsel %vm8343_vm14, %v4179_v4, %v4175_v52  ;;  %v4190_v63 = vsel %vm8357_vm5, %v5510_v42, %v4186_v61  ;;  %vm4219_vm11 = vmor %vm4217_vm4, %vm4218_vm7  ;;  %vm4562_vm14 = vcmask 656384  }
 0x58a   :  { %v4214_v35 = vsub.f32 1.0, %v4213_v60  ;;  %v4227_v53 = vpack.c.bf16 %v4180_v20, %v4180_v20  ;;  %v4195_v8 = vsel %vm8347_vm0, %v4194_v33, %v4190_v63 }
 0x58b   :  { %4511 = vmatpush.bf16.msra.mxu1 %v5154_v49  ;;  %v4200_v37 = vmul.f32 %v5512_v55, %v4199_v58  ;;  %v4228_v16 = vpack.c.bf16 %v4195_v8, %v4195_v8 }
 0x58c   :  { %4524 = vmatpush.bf16.msra.mxu2 %v5162_v6  ;;  %v4215_v38 = vmul.f32 %v5514_v34, %v4214_v35  ;;  %4499 = vmatmul.bf16.vlgmr.msra.gmra.mxu0 %v4227_v53 }
 0x58d   :  { %v4201_v11 = vadd.f32 %v5512_v55, %v4200_v37 }
 0x58e   :  { %v4216_v28 = vadd.f32 %v5514_v34, %v4215_v38  ;;  %4512 = vmatmul.bf16.vlgmr.msra.gmra.mxu1 %v4228_v16 }
 0x58f   :  { %v4205_v12 = vsel %vm4204_vm10, %v5512_v55, %v4201_v11 }
 0x590   :  { %v4210_v10 = vsel %vm8363_vm9, %v4209_v24, %v4205_v12  ;;  %v4220_v21 = vsel %vm4219_vm11, %v5514_v34, %v4216_v28 }
 0x591   :  { %v4229_v15 = vpack.c.bf16 %v4210_v10, %v4210_v10  ;;  %v4225_v46 = vsel %vm4222_vm12, %v4224_v59, %v4220_v21 }
 0x592   :  { %v4230_v2 = vpack.c.bf16 %v4225_v46, %v4225_v46 }
 0x593   :  { %4525 = vmatmul.bf16.vlgmr.msra.gmra.mxu2 %v4229_v15 }
 0x594   :  { %4538 = vmatmul.bf16.vlgmr.msra.gmra.mxu3 %v4230_v2 }
 0x609   :  { %v4500_v62 = vpop.f32.mrf.mxu0 }
 0x60a   :  { %v4501_v1 = vadd.f32 %v5498_v44, %v4500_v62 }
 0x60b   :  { %v4513_v9 = vpop.f32.mrf.mxu1 }
 0x60c   :  { %v4514_v32 = vadd.f32 %v4513_v9, %v4501_v1 }
 0x611   :  { %v4502_v54 = vpop.f32.mrf.mxu0 }
 0x613   :  { %v4515_v49 = vpop.f32.mrf.mxu1 }
 0x616   :  { %v4526_v36 = vpop.f32.mrf.mxu2 }
 0x617   :  { %v4527_v26 = vadd.f32 %v4526_v36, %v4514_v32  ;;  %v4539_v6 = vpop.f32.mrf.mxu3 }
 0x619   :  { %v4540_v0 = vadd.f32 %v4539_v6, %v4527_v26 }
 0x61b   :  { %v5112_v57 = vmul.f32 -1.442695, %v4540_v0 }
 0x61d   :  { %5515 = vpow2.f32 %v5112_v57 }
 0x61e   :  { %v4528_v56 = vpop.f32.mrf.mxu2 }
 0x61f   :  { %v4541_v3 = vpop.f32.mrf.mxu3 }
 0x623   :  { %v5516_v17 = vpop.eup %5515 }
 0x624   :  { %v4546_v18 = vadd.f32 1.0, %v5516_v17 }
 0x626   :  { %5517 = vrcp.f32 %v4546_v18  ;;  %v4558_v30 = vand.u32 2147483648, %v4546_v18  ;;  %v4556_v29 = vand.u32 2147483647, %v4546_v18  ;;  %vm4552_vm8 = vweird.f32 %v4546_v18 }
 0x628   :  { %v4559_v39 = vor.u32 1.1754944e-38, %v4558_v30  ;;  %vm4557_vm15 = vcmp.eq.f32.partialorder %v4556_v29, 8.507059e+37 }
 0x62c   :  { %v5518_v51 = vpop.eup %5517 }
 0x62d   :  { %v4548_v40 = vmul.f32 %v5518_v51, %v4546_v18  ;;  %vm4553_vm2 = vweird.f32 %v5518_v51 }
 0x62e   :  { %vm4554_vm13 = vmor %vm4552_vm8, %vm4553_vm2 }
 0x62f   :  { %v4549_v47 = vsub.f32 1.0, %v4548_v40 }
 0x631   :  { %v4550_v42 = vmul.f32 %v5518_v51, %v4549_v47 }
 0x633   :  { %v4551_v23 = vadd.f32 %v5518_v51, %v4550_v42 }
 0x635   :  { %v4555_v19 = vsel %vm4554_vm13, %v5518_v51, %v4551_v23 }
 0x636   :  { %v4560_v4 = vsel %vm4557_vm15, %v4559_v39, %v4555_v19 }
 0x637   :  { %4563 = vst.msk [vmem:[#allocation20] sm:$0x3] %vm4562_vm14, %v4560_v4 }
 0x638   :  { %4574 = dma.vmem_to_hbm [thread:$0]  %s4570_s6, 32, %s4572_s17, [#allocation8]  }
 0x639   :  { %5883 = dma.done.wait [#allocation8], 32  }
 0x63a   :  { %5884 = vsyncadd [#allocation8], 4294967264 }
 0x63b   :  { %4579 = vsyncpa [#allocation7], 1 }
 0x63c   :  { %4580 = vsyncpa [#allocation10], 1 }
 0x63d   :  { %4581 = vsyncpa [#allocation13], 1 }
 0x63e   :  { %4582 = vsyncpa [#allocation16], 1 }
 0x63f   :  { %4583 = vsyncpa [#allocation19], 1 }
 0x640   :  { %4584 = vsyncpa [#allocation8], 1 }
 0x641   :  { %4585 = vsyncmov [#allocation5] }
 0x644   :  { %s4586_s11 = vpop.sfrf %4585 }
 0x645   :  { %p5113_p3 = scmp.ne.s32.totalorder %s4586_s11, 0 }
 0x647   :  { %4590 = shalt.err (%p5113_p3)  }
 0x648   :  { %4592 = vsyncmov [#allocation5 + $0x1] }
 0x64b   :  { %s4593_s18 = vpop.sfrf %4592 }
 0x64c   :  { %p5114_p4 = scmp.ne.s32.totalorder %s4593_s18, 0 }
 0x64e   :  { %4597 = shalt.err (%p5114_p4)  }
 0x64f   :  { %4599 = vsyncmov [#allocation5 + $0x2] }
 0x652   :  { %s4600_s19 = vpop.sfrf %4599 }
 0x653   :  { %p5115_p5 = scmp.ne.s32.totalorder %s4600_s19, 0 }
 0x655   :  { %4604 = shalt.err (%p5115_p5)  }

</bundles_post_ra>
